<compile_context>
chip_gen: v7x
topology: tpu7x:2x2x1
jax: 0.10.0
libtpu: 0.0.40
codegen_flags: <defaults>
</compile_context>

<pallas_src>
import functools

import jax
import jax.numpy as jnp
from jax.experimental import pallas as pl
from jax.experimental.pallas import tpu as pltpu


_VMEM_BUDGET = 16 * 1024 * 1024   # target working set (safe on v5e/v6e/v7x)
_VMEM_LIMIT = 40 * 1024 * 1024    # scoped VMEM cap handed to Mosaic
_WPAD = 8                         # tile-aligned zero border on the W axis


def _conv3x3_kernel(x_ref, top_ref, bot_ref, w_ref, b_ref, o_ref, acc_ref, *,
                    apply_silu: bool, fold_w: bool):
    """One H-tile of a 3x3 / stride-1 / pad-1 conv (+ optional fused SiLU).

    x_ref  : (1, tH, W, Cin)   bf16 input tile (no halo, no padding)
    top_ref: (1, 1, W, Cin)    bf16 row directly above the tile (zeros at edge)
    bot_ref: (1, 1, W, Cin)    bf16 row directly below the tile (zeros at edge)
    w_ref  : (3, 3*Cin, Cout)  bf16 weights, W-taps folded into K
    b_ref  : (1, Cout)         f32 bias
    o_ref  : (1, tH, W, Cout)  bf16 output tile
    acc_ref: (tH*W, Cout)      f32 VMEM accumulator scratch
    """
    _, tH, W, Cout = o_ref.shape
    Cin = x_ref.shape[3]
    M = tH * W

    # Assemble the zero-padded tile in VMEM.
    #  rows: outer-dim concat (free);  cols: 8-wide aligned zero borders.
    xrows = jnp.concatenate([top_ref[0], x_ref[0], bot_ref[0]], axis=0)
    zcols = jnp.zeros((tH + 2, _WPAD, Cin), xrows.dtype)
    xp = jnp.concatenate([zcols, xrows, zcols], axis=1)   # (tH+2, W+16, Cin)

    for dh in range(3):                                    # unrolled H-taps
        if fold_w:
            # Fold the 3 W-taps into the contraction: K = 3*Cin.
            parts = [xp[dh:dh + tH, _WPAD - 1 + dw:_WPAD - 1 + dw + W, :]
                     for dw in range(3)]
            patch = jnp.concatenate(parts, axis=-1).reshape(M, 3 * Cin)
            contrib = jnp.dot(patch, w_ref[dh],
                              preferred_element_type=jnp.float32)
            if dh == 0:
                acc_ref[...] = contrib
            else:
                acc_ref[...] += contrib
        else:
            for dw in range(3):
                patch = xp[dh:dh + tH,
                           _WPAD - 1 + dw:_WPAD - 1 + dw + W, :].reshape(M, Cin)
                w_tap = w_ref[dh, dw * Cin:(dw + 1) * Cin, :]
                contrib = jnp.dot(patch, w_tap,
                                  preferred_element_type=jnp.float32)
                if dh == 0 and dw == 0:
                    acc_ref[...] = contrib
                else:
                    acc_ref[...] += contrib

    y = acc_ref[...] + b_ref[...]                          # f32
    if apply_silu:
        y = y * jax.nn.sigmoid(y)                          # SiLU in f32
    o_ref[0] = y.reshape(tH, W, Cout).astype(o_ref.dtype)


def _pick_tile_h(H, W, Cin, Cout, itemsize=2):
    """Largest divisor of H whose per-tile working set fits the VMEM budget."""
    def est(tH):
        M = tH * W
        inp = 2 * tH * W * Cin * itemsize                 # double-buffered in
        halo = 4 * W * Cin * itemsize                     # halo rows (2x dbuf)
        out = 2 * M * Cout * itemsize                     # double-buffered out
        acc = M * Cout * 4                                # f32 accumulator
        xpv = (tH + 2) * (W + 2 * _WPAD) * Cin * itemsize  # assembled pad tile
        tmp = M * Cout * 4 + 2 * M * 3 * Cin * itemsize   # dot result + patch
        wgt = 2 * (9 * Cin * Cout * itemsize + 4 * Cout)  # resident weights
        return inp + halo + out + acc + xpv + tmp + wgt

    for tH in range(H, 0, -1):
        if H % tH == 0 and est(tH) <= _VMEM_BUDGET:
            return tH
    return 1


def conv3x3_same(x_nhwc, w, b, *, apply_silu: bool):
    """3x3 stride-1 'same' conv (+ optional fused SiLU). NHWC, bf16 in/out."""
    x = x_nhwc.astype(jnp.bfloat16)
    N, H, W, Cin = x.shape
    Cout = w.shape[-1]

    tH = _pick_tile_h(H, W, Cin, Cout)
    nH = H // tH

    # Thin halo-row arrays (N, nH, W, Cin): the row just above / below each
    # H-tile (zeros at the image border).  Only ~2/tH of one activation of
    # extra HBM traffic; the bulk tensor is consumed in place by BlockSpec.
    zrow = jnp.zeros((N, 1, W, Cin), x.dtype)
    if nH > 1:
        tops = x[:, tH - 1::tH, :, :][:, :nH - 1]          # rows h*tH - 1
        bots = x[:, tH::tH, :, :]                          # rows (h+1)*tH
        halo_top = jnp.concatenate([zrow, tops], axis=1)
        halo_bot = jnp.concatenate([bots, zrow], axis=1)
    else:
        halo_top = zrow
        halo_bot = zrow

    wf = w.reshape(3, 3 * Cin, Cout).astype(jnp.bfloat16)
    bf = b.reshape(1, Cout).astype(jnp.float32)

    fold_w = (Cin % 8 == 0)   # lane-concat K-fold; skip for tiny Cin (conv_in)
    kernel = functools.partial(_conv3x3_kernel,
                               apply_silu=apply_silu, fold_w=fold_w)

    out = pl.pallas_call(
        kernel,
        out_shape=jax.ShapeDtypeStruct((N, H, W, Cout), jnp.bfloat16),
        grid_spec=pltpu.PrefetchScalarGridSpec(
            num_scalar_prefetch=0,
            grid=(N, nH),
            in_specs=[
                pl.BlockSpec((1, tH, W, Cin), lambda n, h: (n, h, 0, 0)),
                pl.BlockSpec((1, 1, W, Cin), lambda n, h: (n, h, 0, 0)),
                pl.BlockSpec((1, 1, W, Cin), lambda n, h: (n, h, 0, 0)),
                pl.BlockSpec((3, 3 * Cin, Cout), lambda n, h: (0, 0, 0)),
                pl.BlockSpec((1, Cout), lambda n, h: (0, 0)),
            ],
            out_specs=pl.BlockSpec((1, tH, W, Cout), lambda n, h: (n, h, 0, 0)),
            scratch_shapes=[pltpu.VMEM((tH * W, Cout), jnp.float32)],
        ),
        compiler_params=pltpu.CompilerParams(
            dimension_semantics=("parallel", "parallel"),
            vmem_limit_bytes=_VMEM_LIMIT),
    )(x, halo_top, halo_bot, wf, bf)

    return out


def init_params(key,
                conditioning_embedding_channels,
                conditioning_channels=3,
                block_out_channels=(16, 32, 96, 256)):
    """Deterministic synthetic params.  Weights stored as (3,3,Cin,Cout) f32."""
    def conv_param(k, cin, cout, zero=False):
        if zero:  # zero_module(conv_out): weights and bias all zeros
            return (jnp.zeros((3, 3, cin, cout), jnp.float32),
                    jnp.zeros((cout,), jnp.float32))
        kw, kb = jax.random.split(k)
        scale = 1.5 / jnp.sqrt(9.0 * cin)   # keep activation magnitudes healthy
        w = scale * jax.random.normal(kw, (3, 3, cin, cout), jnp.float32)
        b = 0.1 * jax.random.normal(kb, (cout,), jnp.float32)
        return w, b

    n_convs = 2 * len(block_out_channels)  # conv_in + 2*(L-1) blocks + conv_out
    keys = jax.random.split(key, n_convs)
    params, ki = [], 0
    params.append(conv_param(keys[ki], conditioning_channels,
                             block_out_channels[0])); ki += 1
    for i in range(len(block_out_channels) - 1):
        cin, cout = block_out_channels[i], block_out_channels[i + 1]
        params.append(conv_param(keys[ki], cin, cin)); ki += 1
        params.append(conv_param(keys[ki], cin, cout)); ki += 1
    params.append(conv_param(keys[ki], block_out_channels[-1],
                             conditioning_embedding_channels, zero=True))
    return params


def _forward_nhwc(x_nhwc, params, silu_flags):
    h = x_nhwc.astype(jnp.bfloat16)
    for (w, b), act in zip(params, silu_flags):
        h = conv3x3_same(h, w, b, apply_silu=act)
    return h


def controlnet_conditioning_embedding(x_nchw, params):
    """Matches ControlNetConditioningEmbedding.forward. NCHW in / NCHW out."""
    silu_flags = [True] * (len(params) - 1) + [False]  # no SiLU after conv_out
    x = jnp.transpose(x_nchw, (0, 2, 3, 1))            # NCHW -> NHWC
    y = _forward_nhwc(x, params, silu_flags)
    return jnp.transpose(y, (0, 3, 1, 2)).astype(jnp.float32)


# ---- pure-JAX reference (same bf16-activation / f32-accum recipe) ----
def _ref_forward_nchw(x_nchw, params, silu_flags):
    h = x_nchw.astype(jnp.bfloat16)
    for (w, b), act in zip(params, silu_flags):
        w_oihw = jnp.transpose(w, (3, 2, 0, 1)).astype(jnp.bfloat16)
        y = jax.lax.conv_general_dilated(
            h, w_oihw, window_strides=(1, 1), padding=((1, 1), (1, 1)),
            dimension_numbers=("NCHW", "OIHW", "NCHW"),
            preferred_element_type=jnp.float32)
        y = y + b.reshape(1, -1, 1, 1)
        if act:
            y = y * jax.nn.sigmoid(y)
        h = y.astype(jnp.bfloat16)
    return h.astype(jnp.float32)


if __name__ == "__main__":
    key = jax.random.PRNGKey(0)
    k_x, k_p = jax.random.split(key)

    # Small example consistent with the module: NCHW conditioning image.
    N, C, H, W = 2, 3, 16, 16
    emb_channels = 32
    x = jax.random.normal(k_x, (N, C, H, W), jnp.float32)
    params = init_params(k_p, conditioning_embedding_channels=emb_channels)
    silu_flags = [True] * (len(params) - 1) + [False]

    out = controlnet_conditioning_embedding(x, params)
    out = jax.block_until_ready(out)
    assert out.shape == (N, emb_channels, H, W)

    # Full model (conv_out zero-initialized -> zeros, trivially matches).
    ref = _ref_forward_nchw(x, params, silu_flags)
    assert jnp.allclose(out, ref, atol=5e-2, rtol=5e-2)

    # Non-trivial trunk check (all layers except the zero conv_out).
    # Tolerances account for bf16 inter-layer activations in both paths.
    x_nhwc = jnp.transpose(x, (0, 2, 3, 1))
    trunk = _forward_nhwc(x_nhwc, params[:-1], silu_flags[:-1])
    trunk = jnp.transpose(jax.block_until_ready(trunk).astype(jnp.float32),
                          (0, 3, 1, 2))
    trunk_ref = _ref_forward_nchw(x, params[:-1], silu_flags[:-1])
    assert jnp.allclose(trunk, trunk_ref, atol=5e-2, rtol=5e-2)

    print("KERNEL_OK")
</pallas_src>

<mosaic_0001>
module attributes {stable_mosaic.version = 11 : i64} {
  func.func @_conv3x3_kernel(%arg0: i32, %arg1: i32, %arg2: memref<1x16x16x3xbf16, #tpu.memory_space<vmem>>, %arg3: memref<1x1x16x3xbf16, #tpu.memory_space<vmem>>, %arg4: memref<1x1x16x3xbf16, #tpu.memory_space<vmem>>, %arg5: memref<3x9x16xbf16, #tpu.memory_space<vmem>>, %arg6: memref<1x16xf32, #tpu.memory_space<vmem>>, %arg7: memref<1x16x16x16xbf16, #tpu.memory_space<vmem>>, %arg8: memref<256x16xf32, #tpu.memory_space<vmem>>) attributes {dimension_semantics = [#tpu.dimension_semantics<parallel>, #tpu.dimension_semantics<parallel>], iteration_bounds = array<i64: 2, 1>, scalar_prefetch = 0 : i64, scratch_operands = 1 : i64, tpu.core_type = #tpu.core_type<tc>, window_params = [{transform_indices = @transform_0, window_bounds = array<i64: 1, 16, 16, 3>}, {transform_indices = @transform_1, window_bounds = array<i64: 1, 1, 16, 3>}, {transform_indices = @transform_2, window_bounds = array<i64: 1, 1, 16, 3>}, {pipeline_mode = #tpu.pipeline_mode<synchronous>, transform_indices = @transform_3, window_bounds = array<i64: 3, 9, 16>}, {pipeline_mode = #tpu.pipeline_mode<synchronous>, transform_indices = @transform_4, window_bounds = array<i64: 1, 16>}, {transform_indices = @transform_5, window_bounds = array<i64: 1, 16, 16, 16>}]} {
    %c0 = arith.constant 0 : index
    %c0_0 = arith.constant 0 : index
    %c0_1 = arith.constant 0 : index
    %c0_2 = arith.constant 0 : index
    %0 = vector.load %arg3[%c0, %c0_0, %c0_1, %c0_2] : memref<1x1x16x3xbf16, #tpu.memory_space<vmem>>, vector<1x1x16x3xbf16>
    %1 = vector.shape_cast %0 : vector<1x1x16x3xbf16> to vector<1x16x3xbf16>
    %c0_3 = arith.constant 0 : index
    %c0_4 = arith.constant 0 : index
    %c0_5 = arith.constant 0 : index
    %c0_6 = arith.constant 0 : index
    %2 = vector.load %arg2[%c0_3, %c0_4, %c0_5, %c0_6] : memref<1x16x16x3xbf16, #tpu.memory_space<vmem>>, vector<1x16x16x3xbf16>
    %3 = vector.shape_cast %2 : vector<1x16x16x3xbf16> to vector<16x16x3xbf16>
    %c0_7 = arith.constant 0 : index
    %c0_8 = arith.constant 0 : index
    %c0_9 = arith.constant 0 : index
    %c0_10 = arith.constant 0 : index
    %4 = vector.load %arg4[%c0_7, %c0_8, %c0_9, %c0_10] : memref<1x1x16x3xbf16, #tpu.memory_space<vmem>>, vector<1x1x16x3xbf16>
    %5 = vector.shape_cast %4 : vector<1x1x16x3xbf16> to vector<1x16x3xbf16>
    %6 = tpu.concatenate %1, %3, %5 in 0 : vector<1x16x3xbf16>, vector<16x16x3xbf16>, vector<1x16x3xbf16> -> vector<18x16x3xbf16>
    %cst = arith.constant 0.000000e+00 : bf16
    %7 = vector.broadcast %cst : bf16 to vector<18x8x3xbf16>
    %8 = tpu.concatenate %7, %6, %7 in 1 : vector<18x8x3xbf16>, vector<18x16x3xbf16>, vector<18x8x3xbf16> -> vector<18x32x3xbf16>
    %9 = vector.extract_strided_slice %8 {offsets = [0, 7, 0], sizes = [16, 16, 3], strides = [1, 1, 1]} : vector<18x32x3xbf16> to vector<16x16x3xbf16>
    %10 = vector.shape_cast %9 : vector<16x16x3xbf16> to vector<256x3xbf16>
    %c0_11 = arith.constant 0 : index
    %c0_12 = arith.constant 0 : index
    %c0_13 = arith.constant 0 : index
    %11 = vector.load %arg5[%c0_11, %c0_12, %c0_13] : memref<3x9x16xbf16, #tpu.memory_space<vmem>>, vector<1x3x16xbf16>
    %12 = vector.shape_cast %11 : vector<1x3x16xbf16> to vector<3x16xbf16>
    %cst_14 = arith.constant dense<0.000000e+00> : vector<256x16xf32>
    %13 = tpu.matmul %10, %12, %cst_14 {dimension_numbers = #tpu.dot_dimension_numbers<[1], [0], [0], [1], [0, 0, 1, 1], [], []>} : vector<256x3xbf16>, vector<3x16xbf16>, vector<256x16xf32> -> vector<256x16xf32>
    %c0_15 = arith.constant 0 : index
    %c0_16 = arith.constant 0 : index
    %14 = vector.load %arg8[%c0_15, %c0_16] : memref<256x16xf32, #tpu.memory_space<vmem>>, vector<256x16xf32>
    tpu.vector_store %arg8[%c0_15, %c0_16], %13 {strides = array<i32>} : memref<256x16xf32, #tpu.memory_space<vmem>>, vector<256x16xf32>,
    %15 = vector.extract_strided_slice %8 {offsets = [0, 8, 0], sizes = [16, 16, 3], strides = [1, 1, 1]} : vector<18x32x3xbf16> to vector<16x16x3xbf16>
    %16 = vector.shape_cast %15 : vector<16x16x3xbf16> to vector<256x3xbf16>
    %c0_17 = arith.constant 0 : index
    %c3 = arith.constant 3 : index
    %c0_18 = arith.constant 0 : index
    %17 = vector.load %arg5[%c0_17, %c3, %c0_18] : memref<3x9x16xbf16, #tpu.memory_space<vmem>>, vector<1x3x16xbf16>
    %18 = vector.shape_cast %17 : vector<1x3x16xbf16> to vector<3x16xbf16>
    %cst_19 = arith.constant dense<0.000000e+00> : vector<256x16xf32>
    %19 = tpu.matmul %16, %18, %cst_19 {dimension_numbers = #tpu.dot_dimension_numbers<[1], [0], [0], [1], [0, 0, 1, 1], [], []>} : vector<256x3xbf16>, vector<3x16xbf16>, vector<256x16xf32> -> vector<256x16xf32>
    %c0_20 = arith.constant 0 : index
    %c0_21 = arith.constant 0 : index
    %20 = vector.load %arg8[%c0_20, %c0_21] : memref<256x16xf32, #tpu.memory_space<vmem>>, vector<256x16xf32>
    %21 = arith.addf %20, %19 : vector<256x16xf32>
    %c0_22 = arith.constant 0 : index
    %c0_23 = arith.constant 0 : index
    %22 = vector.load %arg8[%c0_22, %c0_23] : memref<256x16xf32, #tpu.memory_space<vmem>>, vector<256x16xf32>
    tpu.vector_store %arg8[%c0_22, %c0_23], %21 {strides = array<i32>} : memref<256x16xf32, #tpu.memory_space<vmem>>, vector<256x16xf32>,
    %23 = vector.extract_strided_slice %8 {offsets = [0, 9, 0], sizes = [16, 16, 3], strides = [1, 1, 1]} : vector<18x32x3xbf16> to vector<16x16x3xbf16>
    %24 = vector.shape_cast %23 : vector<16x16x3xbf16> to vector<256x3xbf16>
    %c0_24 = arith.constant 0 : index
    %c6 = arith.constant 6 : index
    %c0_25 = arith.constant 0 : index
    %25 = vector.load %arg5[%c0_24, %c6, %c0_25] : memref<3x9x16xbf16, #tpu.memory_space<vmem>>, vector<1x3x16xbf16>
    %26 = vector.shape_cast %25 : vector<1x3x16xbf16> to vector<3x16xbf16>
    %cst_26 = arith.constant dense<0.000000e+00> : vector<256x16xf32>
    %27 = tpu.matmul %24, %26, %cst_26 {dimension_numbers = #tpu.dot_dimension_numbers<[1], [0], [0], [1], [0, 0, 1, 1], [], []>} : vector<256x3xbf16>, vector<3x16xbf16>, vector<256x16xf32> -> vector<256x16xf32>
    %c0_27 = arith.constant 0 : index
    %c0_28 = arith.constant 0 : index
    %28 = vector.load %arg8[%c0_27, %c0_28] : memref<256x16xf32, #tpu.memory_space<vmem>>, vector<256x16xf32>
    %29 = arith.addf %28, %27 : vector<256x16xf32>
    %c0_29 = arith.constant 0 : index
    %c0_30 = arith.constant 0 : index
    %30 = vector.load %arg8[%c0_29, %c0_30] : memref<256x16xf32, #tpu.memory_space<vmem>>, vector<256x16xf32>
    tpu.vector_store %arg8[%c0_29, %c0_30], %29 {strides = array<i32>} : memref<256x16xf32, #tpu.memory_space<vmem>>, vector<256x16xf32>,
    %31 = vector.extract_strided_slice %8 {offsets = [1, 7, 0], sizes = [16, 16, 3], strides = [1, 1, 1]} : vector<18x32x3xbf16> to vector<16x16x3xbf16>
    %32 = vector.shape_cast %31 : vector<16x16x3xbf16> to vector<256x3xbf16>
    %c1 = arith.constant 1 : index
    %c0_31 = arith.constant 0 : index
    %c0_32 = arith.constant 0 : index
    %33 = vector.load %arg5[%c1, %c0_31, %c0_32] : memref<3x9x16xbf16, #tpu.memory_space<vmem>>, vector<1x3x16xbf16>
    %34 = vector.shape_cast %33 : vector<1x3x16xbf16> to vector<3x16xbf16>
    %cst_33 = arith.constant dense<0.000000e+00> : vector<256x16xf32>
    %35 = tpu.matmul %32, %34, %cst_33 {dimension_numbers = #tpu.dot_dimension_numbers<[1], [0], [0], [1], [0, 0, 1, 1], [], []>} : vector<256x3xbf16>, vector<3x16xbf16>, vector<256x16xf32> -> vector<256x16xf32>
    %c0_34 = arith.constant 0 : index
    %c0_35 = arith.constant 0 : index
    %36 = vector.load %arg8[%c0_34, %c0_35] : memref<256x16xf32, #tpu.memory_space<vmem>>, vector<256x16xf32>
    %37 = arith.addf %36, %35 : vector<256x16xf32>
    %c0_36 = arith.constant 0 : index
    %c0_37 = arith.constant 0 : index
    %38 = vector.load %arg8[%c0_36, %c0_37] : memref<256x16xf32, #tpu.memory_space<vmem>>, vector<256x16xf32>
    tpu.vector_store %arg8[%c0_36, %c0_37], %37 {strides = array<i32>} : memref<256x16xf32, #tpu.memory_space<vmem>>, vector<256x16xf32>,
    %39 = vector.extract_strided_slice %8 {offsets = [1, 8, 0], sizes = [16, 16, 3], strides = [1, 1, 1]} : vector<18x32x3xbf16> to vector<16x16x3xbf16>
    %40 = vector.shape_cast %39 : vector<16x16x3xbf16> to vector<256x3xbf16>
    %c1_38 = arith.constant 1 : index
    %c3_39 = arith.constant 3 : index
    %c0_40 = arith.constant 0 : index
    %41 = vector.load %arg5[%c1_38, %c3_39, %c0_40] : memref<3x9x16xbf16, #tpu.memory_space<vmem>>, vector<1x3x16xbf16>
    %42 = vector.shape_cast %41 : vector<1x3x16xbf16> to vector<3x16xbf16>
    %cst_41 = arith.constant dense<0.000000e+00> : vector<256x16xf32>
    %43 = tpu.matmul %40, %42, %cst_41 {dimension_numbers = #tpu.dot_dimension_numbers<[1], [0], [0], [1], [0, 0, 1, 1], [], []>} : vector<256x3xbf16>, vector<3x16xbf16>, vector<256x16xf32> -> vector<256x16xf32>
    %c0_42 = arith.constant 0 : index
    %c0_43 = arith.constant 0 : index
    %44 = vector.load %arg8[%c0_42, %c0_43] : memref<256x16xf32, #tpu.memory_space<vmem>>, vector<256x16xf32>
    %45 = arith.addf %44, %43 : vector<256x16xf32>
    %c0_44 = arith.constant 0 : index
    %c0_45 = arith.constant 0 : index
    %46 = vector.load %arg8[%c0_44, %c0_45] : memref<256x16xf32, #tpu.memory_space<vmem>>, vector<256x16xf32>
    tpu.vector_store %arg8[%c0_44, %c0_45], %45 {strides = array<i32>} : memref<256x16xf32, #tpu.memory_space<vmem>>, vector<256x16xf32>,
    %47 = vector.extract_strided_slice %8 {offsets = [1, 9, 0], sizes = [16, 16, 3], strides = [1, 1, 1]} : vector<18x32x3xbf16> to vector<16x16x3xbf16>
    %48 = vector.shape_cast %47 : vector<16x16x3xbf16> to vector<256x3xbf16>
    %c1_46 = arith.constant 1 : index
    %c6_47 = arith.constant 6 : index
    %c0_48 = arith.constant 0 : index
    %49 = vector.load %arg5[%c1_46, %c6_47, %c0_48] : memref<3x9x16xbf16, #tpu.memory_space<vmem>>, vector<1x3x16xbf16>
    %50 = vector.shape_cast %49 : vector<1x3x16xbf16> to vector<3x16xbf16>
    %cst_49 = arith.constant dense<0.000000e+00> : vector<256x16xf32>
    %51 = tpu.matmul %48, %50, %cst_49 {dimension_numbers = #tpu.dot_dimension_numbers<[1], [0], [0], [1], [0, 0, 1, 1], [], []>} : vector<256x3xbf16>, vector<3x16xbf16>, vector<256x16xf32> -> vector<256x16xf32>
    %c0_50 = arith.constant 0 : index
    %c0_51 = arith.constant 0 : index
    %52 = vector.load %arg8[%c0_50, %c0_51] : memref<256x16xf32, #tpu.memory_space<vmem>>, vector<256x16xf32>
    %53 = arith.addf %52, %51 : vector<256x16xf32>
    %c0_52 = arith.constant 0 : index
    %c0_53 = arith.constant 0 : index
    %54 = vector.load %arg8[%c0_52, %c0_53] : memref<256x16xf32, #tpu.memory_space<vmem>>, vector<256x16xf32>
    tpu.vector_store %arg8[%c0_52, %c0_53], %53 {strides = array<i32>} : memref<256x16xf32, #tpu.memory_space<vmem>>, vector<256x16xf32>,
    %55 = vector.extract_strided_slice %8 {offsets = [2, 7, 0], sizes = [16, 16, 3], strides = [1, 1, 1]} : vector<18x32x3xbf16> to vector<16x16x3xbf16>
    %56 = vector.shape_cast %55 : vector<16x16x3xbf16> to vector<256x3xbf16>
    %c2 = arith.constant 2 : index
    %c0_54 = arith.constant 0 : index
    %c0_55 = arith.constant 0 : index
    %57 = vector.load %arg5[%c2, %c0_54, %c0_55] : memref<3x9x16xbf16, #tpu.memory_space<vmem>>, vector<1x3x16xbf16>
    %58 = vector.shape_cast %57 : vector<1x3x16xbf16> to vector<3x16xbf16>
    %cst_56 = arith.constant dense<0.000000e+00> : vector<256x16xf32>
    %59 = tpu.matmul %56, %58, %cst_56 {dimension_numbers = #tpu.dot_dimension_numbers<[1], [0], [0], [1], [0, 0, 1, 1], [], []>} : vector<256x3xbf16>, vector<3x16xbf16>, vector<256x16xf32> -> vector<256x16xf32>
    %c0_57 = arith.constant 0 : index
    %c0_58 = arith.constant 0 : index
    %60 = vector.load %arg8[%c0_57, %c0_58] : memref<256x16xf32, #tpu.memory_space<vmem>>, vector<256x16xf32>
    %61 = arith.addf %60, %59 : vector<256x16xf32>
    %c0_59 = arith.constant 0 : index
    %c0_60 = arith.constant 0 : index
    %62 = vector.load %arg8[%c0_59, %c0_60] : memref<256x16xf32, #tpu.memory_space<vmem>>, vector<256x16xf32>
    tpu.vector_store %arg8[%c0_59, %c0_60], %61 {strides = array<i32>} : memref<256x16xf32, #tpu.memory_space<vmem>>, vector<256x16xf32>,
    %63 = vector.extract_strided_slice %8 {offsets = [2, 8, 0], sizes = [16, 16, 3], strides = [1, 1, 1]} : vector<18x32x3xbf16> to vector<16x16x3xbf16>
    %64 = vector.shape_cast %63 : vector<16x16x3xbf16> to vector<256x3xbf16>
    %c2_61 = arith.constant 2 : index
    %c3_62 = arith.constant 3 : index
    %c0_63 = arith.constant 0 : index
    %65 = vector.load %arg5[%c2_61, %c3_62, %c0_63] : memref<3x9x16xbf16, #tpu.memory_space<vmem>>, vector<1x3x16xbf16>
    %66 = vector.shape_cast %65 : vector<1x3x16xbf16> to vector<3x16xbf16>
    %cst_64 = arith.constant dense<0.000000e+00> : vector<256x16xf32>
    %67 = tpu.matmul %64, %66, %cst_64 {dimension_numbers = #tpu.dot_dimension_numbers<[1], [0], [0], [1], [0, 0, 1, 1], [], []>} : vector<256x3xbf16>, vector<3x16xbf16>, vector<256x16xf32> -> vector<256x16xf32>
    %c0_65 = arith.constant 0 : index
    %c0_66 = arith.constant 0 : index
    %68 = vector.load %arg8[%c0_65, %c0_66] : memref<256x16xf32, #tpu.memory_space<vmem>>, vector<256x16xf32>
    %69 = arith.addf %68, %67 : vector<256x16xf32>
    %c0_67 = arith.constant 0 : index
    %c0_68 = arith.constant 0 : index
    %70 = vector.load %arg8[%c0_67, %c0_68] : memref<256x16xf32, #tpu.memory_space<vmem>>, vector<256x16xf32>
    tpu.vector_store %arg8[%c0_67, %c0_68], %69 {strides = array<i32>} : memref<256x16xf32, #tpu.memory_space<vmem>>, vector<256x16xf32>,
    %71 = vector.extract_strided_slice %8 {offsets = [2, 9, 0], sizes = [16, 16, 3], strides = [1, 1, 1]} : vector<18x32x3xbf16> to vector<16x16x3xbf16>
    %72 = vector.shape_cast %71 : vector<16x16x3xbf16> to vector<256x3xbf16>
    %c2_69 = arith.constant 2 : index
    %c6_70 = arith.constant 6 : index
    %c0_71 = arith.constant 0 : index
    %73 = vector.load %arg5[%c2_69, %c6_70, %c0_71] : memref<3x9x16xbf16, #tpu.memory_space<vmem>>, vector<1x3x16xbf16>
    %74 = vector.shape_cast %73 : vector<1x3x16xbf16> to vector<3x16xbf16>
    %cst_72 = arith.constant dense<0.000000e+00> : vector<256x16xf32>
    %75 = tpu.matmul %72, %74, %cst_72 {dimension_numbers = #tpu.dot_dimension_numbers<[1], [0], [0], [1], [0, 0, 1, 1], [], []>} : vector<256x3xbf16>, vector<3x16xbf16>, vector<256x16xf32> -> vector<256x16xf32>
    %c0_73 = arith.constant 0 : index
    %c0_74 = arith.constant 0 : index
    %76 = vector.load %arg8[%c0_73, %c0_74] : memref<256x16xf32, #tpu.memory_space<vmem>>, vector<256x16xf32>
    %77 = arith.addf %76, %75 : vector<256x16xf32>
    %c0_75 = arith.constant 0 : index
    %c0_76 = arith.constant 0 : index
    %78 = vector.load %arg8[%c0_75, %c0_76] : memref<256x16xf32, #tpu.memory_space<vmem>>, vector<256x16xf32>
    tpu.vector_store %arg8[%c0_75, %c0_76], %77 {strides = array<i32>} : memref<256x16xf32, #tpu.memory_space<vmem>>, vector<256x16xf32>,
    %c0_77 = arith.constant 0 : index
    %c0_78 = arith.constant 0 : index
    %79 = vector.load %arg8[%c0_77, %c0_78] : memref<256x16xf32, #tpu.memory_space<vmem>>, vector<256x16xf32>
    %c0_79 = arith.constant 0 : index
    %c0_80 = arith.constant 0 : index
    %80 = vector.load %arg6[%c0_79, %c0_80] : memref<1x16xf32, #tpu.memory_space<vmem>>, vector<1x16xf32>
    %81 = vector.broadcast %80 : vector<1x16xf32> to vector<256x16xf32>
    %82 = arith.addf %79, %81 : vector<256x16xf32>
    %83 = arith.negf %82 : vector<256x16xf32>
    %84 = math.exp %83 : vector<256x16xf32>
    %cst_81 = arith.constant 1.000000e+00 : f32
    %85 = vector.broadcast %cst_81 : f32 to vector<256x16xf32>
    %86 = arith.addf %85, %84 : vector<256x16xf32>
    %87 = arith.divf %85, %86 : vector<256x16xf32>
    %88 = arith.mulf %82, %87 : vector<256x16xf32>
    %89 = vector.shape_cast %88 : vector<256x16xf32> to vector<16x16x16xf32>
    %90 = arith.truncf %89 : vector<16x16x16xf32> to vector<16x16x16xbf16>
    %c0_82 = arith.constant 0 : index
    %c0_83 = arith.constant 0 : index
    %c0_84 = arith.constant 0 : index
    %c0_85 = arith.constant 0 : index
    %91 = vector.load %arg7[%c0_82, %c0_83, %c0_84, %c0_85] : memref<1x16x16x16xbf16, #tpu.memory_space<vmem>>, vector<1x16x16x16xbf16>
    %92 = vector.shape_cast %91 : vector<1x16x16x16xbf16> to vector<16x16x16xbf16>
    %93 = vector.shape_cast %90 : vector<16x16x16xbf16> to vector<1x16x16x16xbf16>
    tpu.vector_store %arg7[%c0_82, %c0_83, %c0_84, %c0_85], %93 {strides = array<i32>} : memref<1x16x16x16xbf16, #tpu.memory_space<vmem>>, vector<1x16x16x16xbf16>,
    return
  }
  func.func @transform_0(%arg0: i32, %arg1: i32) -> (i32, i32, i32, i32) {
    %c0_i32 = arith.constant 0 : i32
    %c0_i32_0 = arith.constant 0 : i32
    %c0_i32_1 = arith.constant 0 : i32
    return %arg0, %arg1, %c0_i32, %c0_i32_0 : i32, i32, i32, i32
  }
  func.func @transform_1(%arg0: i32, %arg1: i32) -> (i32, i32, i32, i32) {
    %c0_i32 = arith.constant 0 : i32
    %c0_i32_0 = arith.constant 0 : i32
    %c0_i32_1 = arith.constant 0 : i32
    return %arg0, %arg1, %c0_i32, %c0_i32_0 : i32, i32, i32, i32
  }
  func.func @transform_2(%arg0: i32, %arg1: i32) -> (i32, i32, i32, i32) {
    %c0_i32 = arith.constant 0 : i32
    %c0_i32_0 = arith.constant 0 : i32
    %c0_i32_1 = arith.constant 0 : i32
    return %arg0, %arg1, %c0_i32, %c0_i32_0 : i32, i32, i32, i32
  }
  func.func @transform_3(%arg0: i32, %arg1: i32) -> (i32, i32, i32) {
    %c0_i32 = arith.constant 0 : i32
    %c0_i32_0 = arith.constant 0 : i32
    %c0_i32_1 = arith.constant 0 : i32
    %c0_i32_2 = arith.constant 0 : i32
    return %c0_i32, %c0_i32_0, %c0_i32_1 : i32, i32, i32
  }
  func.func @transform_4(%arg0: i32, %arg1: i32) -> (i32, i32) {
    %c0_i32 = arith.constant 0 : i32
    %c0_i32_0 = arith.constant 0 : i32
    %c0_i32_1 = arith.constant 0 : i32
    return %c0_i32, %c0_i32_0 : i32, i32
  }
  func.func @transform_5(%arg0: i32, %arg1: i32) -> (i32, i32, i32, i32) {
    %c0_i32 = arith.constant 0 : i32
    %c0_i32_0 = arith.constant 0 : i32
    %c0_i32_1 = arith.constant 0 : i32
    return %arg0, %arg1, %c0_i32, %c0_i32_0 : i32, i32, i32, i32
  }
}

</mosaic_0001>

<bundles_post_ra>
// kernel: tpu_custom_call.1
= control target key start
LH: loop header
LB: loop body
LE: loop exit
PB: predicated region body
PF: predicated region fallthrough
CT: control target
= control target key end

     0   :  { %10 = vsyncpa [#allocation4], 0  ;;  %s6961_s0 = inlined_call_operand.vmem [shape: bf16[2,16,16,3], index: 0, kind: input, shape index: {}]   ;;  %s6962_s1 = inlined_call_operand.vmem [shape: bf16[2,1,16,3], index: 1, kind: input, shape index: {}]   ;;  %s6963_s2 = inlined_call_operand.vmem [shape: bf16[2,1,16,3], index: 2, kind: input, shape index: {}]   ;;  %s6964_s3 = inlined_call_operand.vmem [shape: bf16[3,9,16], index: 3, kind: input, shape index: {}]   ;;  %s6965_s4 = inlined_call_operand.vmem [shape: f32[1,16], index: 4, kind: input, shape index: {}]   ;;  %s6966_s5 = inlined_call_operand.hbm [shape: bf16[2,16,16,16], index: 5, kind: output, shape index: {}]  }
   0x1   :  { %12 = vsyncpa [#allocation4 + $0x1], 0  ;;  %s5254_s18 = smov 0   ;;  %s5256_s19 = smov 0  }
   0x2   :  { %s5258_s20 = smov 0   ;;  %s5260_s21 = smov 0  }
   0x3   :  { %s5262_s22 = smov 0   ;;  %s5264_s23 = smov 0  }
   0x4 LB: > { %s4139_s24 = sadd.s32 4294967295, %s5218_s23   ;;  %s4140_s25 = sadd.s32 4294967294, %s5218_s23   ;;  %s5218_s23 = sphi %s5264_s23, %s18_s23   ;;  %s5214_s22 = sphi %s5262_s22, %s7111_s22   ;;  %s5210_s21 = sphi %s5260_s21, %s7110_s21   ;;  %s5206_s20 = sphi %s5258_s20, %s7109_s20   ;;  %s5202_s19 = sphi %s5256_s19, %s7108_s19   ;;  %s5198_s18 = sphi %s5254_s18, %s7107_s18  }
   0x5   : > { %s30_s26 = sadd.s32 1, %s5214_s22  ;;  %s165_s27 = sadd.s32 1, %s5206_s20 }
   0x6   : > { %p32_p0 = scmp.ge.s32.totalorder %s30_s26, 2  ;;  %p175_p1 = scmp.ne.s32.totalorder %s5206_s20, %s5202_s19 }
   0x7   : > { %p176_p2 = scmp.eq.s32.totalorder %s4139_s24, 1  ;;  %p181_p3 = scmp.ne.s32.totalorder %s5202_s19, %s5198_s18 }
   0x8   : > { %s7113_s26 = smov (%p32_p0, %s30_s26), 0  ;;  %p182_p5 = scmp.eq.s32.totalorder %s4140_s25, 1 }
   0x9   : > { %p5294_p4 = por %p176_p2, %p175_p1  ;;  %s160_s29 = ssub.s32 %s5214_s22, %s7113_s26 }
   0xa   : > { %p4143_p6 = scmp.ge.s32.totalorder %s5218_s23, 1  ;;  %p163_p7 = scmp.eq.s32.totalorder %s160_s29, 0 }
   0xb   : > { %p5301_p8 = por %p182_p5, %p181_p3  ;;  %p244_p9 = scmp.lt.s32.totalorder %s5218_s23, 3 }
   0xc   : > { %s5307_s6 = scalar_select %p163_p7, %s5206_s20, %s165_s27  }
   0xd   : > { %p245_p10 = pnand %p4143_p6, %p244_p9 }
   0xf   : > { %248 = sbr.rel (%p245_p10) target bundleno = 639 (0x27f), region = 40 }
  0x16   : > { %v785_v0 = vld [vmem:[%s6964_s3] sm:$0x3]  ;;  %vm835_vm0 = vcmask 1040384   ;;  %vm836_vm1 = vcmask 1041408   ;;  %p296_p11 = scmp.lt.s32.totalorder %s5210_s21, 1  ;;  %v5220_v1 = vmov 65535  }
  0x17   : > { %v837_v2 = vsel %vm835_vm0, 4294967295, %v5220_v1  ;;  %v4972_v5 = vld [vmem:[%s6964_s3] ss:$0 sps:$4 sm:$0x66]   ;;  %v4983_v6 = vld [vmem:[%s6964_s3] sm:$0x18]  }
  0x18   : > { %v5313_v3 = vsel %vm836_vm1, %v837_v2, 0  ;;  %s5316_s9 = scalar_select %p296_p11, %s5210_s21, 1  ;;  %vm470_vm2 = vcmask 1043456   ;;  %vm544_vm3 = vsmask.f32 4352  ;;  %v1122_v7 = vshrl.u32 %v4972_v5, 16 }
  0x19   : > { %v840_v4 = vand.u32 %v5313_v3, %v785_v0  ;;  %v1125_v8 = vshll.u32 %v4972_v5, 16  ;;  %vm786_vm4 = vcmask 23552   ;;  %v1557_v15 = vrot.slane %v4983_v6, 3  ;;  %v4237_v16 = vld [vmem:[%s6964_s3 + $0x8] sm:$0x3]  ;;  %s292_s10 = sand.u32 1, %s5202_s19  }
  0x1a   : > { %s4415_s12 = sshll.u32 %s5316_s9, 7  ;;  %s4416_s24 = sshll.u32 %s5316_s9, 3  ;;  %v1124_v11 = vrot.slane %v1122_v7, 1  ;;  %v5378_v39 = vand.u32 %v4237_v16, %v5313_v3  ;;  %vm1437_vm5 = vsmask.f32 3328  ;;  %vm1003_vm6 = vcmask 130048  }
  0x1b   : > { %4910 = vmatprep.subr.bf16.mxu1 %v840_v4  ;;  %s5329_s17 = scalar_lea.vmem %s6961_s0, %s4415_s12  ;;  %4604 = vmatprep.subr.bf16.mxu0 %v840_v4  ;;  %v1127_v12 = vrot.slane %v1125_v8, 2  ;;  %s314_s8 = scalar_lea.vmem %s6962_s1, %s4416_s24  ;;  %v5358_v25 = vand.u32 %v1557_v15, %v5313_v3  ;;  %vm3965_vm7 = vcmask 125952  }
  0x1c   : > { %4911 = vmatpush3.bf16.msra.mxu1 %v840_v4  ;;  %v4970_v9 = vld [vmem:[%s5329_s17 + $0x38] ss:$0 sps:$4 sm:$0xff]   ;;  %4605 = vmatpush3.bf16.msra.mxu0 %v840_v4  ;;  %v4971_v10 = vld [vmem:[%s5329_s17 + $0x3c] ss:$0 sps:$4 sm:$0xff]   ;;  %v4973_v14 = vld [vmem:[%s5329_s17 + $0x40] ss:$0 sps:$4 sm:$0xff]   ;;  %s5758_s14 = scalar_lea.vmem %s6963_s2, %s4416_s24 }
  0x1d   : > { %v5335_v13 = vsel %vm470_vm2, 0, %v4970_v9  ;;  %v5342_v17 = vsel %vm470_vm2, %v4971_v10, 0  ;;  %v1128_v20 = vor.u32 %v1127_v12, %v1124_v11  ;;  %v4974_v21 = vld [vmem:[%s5329_s17 + $0x44] ss:$0 sps:$4 sm:$0xff]   ;;  %v5355_v24 = vsel %vm470_vm2, 0, %v4973_v14  ;;  %4672 = vmatprep.subr.bf16.mxu0 %v5358_v25  ;;  %s6680_s11 = sshll.u32 %s292_s10, 7 }
  0x1e   : > { %v6989_v18 = vshrl.u32 %v5335_v13, 16  ;;  %v6985_v19 = vshll.u32 %v5335_v13, 16  ;;  %v6984_v22 = vshrl.u32 %v5342_v17, 16  ;;  %v6981_v23 = vshll.u32 %v5342_v17, 16  ;;  %v4975_v34 = vld [vmem:[%s314_s8] ss:$0 sps:$4 sm:$0xff]  }
  0x1f   : > { %v1178_v28 = vand.u32 %v1128_v20, %v5313_v3  ;;  %v5366_v29 = vsel %vm470_vm2, %v4974_v21, 0  ;;  %v6978_v32 = vshrl.u32 %v5355_v24, 16  ;;  %v6977_v33 = vshll.u32 %v5355_v24, 16  ;;  %v4976_v38 = vld [vmem:[%s314_s8 + $0x4] ss:$0 sps:$4 sm:$0xff]   ;;  %s6705_s12 = scalar_lea.vmem [#allocation3], %s6680_s11 }
  0x20   : > { %v667_v26 = vrot.slane %v6989_v18, 3  ;;  %v670_v27 = vrot.slane %v6985_v19, 4  ;;  %v674_v30 = vrot.slane %v6984_v22, 3  ;;  %v677_v31 = vrot.slane %v6981_v23, 4  ;;  %v4977_v48 = vld [vmem:[%s5329_s17] ss:$0 sps:$4 sm:$0xff]  }
  0x21   : > { %4638 = vmatprep.subr.bf16.mxu1 %v1178_v28  ;;  %v6976_v36 = vshrl.u32 %v5366_v29, 16  ;;  %v6975_v37 = vshll.u32 %v5366_v29, 16  ;;  %v682_v41 = vrot.slane %v6978_v32, 3  ;;  %v685_v42 = vrot.slane %v6977_v33, 4  ;;  %v4978_v53 = vld [vmem:[%s5329_s17 + $0x4] ss:$0 sps:$4 sm:$0xff]  }
  0x22   : > { %v671_v35 = vor.u32 %v670_v27, %v667_v26  ;;  %v678_v40 = vor.u32 %v677_v31, %v674_v30  ;;  %v5385_v43 = vsel %vm470_vm2, 0, %v4975_v34  ;;  %v5392_v46 = vsel %vm470_vm2, %v4976_v38, 0  ;;  %v4979_v62 = vld [vmem:[%s5329_s17 + $0x48] ss:$0 sps:$4 sm:$0xff]   ;;  %v4980_v4 = vld [vmem:[%s5329_s17 + $0x4c] ss:$0 sps:$4 sm:$0xff]  }
  0x23   : > { %v689_v44 = vrot.slane %v6976_v36, 3  ;;  %v692_v45 = vrot.slane %v6975_v37, 4  ;;  %v7015_v47 = vshrl.u32 %v5385_v43, 16  ;;  %v686_v50 = vor.u32 %v685_v42, %v682_v41  ;;  %v4981_v21 = vld [vmem:[%s5329_s17 + $0x50] ss:$0 sps:$4 sm:$0xff]   ;;  %s4450_s13 = sshll.u32 %s5210_s21, 11 }
  0x24   : > { %v5397_v49 = vsel %vm544_vm3, %v671_v35, %v678_v40  ;;  %v7013_v51 = vshll.u32 %v5385_v43, 16  ;;  %v7012_v52 = vshrl.u32 %v5392_v46, 16  ;;  %v7009_v56 = vshll.u32 %v5392_v46, 16  ;;  %v4982_v31 = vld [vmem:[%s5329_s17 + $0x54] ss:$0 sps:$4 sm:$0xff]   ;;  %s6905_s16 = scalar_lea.hbm %s6966_s5, %s4450_s13  ;;  %s6915_s21 = scalar_lea.sflag [#allocation4], %s292_s10 }
  0x25   : > { %4622 = vmatprep.mubr.msk.bf16.mxu1 %vm786_vm4, %v5397_v49  ;;  %v693_v54 = vor.u32 %v692_v45, %v689_v44  ;;  %v547_v55 = vrot.slane %v7015_v47, 3  ;;  %v5408_v57 = vsel %vm470_vm2, 0, %v4977_v48  ;;  %v5415_v60 = vsel %vm470_vm2, %v4978_v53, 0  ;;  %v4984_v45 = vld [vmem:[%s5329_s17 + $0x8] ss:$0 sps:$4 sm:$0xff]   ;;  %s5221_s25 = smov [#allocation3]  }
  0x26   : > { %v550_v58 = vrot.slane %v7013_v51, 4  ;;  %v554_v59 = vrot.slane %v7012_v52, 3  ;;  %v560_v61 = vshrl.u32 %v5408_v57, 16  ;;  %v557_v0 = vrot.slane %v7009_v56, 4  ;;  %v4994_v19 = vld [vmem:[%s5329_s17 + $0x20] ss:$0 sps:$4 sm:$0xff]  }
  0x27   : > { %v5420_v63 = vsel %vm544_vm3, %v686_v50, %v693_v54  ;;  %v563_v1 = vshll.u32 %v5408_v57, 16  ;;  %v567_v2 = vshrl.u32 %v5415_v60, 16  ;;  %v570_v7 = vshll.u32 %v5415_v60, 16  ;;  %v5002_v51 = vld [vmem:[%s5329_s17 + $0x30] ss:$0 sps:$4 sm:$0xff]   ;;  %s5144_s27 = sshll.u32 %s5221_s25, 4  ;;  %s5145_s27 = int_to_ptr.vmem [resolvable:$false] %s5144_s27 }
  0x28   : > { %4623 = vmatmul.mubr.msk.bf16.vlgmr.msra.gmra.mrb[0].mxu1 %vm786_vm4, %v5420_v63  ;;  %v551_v5 = vor.u32 %v550_v58, %v547_v55  ;;  %v562_v6 = vrot.slane %v560_v61, 3  ;;  %v5430_v8 = vrot.slane %v560_v61, 4  ;;  %v558_v9 = vor.u32 %v557_v0, %v554_v59  ;;  %v4985_v58 = vld [vmem:[%s5329_s17 + $0xc] ss:$0 sps:$4 sm:$0xff]  }
  0x29   : > { %4639 = vmatpush3.bf16.msra.mxu1 %v1178_v28  ;;  %v565_v10 = vrot.slane %v563_v1, 4  ;;  %v569_v11 = vrot.slane %v567_v2, 3  ;;  %v5432_v12 = vrot.slane %v563_v1, 5  ;;  %v572_v14 = vrot.slane %v570_v7, 4 }
  0x2a   : > { %v5434_v15 = vrot.slane %v567_v2, 4  ;;  %v5436_v16 = vrot.slane %v570_v7, 5  ;;  %v5439_v20 = vsel %vm470_vm2, 0, %v4979_v62  ;;  %4706 = vmatprep.subr.bf16.mxu1 %v5378_v39  ;;  %v559_v26 = vsel %vm544_vm3, %v551_v5, %v558_v9 }
  0x2b   : > { %v566_v27 = vor.u32 %v565_v10, %v562_v6  ;;  %v5445_v28 = vsel %vm470_vm2, %v4980_v4, 0  ;;  %v6974_v30 = vshrl.u32 %v5439_v20, 16  ;;  %4606 = vmatprep.mubr.msk.bf16.mxu0 %vm786_vm4, %v559_v26  ;;  %v573_v34 = vor.u32 %v572_v14, %v569_v11  ;;  %v4986_v6 = vld [vmem:[%s5329_s17 + $0x10] ss:$0 sps:$4 sm:$0xff]   ;;  %v4987_v11 = vld [vmem:[%s5329_s17 + $0x14] ss:$0 sps:$4 sm:$0xff]  }
  0x2c   : > { %v6973_v35 = vshll.u32 %v5439_v20, 16  ;;  %v6972_v38 = vshrl.u32 %v5445_v28, 16  ;;  %v6971_v40 = vshll.u32 %v5445_v28, 16  ;;  %v5456_v42 = vsel %vm470_vm2, 0, %v4981_v21 }
  0x2d   : > { %v697_v41 = vrot.slane %v6974_v30, 3  ;;  %v5459_v44 = vsel %vm470_vm2, %v4982_v31, 0  ;;  %v5464_v50 = vsel %vm544_vm3, %v566_v27, %v573_v34  ;;  %v6970_v59 = vshrl.u32 %v5456_v42, 16 }
  0x2e   : > { %v700_v53 = vrot.slane %v6973_v35, 4  ;;  %v704_v54 = vrot.slane %v6972_v38, 3  ;;  %v707_v55 = vrot.slane %v6971_v40, 4  ;;  %4607 = vmatmul.mubr.msk.bf16.vlgmr.msra.gmra.mrb[0].mxu0 %vm786_vm4, %v5464_v50  ;;  %v6969_v61 = vshll.u32 %v5456_v42, 16  ;;  %v4990_v40 = vld [vmem:[%s5329_s17 + $0x60] ss:$0 sps:$4 sm:$0xff]  }
  0x2f   : > { %v6968_v62 = vshrl.u32 %v5459_v44, 16  ;;  %v6967_v0 = vshll.u32 %v5459_v44, 16  ;;  %4673 = vmatpush3.bf16.msra.mxu0 %v5358_v25  ;;  %v5481_v4 = vsel %vm470_vm2, 0, %v4984_v45  ;;  %v5484_v5 = vsel %vm470_vm2, %v4985_v58, 0 }
  0x30   : > { %v701_v1 = vor.u32 %v700_v53, %v697_v41  ;;  %v708_v2 = vor.u32 %v707_v55, %v704_v54  ;;  %v712_v7 = vrot.slane %v6970_v59, 3  ;;  %v715_v9 = vrot.slane %v6969_v61, 4  ;;  %v4988_v53 = vld [vmem:[%s5329_s17 + $0x58] ss:$0 sps:$4 sm:$0xff]  }
  0x31   : > { %v719_v10 = vrot.slane %v6968_v62, 3  ;;  %v722_v25 = vrot.slane %v6967_v0, 4  ;;  %v7006_v21 = vshrl.u32 %v5481_v4, 16  ;;  %v7005_v26 = vshll.u32 %v5481_v4, 16 }
  0x32   : > { %v5497_v14 = vsel %vm544_vm3, %v701_v1, %v708_v2  ;;  %v7003_v27 = vshrl.u32 %v5484_v5, 16  ;;  %v716_v31 = vor.u32 %v715_v9, %v712_v7  ;;  %v6999_v41 = vshll.u32 %v5484_v5, 16  ;;  %v4989_v2 = vld [vmem:[%s5329_s17 + $0x5c] ss:$0 sps:$4 sm:$0xff]  }
  0x33   : > { %4626 = vmatprep.mubr.msk.bf16.mxu1 %vm786_vm4, %v5497_v14  ;;  %v723_v34 = vor.u32 %v722_v25, %v719_v10  ;;  %v5506_v45 = vsel %vm470_vm2, 0, %v4986_v6  ;;  %v577_v54 = vrot.slane %v7006_v21, 3  ;;  %v580_v55 = vrot.slane %v7005_v26, 4 }
  0x34   : > { %v584_v58 = vrot.slane %v7003_v27, 3  ;;  %v5516_v1 = vsel %vm470_vm2, %v4987_v11, 0  ;;  %v587_v6 = vrot.slane %v6999_v41, 4  ;;  %v6998_v9 = vshrl.u32 %v5506_v45, 16 }
  0x35   : > { %v5520_v7 = vsel %vm544_vm3, %v716_v31, %v723_v34  ;;  %v6996_v10 = vshll.u32 %v5506_v45, 16  ;;  %v581_v25 = vor.u32 %v580_v55, %v577_v54  ;;  %v6992_v0 = vshrl.u32 %v5516_v1, 16 }
  0x36   : > { %4627 = vmatmul.mubr.msk.bf16.gmra.mrb[4].mxu1 %vm786_vm4, %v5520_v7  ;;  %v6991_v11 = vshll.u32 %v5516_v1, 16  ;;  %v5531_v62 = vsel %vm470_vm2, 0, %v4988_v53  ;;  %v588_v31 = vor.u32 %v587_v6, %v584_v58  ;;  %v592_v34 = vrot.slane %v6998_v9, 3  ;;  %v4991_v6 = vld [vmem:[%s5329_s17 + $0x64] ss:$0 sps:$4 sm:$0xff]  }
  0x37   : > { %v595_v61 = vrot.slane %v6996_v10, 4  ;;  %v5538_v59 = vsel %vm470_vm2, %v4989_v2, 0  ;;  %v599_v54 = vrot.slane %v6992_v0, 3  ;;  %v6980_v53 = vshrl.u32 %v5531_v62, 16 }
  0x38   : > { %v602_v55 = vrot.slane %v6991_v11, 4  ;;  %v6979_v58 = vshll.u32 %v5531_v62, 16  ;;  %v5549_v38 = vsel %vm544_vm3, %v581_v25, %v588_v31  ;;  %v6982_v2 = vshrl.u32 %v5538_v59, 16  ;;  %v4992_v25 = vld [vmem:[%s5329_s17 + $0x18] ss:$0 sps:$4 sm:$0xff]  }
  0x39   : > { %v596_v35 = vor.u32 %v595_v61, %v592_v34  ;;  %v6983_v30 = vshll.u32 %v5538_v59, 16  ;;  %4610 = vmatprep.mubr.msk.bf16.mxu0 %vm786_vm4, %v5549_v38  ;;  %v727_v36 = vrot.slane %v6980_v53, 3  ;;  %v5560_v32 = vsel %vm470_vm2, 0, %v4990_v40 }
  0x3a   : > { %v603_v37 = vor.u32 %v602_v55, %v599_v54  ;;  %v730_v33 = vrot.slane %v6979_v58, 4  ;;  %v734_v61 = vrot.slane %v6982_v2, 3  ;;  %v5568_v34 = vsel %vm470_vm2, %v4991_v6, 0  ;;  %v4993_v55 = vld [vmem:[%s5329_s17 + $0x1c] ss:$0 sps:$4 sm:$0xff]  }
  0x3b   : > { %v737_v31 = vrot.slane %v6983_v30, 4  ;;  %v6986_v54 = vshrl.u32 %v5560_v32, 16  ;;  %v6987_v53 = vshll.u32 %v5560_v32, 16  ;;  %v6988_v23 = vshrl.u32 %v5568_v34, 16 }
  0x3c   : > { %v5573_v58 = vsel %vm544_vm3, %v596_v35, %v603_v37  ;;  %v731_v40 = vor.u32 %v730_v33, %v727_v36  ;;  %v6990_v30 = vshll.u32 %v5568_v34, 16  ;;  %v5583_v22 = vsel %vm470_vm2, 0, %v4992_v25 }
  0x3d   : > { %4611 = vmatmul.mubr.msk.bf16.gmra.mrb[4].mxu0 %vm786_vm4, %v5573_v58  ;;  %v738_v2 = vor.u32 %v737_v31, %v734_v61  ;;  %v742_v6 = vrot.slane %v6986_v54, 3  ;;  %v745_v33 = vrot.slane %v6987_v53, 4  ;;  %v749_v36 = vrot.slane %v6988_v23, 3  ;;  %v4995_v61 = vld [vmem:[%s5329_s17 + $0x24] ss:$0 sps:$4 sm:$0xff]  }
  0x3e   : > { %v5591_v37 = vsel %vm470_vm2, %v4993_v55, 0  ;;  %v6993_v35 = vshrl.u32 %v5583_v22, 16  ;;  %v752_v25 = vrot.slane %v6990_v30, 4  ;;  %v6994_v54 = vshll.u32 %v5583_v22, 16 }
  0x3f   : > { %v5596_v31 = vsel %vm544_vm3, %v731_v40, %v738_v2  ;;  %v6995_v53 = vshrl.u32 %v5591_v37, 16  ;;  %v746_v55 = vor.u32 %v745_v33, %v742_v6  ;;  %v6997_v18 = vshll.u32 %v5591_v37, 16  ;;  %v4996_v6 = vld [vmem:[%s5329_s17 + $0x68] ss:$0 sps:$4 sm:$0xff]  }
  0x40   : > { %7037 = vst [vmem:[#allocation6_spill] sm:$0xff] %v5596_v31  ;;  %4630 = vmatprep.mubr.msk.bf16.mxu1 %vm786_vm4, %v5596_v31  ;;  %v607_v23 = vrot.slane %v6993_v35, 3  ;;  %v5608_v2 = vsel %vm470_vm2, 0, %v4994_v19  ;;  %v753_v40 = vor.u32 %v752_v25, %v749_v36  ;;  %v610_v30 = vrot.slane %v6994_v54, 4  ;;  %v4997_v25 = vld [vmem:[%s5329_s17 + $0x6c] ss:$0 sps:$4 sm:$0xff]  }
  0x41   : > { %v614_v11 = vrot.slane %v6995_v53, 3  ;;  %v5615_v0 = vsel %vm470_vm2, %v4995_v61, 0  ;;  %v617_v33 = vrot.slane %v6997_v18, 4  ;;  %v7000_v35 = vshrl.u32 %v5608_v2, 16 }
  0x42   : > { %v7001_v19 = vshll.u32 %v5608_v2, 16  ;;  %v7002_v36 = vshrl.u32 %v5615_v0, 16  ;;  %v5625_v54 = vsel %vm544_vm3, %v746_v55, %v753_v40  ;;  %v611_v53 = vor.u32 %v610_v30, %v607_v23  ;;  %v4998_v23 = vld [vmem:[%s5329_s17 + $0x70] ss:$0 sps:$4 sm:$0xff]  }
  0x43   : > { %7038 = vst [vmem:[#allocation7_spill] sm:$0xff] %v5625_v54  ;;  %v7004_v61 = vshll.u32 %v5615_v0, 16  ;;  %v5629_v10 = vsel %vm470_vm2, 0, %v4996_v6  ;;  %4631 = vmatmul.mubr.msk.bf16.gmra.mrb[8].mxu1 %vm786_vm4, %v5625_v54  ;;  %v618_v18 = vor.u32 %v617_v33, %v614_v11  ;;  %v622_v9 = vrot.slane %v7000_v35, 3  ;;  %v4999_v33 = vld [vmem:[%s5329_s17 + $0x74] ss:$0 sps:$4 sm:$0xff]  }
  0x44   : > { %v625_v41 = vrot.slane %v7001_v19, 4  ;;  %v629_v55 = vrot.slane %v7002_v36, 3  ;;  %v5643_v40 = vsel %vm470_vm2, %v4997_v25, 0  ;;  %v7008_v6 = vshrl.u32 %v5629_v10, 16 }
  0x45   : > { %v632_v30 = vrot.slane %v7004_v61, 4  ;;  %v7007_v11 = vshll.u32 %v5629_v10, 16  ;;  %v5649_v35 = vsel %vm544_vm3, %v611_v53, %v618_v18  ;;  %v7010_v36 = vshrl.u32 %v5643_v40, 16  ;;  %v5000_v18 = vld [vmem:[%s5329_s17 + $0x28] ss:$0 sps:$4 sm:$0xff]  }
  0x46   : > { %v626_v19 = vor.u32 %v625_v41, %v622_v9  ;;  %v7011_v27 = vshll.u32 %v5643_v40, 16  ;;  %4614 = vmatprep.mubr.msk.bf16.mxu0 %vm786_vm4, %v5649_v35  ;;  %v757_v25 = vrot.slane %v7008_v6, 3  ;;  %v5660_v21 = vsel %vm470_vm2, 0, %v4998_v23 }
  0x47   : > { %v633_v61 = vor.u32 %v632_v30, %v629_v55  ;;  %v760_v26 = vrot.slane %v7007_v11, 4  ;;  %v764_v41 = vrot.slane %v7010_v36, 3  ;;  %v5668_v53 = vsel %vm470_vm2, %v4999_v33, 0  ;;  %v5001_v30 = vld [vmem:[%s5329_s17 + $0x2c] ss:$0 sps:$4 sm:$0xff]  }
  0x48   : > { %v767_v9 = vrot.slane %v7011_v27, 4  ;;  %v7014_v55 = vshrl.u32 %v5660_v21, 16  ;;  %v7017_v6 = vshll.u32 %v5660_v21, 16  ;;  %v7016_v56 = vshrl.u32 %v5668_v53, 16 }
  0x49   : > { %v5673_v11 = vsel %vm544_vm3, %v626_v19, %v633_v61  ;;  %v761_v23 = vor.u32 %v760_v26, %v757_v25  ;;  %v7018_v27 = vshll.u32 %v5668_v53, 16  ;;  %v5683_v52 = vsel %vm470_vm2, 0, %v5000_v18 }
  0x4a   : > { %4615 = vmatmul.mubr.msk.bf16.gmra.mrb[8].mxu0 %vm786_vm4, %v5673_v11  ;;  %v768_v36 = vor.u32 %v767_v9, %v764_v41  ;;  %v772_v33 = vrot.slane %v7014_v55, 3  ;;  %v775_v26 = vrot.slane %v7017_v6, 4  ;;  %v779_v19 = vrot.slane %v7016_v56, 3  ;;  %v5003_v41 = vld [vmem:[%s5329_s17 + $0x34] ss:$0 sps:$4 sm:$0xff]  }
  0x4b   : > { %v5691_v61 = vsel %vm470_vm2, %v5001_v30, 0  ;;  %v7021_v25 = vshrl.u32 %v5683_v52, 16  ;;  %v782_v18 = vrot.slane %v7018_v27, 4  ;;  %v7022_v55 = vshll.u32 %v5683_v52, 16 }
  0x4c   : > { %v5696_v9 = vsel %vm544_vm3, %v761_v23, %v768_v36  ;;  %v7023_v47 = vshrl.u32 %v5691_v61, 16  ;;  %v776_v56 = vor.u32 %v775_v26, %v772_v33  ;;  %v7024_v6 = vshll.u32 %v5691_v61, 16 }
  0x4d   : > { %7039 = vst [vmem:[#allocation8_spill] sm:$0xff] %v5696_v9  ;;  %4634 = vmatprep.mubr.msk.bf16.mxu1 %vm786_vm4, %v5696_v9  ;;  %v637_v30 = vrot.slane %v7021_v25, 3  ;;  %v5708_v48 = vsel %vm470_vm2, 0, %v5002_v51  ;;  %v783_v36 = vor.u32 %v782_v18, %v779_v19  ;;  %v640_v23 = vrot.slane %v7022_v55, 4 }
  0x4e   : > { %v644_v27 = vrot.slane %v7023_v47, 3  ;;  %v5715_v54 = vsel %vm470_vm2, %v5003_v41, 0  ;;  %v647_v33 = vrot.slane %v7024_v6, 4  ;;  %v7030_v26 = vshrl.u32 %v5708_v48, 16 }
  0x4f   : > { %v7029_v25 = vshll.u32 %v5708_v48, 16  ;;  %v7032_v51 = vshrl.u32 %v5715_v54, 16  ;;  %v5723_v19 = vsel %vm544_vm3, %v776_v56, %v783_v36  ;;  %v641_v18 = vor.u32 %v640_v23, %v637_v30 }
  0x50   : > { %7040 = vst [vmem:[#allocation9_spill] sm:$0xff] %v5723_v19  ;;  %v7031_v55 = vshll.u32 %v5715_v54, 16  ;;  %v1070_v47 = vrot.slane %v5392_v46, 4  ;;  %4635 = vmatmul.mubr.msk.bf16.gmra.mrb[12].mxu1 %vm786_vm4, %v5723_v19  ;;  %v648_v41 = vor.u32 %v647_v33, %v644_v27  ;;  %v652_v6 = vrot.slane %v7030_v26, 3 }
  0x51   : > { %v655_v9 = vrot.slane %v7029_v25, 4  ;;  %v659_v56 = vrot.slane %v7032_v51, 3  ;;  %v7041_v36 = vrot.slane %v5385_v43, 4  ;;  %v1072_v31 = vrot.slane %v5408_v57, 4 }
  0x52   : > { %v662_v30 = vrot.slane %v7031_v55, 4  ;;  %v1073_v27 = vrot.slane %v5415_v60, 4  ;;  %v5004_v33 = vld [vmem:[%s6964_s3 + $0x8] ss:$0 sps:$4 sm:$0x66]   ;;  %v5746_v25 = vsel %vm544_vm3, %v641_v18, %v648_v41  ;;  %v7042_v55 = vshrl.u32 %v5385_v43, 16 }
  0x53   : > { %v1071_v23 = vsel %vm470_vm2, %v7041_v36, %v1070_v47  ;;  %v656_v26 = vor.u32 %v655_v9, %v652_v6  ;;  %v7043_v19 = vshll.u32 %v5385_v43, 16  ;;  %4618 = vmatprep.mubr.msk.bf16.mxu0 %vm786_vm4, %v5746_v25  ;;  %v7044_v60 = vshrl.u32 %v5392_v46, 16 }
  0x54   : > { %4640 = vmatprep.mubr.msk.bf16.mxu1 %vm786_vm4, %v1071_v23  ;;  %v1438_v51 = vrot.slane %v7042_v55, 4  ;;  %v663_v57 = vor.u32 %v662_v30, %v659_v56  ;;  %v7045_v9 = vshll.u32 %v5392_v46, 16  ;;  %v1075_v43 = vrot.slane %v5481_v4, 4 }
  0x55   : > { %v1439_v47 = vrot.slane %v7043_v19, 5  ;;  %v1441_v6 = vrot.slane %v7044_v60, 4  ;;  %v1076_v19 = vrot.slane %v5484_v5, 4  ;;  %v1447_v41 = vor.u32 %v5432_v12, %v5430_v8 }
  0x56   : > { %v1442_v18 = vrot.slane %v7045_v9, 5  ;;  %v5771_v36 = vsel %vm544_vm3, %v656_v26, %v663_v57  ;;  %v5774_v23 = vsel %vm470_vm2, %v1072_v31, %v1073_v27  ;;  %v1450_v30 = vor.u32 %v5436_v16, %v5434_v15 }
  0x57   : > { %v1440_v55 = vor.u32 %v1439_v47, %v1438_v51  ;;  %4619 = vmatmul.mubr.msk.bf16.gmra.mrb[12].mxu0 %vm786_vm4, %v5771_v36  ;;  %v5781_v46 = vsel %vm470_vm2, %v1075_v43, %v1076_v19  ;;  %v1078_v51 = vrot.slane %v5506_v45, 4  ;;  %v2156_v47 = vshrl.u32 %v5004_v33, 16 }
  0x58   : > { %v1443_v56 = vor.u32 %v1442_v18, %v1441_v6  ;;  %v2159_v8 = vshll.u32 %v5004_v33, 16  ;;  %v1079_v26 = vrot.slane %v5516_v1, 4  ;;  %v7046_v31 = vshrl.u32 %v5481_v4, 16  ;;  %4641 = vmatmul.mubr.msk.bf16.vlgmr.msra.gmra.mrb[16].mxu1 %vm786_vm4, %v5774_v23 }
  0x59   : > { %v7047_v57 = vshll.u32 %v5481_v4, 16  ;;  %v5794_v16 = vsel %vm1437_vm5, %v1447_v41, %v1450_v30  ;;  %v2158_v60 = vrot.slane %v2156_v47, 1  ;;  %v7048_v6 = vshrl.u32 %v5484_v5, 16  ;;  %4707 = vmatpush3.bf16.msra.mxu1 %v5378_v39  ;;  %4644 = vmatprep.mubr.msk.bf16.mxu1 %vm786_vm4, %v5781_v46 }
  0x5a   : > { %v1444_v12 = vsel %vm1437_vm5, %v1440_v55, %v1443_v56  ;;  %v1452_v27 = vrot.slane %v7046_v31, 4  ;;  %v2161_v33 = vrot.slane %v2159_v8, 2  ;;  %v7049_v18 = vshll.u32 %v5484_v5, 16 }
  0x5b   : > { %v1453_v15 = vrot.slane %v7047_v57, 5  ;;  %4674 = vmatprep.mubr.msk.bf16.mxu0 %vm786_vm4, %v1444_v12  ;;  %v1455_v9 = vrot.slane %v7048_v6, 4  ;;  %v1081_v43 = vrot.slane %v5583_v22, 4  ;;  %v1082_v19 = vrot.slane %v5591_v37, 4 }
  0x5c   : > { %v1456_v55 = vrot.slane %v7049_v18, 5  ;;  %v2162_v41 = vor.u32 %v2161_v33, %v2158_v60  ;;  %v7050_v56 = vshrl.u32 %v5506_v45, 16  ;;  %v7051_v47 = vshll.u32 %v5506_v45, 16 }
  0x5d   : > { %v1454_v4 = vor.u32 %v1453_v15, %v1452_v27  ;;  %v7052_v39 = vshrl.u32 %v5516_v1, 16  ;;  %v5812_v31 = vsel %vm470_vm2, %v1078_v51, %v1079_v26  ;;  %v7053_v5 = vshll.u32 %v5516_v1, 16 }
  0x5e   : > { %v1459_v30 = vrot.slane %v7050_v56, 4  ;;  %v1460_v8 = vrot.slane %v7051_v47, 5  ;;  %v1457_v27 = vor.u32 %v1456_v55, %v1455_v9  ;;  %v1084_v15 = vrot.slane %v5608_v2, 4 }
  0x5f   : > { %v1462_v12 = vrot.slane %v7052_v39, 4  ;;  %v1463_v57 = vrot.slane %v7053_v5, 5  ;;  %v2167_v60 = vand.u32 %v2162_v41, %v5313_v3  ;;  %v1085_v6 = vrot.slane %v5615_v0, 4  ;;  %4675 = vmatmul.mubr.msk.bf16.vlgmr.msra.gmra.mrb[16].mxu0 %vm786_vm4, %v5794_v16 }
  0x60   : > { %v1461_v33 = vor.u32 %v1460_v8, %v1459_v30  ;;  %v7054_v45 = vshrl.u32 %v5583_v22, 16  ;;  %v5822_v56 = vsel %vm1437_vm5, %v1454_v4, %v1457_v27  ;;  %v7055_v51 = vshll.u32 %v5583_v22, 16  ;;  %4645 = vmatmul.mubr.msk.bf16.gmra.mrb[20].mxu1 %vm786_vm4, %v5812_v31 }
  0x61   : > { %v1464_v47 = vor.u32 %v1463_v57, %v1462_v12  ;;  %v7056_v1 = vshrl.u32 %v5591_v37, 16  ;;  %4740 = vmatprep.subr.bf16.mxu0 %v2167_v60  ;;  %v5831_v55 = vsel %vm470_vm2, %v1081_v43, %v1082_v19  ;;  %v7057_v41 = vshll.u32 %v5591_v37, 16  ;;  %4678 = vmatprep.mubr.msk.bf16.mxu0 %vm786_vm4, %v5822_v56 }
  0x62   : > { %v1466_v18 = vrot.slane %v7054_v45, 4  ;;  %v1467_v26 = vrot.slane %v7055_v51, 5  ;;  %v1087_v4 = vrot.slane %v5683_v52, 4  ;;  %v1088_v8 = vrot.slane %v5691_v61, 4  ;;  %4741 = vmatpush3.bf16.msra.mxu0 %v2167_v60  ;;  %4648 = vmatprep.mubr.msk.bf16.mxu1 %vm786_vm4, %v5831_v55 }
  0x63   : > { %v1469_v9 = vrot.slane %v7056_v1, 4  ;;  %v1470_v30 = vrot.slane %v7057_v41, 5  ;;  %v5840_v22 = vsel %vm470_vm2, %v1084_v15, %v1085_v6  ;;  %v7058_v12 = vshrl.u32 %v5608_v2, 16 }
  0x64   : > { %v1468_v39 = vor.u32 %v1467_v26, %v1466_v18  ;;  %v7059_v43 = vshll.u32 %v5608_v2, 16  ;;  %v5849_v37 = vsel %vm1437_vm5, %v1461_v33, %v1464_v47  ;;  %v7060_v57 = vshrl.u32 %v5615_v0, 16 }
  0x65   : > { %v1473_v27 = vrot.slane %v7058_v12, 4  ;;  %v1471_v5 = vor.u32 %v1470_v30, %v1469_v9  ;;  %v7061_v15 = vshll.u32 %v5615_v0, 16  ;;  %v1090_v2 = vrot.slane %v5708_v48, 4 }
  0x66   : > { %v1474_v19 = vrot.slane %v7059_v43, 5  ;;  %v1476_v60 = vrot.slane %v7060_v57, 4  ;;  %v1091_v18 = vrot.slane %v5715_v54, 4  ;;  %v7062_v51 = vshrl.u32 %v5683_v52, 16 }
  0x67   : > { %v1477_v6 = vrot.slane %v7061_v15, 5  ;;  %v5862_v33 = vsel %vm470_vm2, %v1087_v4, %v1088_v8  ;;  %v7063_v1 = vshll.u32 %v5683_v52, 16  ;;  %v7064_v0 = vshrl.u32 %v5691_v61, 16  ;;  %4679 = vmatmul.mubr.msk.bf16.gmra.mrb[20].mxu0 %vm786_vm4, %v5849_v37 }
  0x68   : > { %v1475_v45 = vor.u32 %v1474_v19, %v1473_v27  ;;  %v1480_v26 = vrot.slane %v7062_v51, 4  ;;  %v5869_v30 = vsel %vm1437_vm5, %v1468_v39, %v1471_v5  ;;  %v7065_v12 = vshll.u32 %v5691_v61, 16  ;;  %4649 = vmatmul.mubr.msk.bf16.gmra.mrb[24].mxu1 %vm786_vm4, %v5840_v22 }
  0x69   : > { %v1478_v47 = vor.u32 %v1477_v6, %v1476_v60  ;;  %v1481_v9 = vrot.slane %v7063_v1, 5  ;;  %v1483_v41 = vrot.slane %v7064_v0, 4  ;;  %v1093_v43 = vrot.slane %v5335_v13, 4  ;;  %4682 = vmatprep.mubr.msk.bf16.mxu0 %vm786_vm4, %v5869_v30  ;;  %4652 = vmatprep.mubr.msk.bf16.mxu1 %vm786_vm4, %v5862_v33 }
  0x6a   : > { %v1484_v27 = vrot.slane %v7065_v12, 5  ;;  %v1094_v19 = vrot.slane %v5342_v17, 4  ;;  %v5876_v4 = vsel %vm470_vm2, %v1090_v2, %v1091_v18  ;;  %v7066_v52 = vshrl.u32 %v5708_v48, 16 }
  0x6b   : > { %v1482_v8 = vor.u32 %v1481_v9, %v1480_v26  ;;  %v7067_v60 = vshll.u32 %v5708_v48, 16  ;;  %v5883_v39 = vsel %vm1437_vm5, %v1475_v45, %v1478_v47  ;;  %v7068_v61 = vshrl.u32 %v5715_v54, 16 }
  0x6c   : > { %v1487_v57 = vrot.slane %v7066_v52, 4  ;;  %v1485_v5 = vor.u32 %v1484_v27, %v1483_v41  ;;  %v7069_v51 = vshll.u32 %v5715_v54, 16  ;;  %v5892_v2 = vsel %vm470_vm2, %v1093_v43, %v1094_v19 }
  0x6d   : > { %v1488_v15 = vrot.slane %v7067_v60, 5  ;;  %v1490_v6 = vrot.slane %v7068_v61, 4  ;;  %v1096_v18 = vrot.slane %v5355_v24, 4  ;;  %v1097_v48 = vrot.slane %v5366_v29, 4 }
  0x6e   : > { %v1491_v1 = vrot.slane %v7069_v51, 5  ;;  %v7070_v45 = vshrl.u32 %v5335_v13, 16  ;;  %v7071_v54 = vshll.u32 %v5335_v13, 16  ;;  %v7072_v41 = vshrl.u32 %v5342_v17, 16 }
  0x6f   : > { %v1489_v47 = vor.u32 %v1488_v15, %v1487_v57  ;;  %v5907_v27 = vsel %vm1437_vm5, %v1482_v8, %v1485_v5  ;;  %v7073_v43 = vshll.u32 %v5342_v17, 16  ;;  %v1099_v52 = vrot.slane %v5439_v20, 4  ;;  %4683 = vmatmul.mubr.msk.bf16.gmra.mrb[24].mxu0 %vm786_vm4, %v5883_v39 }
  0x70   : > { %v1494_v26 = vrot.slane %v7070_v45, 4  ;;  %v1492_v9 = vor.u32 %v1491_v1, %v1490_v6  ;;  %v1495_v0 = vrot.slane %v7071_v54, 5  ;;  %v1497_v12 = vrot.slane %v7072_v41, 4  ;;  %4686 = vmatprep.mubr.msk.bf16.mxu0 %vm786_vm4, %v5907_v27  ;;  %4653 = vmatmul.mubr.msk.bf16.gmra.mrb[28].mxu1 %vm786_vm4, %v5876_v4 }
  0x71   : > { %v1498_v19 = vrot.slane %v7073_v43, 5  ;;  %v1100_v57 = vrot.slane %v5445_v28, 4  ;;  %v5916_v13 = vsel %vm470_vm2, %v1096_v18, %v1097_v48  ;;  %v7074_v15 = vshrl.u32 %v5355_v24, 16  ;;  %4656 = vmatprep.mubr.msk.bf16.mxu1 %vm786_vm4, %v5892_v2 }
  0x72   : > { %v1496_v60 = vor.u32 %v1495_v0, %v1494_v26  ;;  %v7075_v8 = vshll.u32 %v5355_v24, 16  ;;  %v7076_v51 = vshrl.u32 %v5366_v29, 16  ;;  %v7077_v18 = vshll.u32 %v5366_v29, 16 }
  0x73   : > { %v5920_v61 = vrot.slane %v7074_v15, 4  ;;  %v1499_v17 = vor.u32 %v1498_v19, %v1497_v12  ;;  %v5927_v6 = vsel %vm470_vm2, %v1099_v52, %v1100_v57  ;;  %v5938_v45 = vsel %vm1437_vm5, %v1489_v47, %v1492_v9 }
  0x74   : > { %v5924_v5 = vrot.slane %v7075_v8, 5  ;;  %v5931_v1 = vrot.slane %v7076_v51, 4  ;;  %v5935_v48 = vrot.slane %v7077_v18, 5  ;;  %v1102_v26 = vrot.slane %v5456_v42, 4 }
  0x75   : > { %v1103_v24 = vrot.slane %v5459_v44, 4  ;;  %v7078_v54 = vshrl.u32 %v5439_v20, 16  ;;  %v5945_v41 = vsel %vm1437_vm5, %v1496_v60, %v1499_v17  ;;  %v7079_v29 = vshll.u32 %v5439_v20, 16 }
  0x76   : > { %v7080_v19 = vshrl.u32 %v5445_v28, 16  ;;  %v7081_v52 = vshll.u32 %v5445_v28, 16  ;;  %v1105_v15 = vrot.slane %v5531_v62, 4  ;;  %v1106_v60 = vrot.slane %v5538_v59, 4 }
  0x77   : > { %v1508_v0 = vrot.slane %v7078_v54, 4  ;;  %v1509_v43 = vrot.slane %v7079_v29, 5  ;;  %v5954_v9 = vsel %vm470_vm2, %v1102_v26, %v1103_v24  ;;  %v1506_v20 = vor.u32 %v5935_v48, %v5931_v1  ;;  %4687 = vmatmul.mubr.msk.bf16.gmra.mrb[28].mxu0 %vm786_vm4, %v5938_v45 }
  0x78   : > { %v1511_v47 = vrot.slane %v7080_v19, 4  ;;  %v1512_v57 = vrot.slane %v7081_v52, 5  ;;  %v7082_v17 = vshrl.u32 %v5456_v42, 16  ;;  %v7083_v18 = vshll.u32 %v5456_v42, 16  ;;  %4690 = vmatprep.mubr.msk.bf16.mxu0 %vm786_vm4, %v5945_v41  ;;  %4657 = vmatmul.mubr.msk.bf16.gmra.mrb[32].mxu1 %vm786_vm4, %v5916_v13 }
  0x79   : > { %v1510_v8 = vor.u32 %v1509_v43, %v1508_v0  ;;  %v5971_v24 = vsel %vm470_vm2, %v1105_v15, %v1106_v60  ;;  %v7084_v54 = vshrl.u32 %v5459_v44, 16  ;;  %v7085_v19 = vshll.u32 %v5459_v44, 16  ;;  %4660 = vmatprep.mubr.msk.bf16.mxu1 %vm786_vm4, %v5927_v6 }
  0x7a   : > { %v1515_v51 = vrot.slane %v7082_v17, 4  ;;  %v1516_v26 = vrot.slane %v7083_v18, 5  ;;  %v1513_v28 = vor.u32 %v1512_v57, %v1511_v47  ;;  %v1108_v42 = vrot.slane %v5560_v32, 4 }
  0x7b   : > { %v1518_v29 = vrot.slane %v7084_v54, 4  ;;  %v1519_v1 = vrot.slane %v7085_v19, 5  ;;  %v1109_v0 = vrot.slane %v5568_v34, 4  ;;  %v7086_v43 = vshrl.u32 %v5531_v62, 16 }
  0x7c   : > { %v1517_v48 = vor.u32 %v1516_v26, %v1515_v51  ;;  %v5986_v52 = vsel %vm1437_vm5, %v1510_v8, %v1513_v28  ;;  %v7087_v44 = vshll.u32 %v5531_v62, 16  ;;  %v7088_v60 = vshrl.u32 %v5538_v59, 16 }
  0x7d   : > { %v1522_v47 = vrot.slane %v7086_v43, 4  ;;  %v1520_v57 = vor.u32 %v1519_v1, %v1518_v29  ;;  %v5993_v51 = vsel %vm470_vm2, %v1108_v42, %v1109_v0  ;;  %v7089_v18 = vshll.u32 %v5538_v59, 16 }
  0x7e   : > { %v1523_v15 = vrot.slane %v7087_v44, 5  ;;  %v1525_v17 = vrot.slane %v7088_v60, 4  ;;  %v1111_v54 = vrot.slane %v5629_v10, 4  ;;  %v1112_v19 = vrot.slane %v5643_v40, 4 }
  0x7f   : > { %v1526_v26 = vrot.slane %v7089_v18, 5  ;;  %v6000_v8 = vsel %vm1437_vm5, %v1517_v48, %v1520_v57  ;;  %v7090_v62 = vshrl.u32 %v5560_v32, 16  ;;  %v7091_v1 = vshll.u32 %v5560_v32, 16  ;;  %v5005_v32 = vld [vmem:[%s6964_s3 + $0x8] sm:$0x18]  }
  0x80   : > { %v1524_v28 = vor.u32 %v1523_v15, %v1522_v47  ;;  %v6007_v42 = vsel %vm470_vm2, %v1111_v54, %v1112_v19  ;;  %v7092_v59 = vshrl.u32 %v5568_v34, 16  ;;  %v7093_v60 = vshll.u32 %v5568_v34, 16  ;;  %4661 = vmatmul.mubr.msk.bf16.gmra.mrb[36].mxu1 %vm786_vm4, %v5954_v9 }
  0x81   : > { %v1529_v29 = vrot.slane %v7090_v62, 4  ;;  %v1530_v43 = vrot.slane %v7091_v1, 5  ;;  %v1527_v44 = vor.u32 %v1526_v26, %v1525_v17  ;;  %v1114_v48 = vrot.slane %v5660_v21, 4  ;;  %4664 = vmatprep.mubr.msk.bf16.mxu1 %vm786_vm4, %v5971_v24 }
  0x82   : > { %v1532_v0 = vrot.slane %v7092_v59, 4  ;;  %v1533_v18 = vrot.slane %v7093_v60, 5  ;;  %v1115_v47 = vrot.slane %v5668_v53, 4  ;;  %v7094_v57 = vshrl.u32 %v5629_v10, 16 }
  0x83   : > { %v1531_v12 = vor.u32 %v1530_v43, %v1529_v29  ;;  %v6023_v17 = vsel %vm1437_vm5, %v1524_v28, %v1527_v44  ;;  %v7095_v26 = vshll.u32 %v5629_v10, 16  ;;  %v7096_v19 = vshrl.u32 %v5643_v40, 16  ;;  %v4291_v29 = vld [vmem:[%s6964_s3 + $0x10] sm:$0x3] }
  0x84   : > { %v1536_v15 = vrot.slane %v7094_v57, 4  ;;  %v1534_v34 = vor.u32 %v1533_v18, %v1532_v0  ;;  %v6035_v1 = vsel %vm470_vm2, %v1114_v48, %v1115_v47  ;;  %v7097_v28 = vshll.u32 %v5643_v40, 16 }
  0x85   : > { %v1537_v54 = vrot.slane %v7095_v26, 5  ;;  %v1539_v62 = vrot.slane %v7096_v19, 4  ;;  %v7098_v44 = vshrl.u32 %v5660_v21, 16  ;;  %v7099_v59 = vshll.u32 %v5660_v21, 16 }
  0x86   : > { %v1540_v43 = vrot.slane %v7097_v28, 5  ;;  %v6046_v60 = vsel %vm1437_vm5, %v1531_v12, %v1534_v34  ;;  %v7100_v57 = vshrl.u32 %v5668_v53, 16  ;;  %v7101_v47 = vshll.u32 %v5668_v53, 16 }
  0x87   : > { %v1543_v10 = vrot.slane %v7098_v44, 4  ;;  %v1544_v0 = vrot.slane %v7099_v59, 5  ;;  %v1538_v18 = vor.u32 %v1537_v54, %v1536_v15  ;;  %v2440_v19 = vrot.slane %v5005_v32, 3 }
  0x88   : > { %v1546_v48 = vrot.slane %v7100_v57, 4  ;;  %v1547_v40 = vrot.slane %v7101_v47, 5  ;;  %v1541_v26 = vor.u32 %v1540_v43, %v1539_v62  ;;  %v2725_v28 = vand.u32 %v4291_v29, %v5313_v3  ;;  %v5008_v62 = vld [vmem:[%s6964_s3 + $0x10] ss:$0 sps:$4 sm:$0x66]   ;;  %4665 = vmatmul.mubr.msk.bf16.gmra.mrb[40].mxu1 %vm786_vm4, %v5993_v51 }
  0x89   : > { %v1545_v21 = vor.u32 %v1544_v0, %v1543_v10  ;;  %v7102_v12 = vor.u32 %v5924_v5, %v5920_v61  ;;  %v2445_v34 = vand.u32 %v2440_v19, %v5313_v3  ;;  %v5006_v61 = vld [vmem:[%s5329_s17 + $0x78] ss:$0 sps:$4 sm:$0xff]   ;;  %v5007_v5 = vld [vmem:[%s5329_s17 + $0x7c] ss:$0 sps:$4 sm:$0xff]   ;;  %4668 = vmatprep.mubr.msk.bf16.mxu1 %vm786_vm4, %v6007_v42  ;;  %v2994_v0 = vshrl.u32 %v5008_v62, 16  ;;  %s5146_s17 = scalar_lea.vmem %s5145_s27, 4096 }
  0x8a   : > { %v1548_v44 = vor.u32 %v1547_v40, %v1546_v48  ;;  %v6062_v53 = vsel %vm1437_vm5, %v1538_v18, %v1541_v26  ;;  %4808 = vmatprep.subr.bf16.mxu0 %v2725_v28  ;;  %v6084_v32 = vsel %vm470_vm2, %v5007_v5, 0  ;;  %v2997_v18 = vshll.u32 %v5008_v62, 16  ;;  %v5009_v5 = vld [vmem:[%s6964_s3 + $0x10] sm:$0x18]  }
  0x8b   : > { %v6059_v15 = vsel %vm1437_vm5, %v7102_v12, %v1506_v20  ;;  %4774 = vmatprep.subr.bf16.mxu1 %v2445_v34  ;;  %v6081_v20 = vsel %vm470_vm2, 0, %v5006_v61  ;;  %v1873_v10 = vshrl.u32 %v6084_v32, 16  ;;  %v1876_v59 = vshll.u32 %v6084_v32, 16 }
  0x8c   : > { %v6066_v54 = vsel %vm1437_vm5, %v1545_v21, %v1548_v44  ;;  %4691 = vmatmul.mubr.msk.bf16.gmra.mrb[32].mxu0 %vm786_vm4, %v6059_v15  ;;  %v1866_v29 = vshrl.u32 %v6081_v20, 16  ;;  %v1869_v43 = vshll.u32 %v6081_v20, 16  ;;  %v2996_v19 = vrot.slane %v2994_v0, 1 }
  0x8d   : > { %4694 = vmatprep.mubr.msk.bf16.mxu0 %vm786_vm4, %v5986_v52  ;;  %v2429_v47 = vrot.slane %v1873_v10, 4  ;;  %v2430_v40 = vrot.slane %v1876_v59, 5  ;;  %v2999_v44 = vrot.slane %v2997_v18, 2  ;;  %v3278_v0 = vrot.slane %v5009_v5, 3 }
  0x8e   : > { %v2426_v57 = vrot.slane %v1866_v29, 4  ;;  %v2427_v48 = vrot.slane %v1869_v43, 5  ;;  %v1875_v18 = vrot.slane %v1873_v10, 3 }
  0x8f   : > { %v2431_v21 = vor.u32 %v2430_v40, %v2429_v47  ;;  %v3000_v61 = vor.u32 %v2999_v44, %v2996_v19  ;;  %v7106_v47 = vld [vmem:[#allocation9_spill] sm:$0xff]  ;;  %v5011_v19 = vld [vmem:[%s5758_s14 + $0x4] ss:$0 sps:$4 sm:$0xff]   ;;  %v2149_v44 = vrot.slane %v6084_v32, 4 }
  0x90   : > { %v2428_v26 = vor.u32 %v2427_v48, %v2426_v57  ;;  %4669 = vmatmul.mubr.msk.bf16.gmra.mrb[44].mxu1 %vm786_vm4, %v6035_v1  ;;  %v1878_v57 = vrot.slane %v1876_v59, 4  ;;  %v7105_v48 = vld [vmem:[#allocation8_spill] sm:$0xff]  ;;  %v6183_v10 = vsel %vm470_vm2, %v5011_v19, 0  ;;  %v2148_v59 = vrot.slane %v6081_v20, 4 }
  0x91   : > { %4708 = vmatprep.mubr.msk.bf16.mxu1 %vm786_vm4, %v5464_v50  ;;  %v6116_v62 = vand.u32 %v3000_v61, %v5313_v3  ;;  %v3283_v50 = vand.u32 %v3278_v0, %v5313_v3  ;;  %v7103_v3 = vld [vmem:[#allocation6_spill] sm:$0xff]  ;;  %v2711_v0 = vshrl.u32 %v6183_v10, 16 }
  0x92   : > { %v6104_v12 = vsel %vm1437_vm5, %v2428_v26, %v2431_v21  ;;  %v1879_v26 = vor.u32 %v1878_v57, %v1875_v18  ;;  %v5010_v21 = vld [vmem:[%s5758_s14] ss:$0 sps:$4 sm:$0xff]   ;;  %v6208_v57 = vsel %vm470_vm2, %v2148_v59, %v2149_v44  ;;  %s4015_s14 = sshll.u32 %s6705_s12, 4  ;;  %s6907_s14 = int_to_ptr.vmem [resolvable:$true] %s4015_s14 }
  0x93   : > { %v3267_v32 = vrot.slane %v2711_v0, 4  ;;  %s5140_s24 = scalar_lea.vmem %s6907_s14, 2048  ;;  %p5147_p1 = scmp.lt.s32.totalorder %s6907_s14, %s5145_s27 }
  0x94   : > { %4695 = vmatmul.mubr.msk.bf16.gmra.mrb[36].mxu0 %vm786_vm4, %v6000_v8  ;;  %p5141_p12 = scmp.ne.s32.totalorder %s6907_s14, %s5140_s24  ;;  %p5148_p2 = scmp.lt.s32.totalorder %s5146_s17, %s5140_s24 }
  0x95   : > { %4698 = vmatprep.mubr.msk.bf16.mxu0 %vm786_vm4, %v6023_v17 }
  0x96   : > { %p5142_p13 = pnand %p5141_p12, %p5294_p4  ;;  %p5149_p3 = por %p5148_p2, %p5147_p1 }
  0x98   : > { %4709 = vmatmul.mubr.msk.bf16.vlgmr.msra.gmra.mrb[48].mxu1 %vm786_vm4, %v5549_v38  ;;  %p5143_p0 = pneg %p5142_p13 }
  0x99   : > { %4775 = vmatpush3.bf16.msra.mxu1 %v2445_v34  ;;  %4712 = vmatprep.mubr.msk.bf16.mxu1 %vm786_vm4, %v5573_v58  ;;  %v1871_v34 = vrot.slane %v1869_v43, 4  ;;  %v6180_v43 = vsel %vm470_vm2, 0, %v5010_v21 }
  0x9a   : > { %4842 = vmatprep.subr.bf16.mxu1 %v6116_v62  ;;  %v2704_v61 = vshrl.u32 %v6180_v43, 16  ;;  %v2707_v5 = vshll.u32 %v6180_v43, 16  ;;  %p5150_p5 = pnand %p5149_p3, %p5143_p0 }
  0x9c   : > { %4699 = vmatmul.mubr.msk.bf16.gmra.mrb[40].mxu0 %vm786_vm4, %v6046_v60  ;;  %v3265_v20 = vrot.slane %v2707_v5, 5 }
  0x9d   : > { %4702 = vmatprep.mubr.msk.bf16.mxu0 %vm786_vm4, %v6062_v53 }
  0xa0   : > { %4713 = vmatmul.mubr.msk.bf16.gmra.mrb[52].mxu1 %vm786_vm4, %v5649_v35 }
  0xa1   : > { %4716 = vmatprep.mubr.msk.bf16.mxu1 %vm786_vm4, %v5673_v11 }
  0xa4   : > { %4703 = vmatmul.mubr.msk.bf16.gmra.mrb[44].mxu0 %vm786_vm4, %v6066_v54 }
  0xa5   : > { %4742 = vmatprep.mubr.msk.bf16.mxu0 %vm786_vm4, %v5774_v23  ;;  %v7104_v23 = vld [vmem:[#allocation7_spill] sm:$0xff] }
  0xa8   : > { %4717 = vmatmul.mubr.msk.bf16.gmra.mrb[56].mxu1 %vm786_vm4, %v5746_v25 }
  0xa9   : > { %4720 = vmatprep.mubr.msk.bf16.mxu1 %vm786_vm4, %v5771_v36 }
  0xac   : > { %4743 = vmatmul.mubr.msk.bf16.vlgmr.msra.gmra.mrb[48].mxu0 %vm786_vm4, %v5781_v46 }
  0xad   : > { %4809 = vmatpush3.bf16.msra.mxu0 %v2725_v28  ;;  %4746 = vmatprep.mubr.msk.bf16.mxu0 %vm786_vm4, %v5812_v31  ;;  %v1868_v28 = vrot.slane %v1866_v29, 3 }
  0xae   : > { %4876 = vmatprep.subr.bf16.mxu0 %v3283_v50 }
  0xaf   : > { %v1872_v40 = vor.u32 %v1871_v34, %v1868_v28  ;;  %v2714_v28 = vshll.u32 %v6183_v10, 16  ;;  %v3264_v34 = vrot.slane %v2704_v61, 4 }
  0xb0   : > { %4721 = vmatmul.mubr.msk.bf16.gmra.mrb[60].mxu1 %vm786_vm4, %v5397_v49 }
  0xb1   : > { %4724 = vmatprep.mubr.msk.bf16.mxu1 %vm786_vm4, %v5420_v63  ;;  %v6177_v29 = vsel %vm544_vm3, %v1872_v40, %v1879_v26  ;;  %v3268_v18 = vrot.slane %v2714_v28, 5  ;;  %v3266_v40 = vor.u32 %v3265_v20, %v3264_v34  ;;  %v2716_v21 = vrot.slane %v2714_v28, 4 }
  0xb3   : > { %v3269_v26 = vor.u32 %v3268_v18, %v3267_v32 }
  0xb4   : > { %4747 = vmatmul.mubr.msk.bf16.gmra.mrb[52].mxu0 %vm786_vm4, %v5831_v55 }
  0xb5   : > { %4750 = vmatprep.mubr.msk.bf16.mxu0 %vm786_vm4, %v5840_v22 }
  0xb8   : > { %4725 = vmatmul.mubr.msk.bf16.gmra.mrb[64].mxu1 %vm786_vm4, %v5497_v14 }
  0xb9   : > { %4728 = vmatprep.mubr.msk.bf16.mxu1 %vm786_vm4, %v5520_v7 }
  0xbc   : > { %4751 = vmatmul.mubr.msk.bf16.gmra.mrb[56].mxu0 %vm786_vm4, %v5862_v33 }
  0xbd   : > { %4754 = vmatprep.mubr.msk.bf16.mxu0 %vm786_vm4, %v5876_v4 }
  0xc0   : > { %4729 = vmatmul.mubr.msk.bf16.gmra.mrb[68].mxu1 %vm786_vm4, %v7103_v3 }
  0xc1   : > { %4732 = vmatprep.mubr.msk.bf16.mxu1 %vm786_vm4, %v7104_v23 }
  0xc4   : > { %4755 = vmatmul.mubr.msk.bf16.gmra.mrb[60].mxu0 %vm786_vm4, %v5892_v2 }
  0xc5   : > { %4758 = vmatprep.mubr.msk.bf16.mxu0 %vm786_vm4, %v5916_v13 }
  0xc8   : > { %4733 = vmatmul.mubr.msk.bf16.gmra.mrb[72].mxu1 %vm786_vm4, %v7105_v48 }
  0xc9   : > { %4736 = vmatprep.mubr.msk.bf16.mxu1 %vm786_vm4, %v7106_v47 }
  0xcc   : > { %4759 = vmatmul.mubr.msk.bf16.gmra.mrb[64].mxu0 %vm786_vm4, %v5927_v6 }
  0xcd   : > { %4762 = vmatprep.mubr.msk.bf16.mxu0 %vm786_vm4, %v5954_v9 }
  0xd0   : > { %4737 = vmatmul.mubr.msk.bf16.gmra.mrb[76].mxu1 %vm786_vm4, %v6177_v29 }
  0xd1   : > { %4776 = vmatprep.mubr.msk.bf16.mxu1 %vm786_vm4, %v5794_v16  ;;  %v6213_v16 = vsel %vm1437_vm5, %v3266_v40, %v3269_v26 }
  0xd4   : > { %4763 = vmatmul.mubr.msk.bf16.gmra.mrb[68].mxu0 %vm786_vm4, %v5971_v24 }
  0xd5   : > { %4766 = vmatprep.mubr.msk.bf16.mxu0 %vm786_vm4, %v5993_v51 }
  0xd8   : > { %4777 = vmatmul.mubr.msk.bf16.vlgmr.msra.gmra.mrb[80].mxu1 %vm786_vm4, %v5822_v56 }
  0xd9   : > { %4843 = vmatpush3.bf16.msra.mxu1 %v6116_v62  ;;  %4780 = vmatprep.mubr.msk.bf16.mxu1 %vm786_vm4, %v5849_v37 }
  0xdc   : > { %4767 = vmatmul.mubr.msk.bf16.gmra.mrb[72].mxu0 %vm786_vm4, %v6007_v42 }
  0xdd   : > { %4770 = vmatprep.mubr.msk.bf16.mxu0 %vm786_vm4, %v6035_v1 }
  0xe0   : > { %4781 = vmatmul.mubr.msk.bf16.gmra.mrb[84].mxu1 %vm786_vm4, %v5869_v30 }
  0xe1   : > { %4784 = vmatprep.mubr.msk.bf16.mxu1 %vm786_vm4, %v5883_v39 }
  0xe4   : > { %4771 = vmatmul.mubr.msk.bf16.gmra.mrb[76].mxu0 %vm786_vm4, %v6208_v57 }
  0xe5   : > { %4810 = vmatprep.mubr.msk.bf16.mxu0 %vm786_vm4, %v5549_v38 }
  0xe8   : > { %4785 = vmatmul.mubr.msk.bf16.gmra.mrb[88].mxu1 %vm786_vm4, %v5907_v27 }
  0xe9   : > { %4788 = vmatprep.mubr.msk.bf16.mxu1 %vm786_vm4, %v5938_v45 }
  0xec   : > { %4811 = vmatmul.mubr.msk.bf16.vlgmr.msra.gmra.mrb[80].mxu0 %vm786_vm4, %v5573_v58 }
  0xed   : > { %4877 = vmatpush3.bf16.msra.mxu0 %v3283_v50  ;;  %4814 = vmatprep.mubr.msk.bf16.mxu0 %vm786_vm4, %v5649_v35 }
  0xf0   : > { %4789 = vmatmul.mubr.msk.bf16.gmra.mrb[92].mxu1 %vm786_vm4, %v5945_v41 }
  0xf1   : > { %4792 = vmatprep.mubr.msk.bf16.mxu1 %vm786_vm4, %v6059_v15 }
  0xf4   : > { %4815 = vmatmul.mubr.msk.bf16.gmra.mrb[84].mxu0 %vm786_vm4, %v5673_v11 }
  0xf5   : > { %4818 = vmatprep.mubr.msk.bf16.mxu0 %vm786_vm4, %v5746_v25 }
  0xf8   : > { %4793 = vmatmul.mubr.msk.bf16.gmra.mrb[96].mxu1 %vm786_vm4, %v5986_v52 }
  0xf9   : > { %4796 = vmatprep.mubr.msk.bf16.mxu1 %vm786_vm4, %v6000_v8 }
  0xfc   : > { %4819 = vmatmul.mubr.msk.bf16.gmra.mrb[88].mxu0 %vm786_vm4, %v5771_v36 }
  0xfd   : > { %4822 = vmatprep.mubr.msk.bf16.mxu0 %vm786_vm4, %v5397_v49  ;;  %v4624_v49 = vpop.f32.mrb[0].mxu1 }
  0xfe   : > { %1022 = vst.msk [vmem:[#allocation2 + $0x90] sm:$0xff] %vm1003_vm6, %v4624_v49  ;;  %v940_v38 = vpop.f32.mrb[1].mxu1 }
  0xff   : > { %1020 = vst.msk [vmem:[#allocation2 + $0x80] sm:$0xff] %vm1003_vm6, %v940_v38  ;;  %v4625_v58 = vpop.f32.mrb[2].mxu1 }
 0x100   : > { %1023 = vst.msk [vmem:[#allocation2 + $0x98] sm:$0xff] %vm1003_vm6, %v4625_v58  ;;  %4797 = vmatmul.mubr.msk.bf16.gmra.mrb[100].mxu1 %vm786_vm4, %v6023_v17 }
 0x101   : > { %4800 = vmatprep.mubr.msk.bf16.mxu1 %vm786_vm4, %v6046_v60 }
 0x104   : > { %4823 = vmatmul.mubr.msk.bf16.gmra.mrb[92].mxu0 %vm786_vm4, %v5420_v63  ;;  %v943_v63 = vpop.f32.mrb[3].mxu1 }
 0x105   : > { %4826 = vmatprep.mubr.msk.bf16.mxu0 %vm786_vm4, %v5497_v14  ;;  %1021 = vst.msk [vmem:[#allocation2 + $0x88] sm:$0xff] %vm1003_vm6, %v943_v63  ;;  %v4608_v14 = vpop.f32.mrb[0].mxu0 }
 0x106   : > { %1006 = vst.msk [vmem:[#allocation2 + $0x10] sm:$0xff] %vm1003_vm6, %v4608_v14  ;;  %v876_v35 = vpop.f32.mrb[1].mxu0 }
 0x107   : > { %1004 = vst.msk [vmem:[#allocation2] sm:$0xff] %vm1003_vm6, %v876_v35  ;;  %v4609_v11 = vpop.f32.mrb[2].mxu0 }
 0x108   : > { %1007 = vst.msk [vmem:[#allocation2 + $0x18] sm:$0xff] %vm1003_vm6, %v4609_v11  ;;  %4801 = vmatmul.mubr.msk.bf16.gmra.mrb[104].mxu1 %vm786_vm4, %v6062_v53 }
 0x109   : > { %v4628_v25 = vpop.f32.mrb[4].mxu1  ;;  %4804 = vmatprep.mubr.msk.bf16.mxu1 %vm786_vm4, %v6066_v54 }
 0x10a   : > { %1026 = vst.msk [vmem:[#allocation2 + $0xb0] sm:$0xff] %vm1003_vm6, %v4628_v25  ;;  %v956_v36 = vpop.f32.mrb[5].mxu1 }
 0x10b   : > { %1024 = vst.msk [vmem:[#allocation2 + $0xa0] sm:$0xff] %vm1003_vm6, %v956_v36  ;;  %v4629_v62 = vpop.f32.mrb[6].mxu1 }
 0x10c   : > { %4827 = vmatmul.mubr.msk.bf16.gmra.mrb[96].mxu0 %vm786_vm4, %v5520_v7  ;;  %v879_v7 = vpop.f32.mrb[3].mxu0  ;;  %1027 = vst.msk [vmem:[#allocation2 + $0xb8] sm:$0xff] %vm1003_vm6, %v4629_v62  ;;  %v959_v50 = vpop.f32.mrb[7].mxu1 }
 0x10d   : > { %4830 = vmatprep.mubr.msk.bf16.mxu0 %vm786_vm4, %v7103_v3  ;;  %1005 = vst.msk [vmem:[#allocation2 + $0x8] sm:$0xff] %vm1003_vm6, %v879_v7  ;;  %v2706_v3 = vrot.slane %v2704_v61, 3  ;;  %1025 = vst.msk [vmem:[#allocation2 + $0xa8] sm:$0xff] %vm1003_vm6, %v959_v50  ;;  %v1343_v26 = vld [vmem:[#allocation2 + $0x10] sm:$0xff] }
 0x10f   : > { %v1344_v14 = vld [vmem:[#allocation2 + $0x18] sm:$0xff] }
 0x110   : > { %v4612_v44 = vpop.f32.mrb[4].mxu0  ;;  %4805 = vmatmul.mubr.msk.bf16.gmra.mrb[108].mxu1 %vm786_vm4, %v6104_v12 }
 0x111   : > { %1010 = vst.msk [vmem:[#allocation2 + $0x30] sm:$0xff] %vm1003_vm6, %v4612_v44  ;;  %v892_v61 = vpop.f32.mrb[5].mxu0  ;;  %4844 = vmatprep.mubr.msk.bf16.mxu1 %vm786_vm4, %v5781_v46 }
 0x112   : > { %1008 = vst.msk [vmem:[#allocation2 + $0x20] sm:$0xff] %vm1003_vm6, %v892_v61 }
 0x114   : > { %4831 = vmatmul.mubr.msk.bf16.gmra.mrb[100].mxu0 %vm786_vm4, %v7104_v23  ;;  %v2709_v23 = vrot.slane %v2707_v5, 4  ;;  %v4613_v5 = vpop.f32.mrb[6].mxu0  ;;  %v1342_v11 = vld [vmem:[#allocation2 + $0x8] sm:$0xff] }
 0x115   : > { %4834 = vmatprep.mubr.msk.bf16.mxu0 %vm786_vm4, %v7105_v48  ;;  %v2713_v48 = vrot.slane %v2711_v0, 3  ;;  %1011 = vst.msk [vmem:[#allocation2 + $0x38] sm:$0xff] %vm1003_vm6, %v4613_v5 }
 0x116   : > { %v2710_v19 = vor.u32 %v2709_v23, %v2706_v3  ;;  %v4632_v0 = vpop.f32.mrb[8].mxu1 }
 0x117   : > { %v2717_v59 = vor.u32 %v2716_v21, %v2713_v48  ;;  %1030 = vst.msk [vmem:[#allocation2 + $0xd0] sm:$0xff] %vm1003_vm6, %v4632_v0  ;;  %v972_v28 = vpop.f32.mrb[9].mxu1 }
 0x118   : > { %4845 = vmatmul.mubr.msk.bf16.vlgmr.msra.gmra.mrb[112].mxu1 %vm786_vm4, %v5812_v31  ;;  %1028 = vst.msk [vmem:[#allocation2 + $0xc0] sm:$0xff] %vm1003_vm6, %v972_v28  ;;  %v4633_v46 = vpop.f32.mrb[10].mxu1 }
 0x119   : > { %1031 = vst.msk [vmem:[#allocation2 + $0xd8] sm:$0xff] %vm1003_vm6, %v4633_v46  ;;  %v975_v34 = vpop.f32.mrb[11].mxu1  ;;  %4848 = vmatprep.mubr.msk.bf16.mxu1 %vm786_vm4, %v5831_v55  ;;  %v1345_v48 = vld [vmem:[#allocation2 + $0x20] sm:$0xff] }
 0x11a   : > { %1029 = vst.msk [vmem:[#allocation2 + $0xc8] sm:$0xff] %vm1003_vm6, %v975_v34 }
 0x11c   : > { %4835 = vmatmul.mubr.msk.bf16.gmra.mrb[104].mxu0 %vm786_vm4, %v7106_v47  ;;  %v895_v47 = vpop.f32.mrb[7].mxu0  ;;  %v1348_v44 = vld [vmem:[#allocation2 + $0x38] sm:$0xff] }
 0x11d   : > { %4838 = vmatprep.mubr.msk.bf16.mxu0 %vm786_vm4, %v6177_v29  ;;  %v2718_v29 = vsel %vm544_vm3, %v2710_v19, %v2717_v59  ;;  %1009 = vst.msk [vmem:[#allocation2 + $0x28] sm:$0xff] %vm1003_vm6, %v895_v47  ;;  %v4616_v20 = vpop.f32.mrb[8].mxu0 }
 0x11e   : > { %1014 = vst.msk [vmem:[#allocation2 + $0x50] sm:$0xff] %vm1003_vm6, %v4616_v20  ;;  %v908_v32 = vpop.f32.mrb[9].mxu0 }
 0x11f   : > { %1012 = vst.msk [vmem:[#allocation2 + $0x40] sm:$0xff] %vm1003_vm6, %v908_v32  ;;  %v4617_v31 = vpop.f32.mrb[10].mxu0 }
 0x120   : > { %1015 = vst.msk [vmem:[#allocation2 + $0x58] sm:$0xff] %vm1003_vm6, %v4617_v31  ;;  %4849 = vmatmul.mubr.msk.bf16.gmra.mrb[116].mxu1 %vm786_vm4, %v5840_v22 }
 0x121   : > { %4852 = vmatprep.mubr.msk.bf16.mxu1 %vm786_vm4, %v5862_v33 }
 0x123   : > { %v4636_v55 = vpop.f32.mrb[12].mxu1 }
 0x124   : > { %4839 = vmatmul.mubr.msk.bf16.gmra.mrb[108].mxu0 %vm786_vm4, %v2718_v29  ;;  %1034 = vst.msk [vmem:[#allocation2 + $0xf0] sm:$0xff] %vm1003_vm6, %v4636_v55  ;;  %v1346_v29 = vld [vmem:[#allocation2 + $0x28] sm:$0xff] }
 0x125   : > { %4878 = vmatprep.mubr.msk.bf16.mxu0 %vm786_vm4, %v5822_v56  ;;  %v911_v56 = vpop.f32.mrb[11].mxu0  ;;  %v1351_v31 = vld [vmem:[#allocation2 + $0x50] sm:$0xff] }
 0x126   : > { %1013 = vst.msk [vmem:[#allocation2 + $0x48] sm:$0xff] %vm1003_vm6, %v911_v56 }
 0x128   : > { %4853 = vmatmul.mubr.msk.bf16.gmra.mrb[120].mxu1 %vm786_vm4, %v5876_v4 }
 0x129   : > { %4856 = vmatprep.mubr.msk.bf16.mxu1 %vm786_vm4, %v5892_v2 }
 0x12a   : > { %v4620_v22 = vpop.f32.mrb[12].mxu0 }
 0x12b   : > { %1018 = vst.msk [vmem:[#allocation2 + $0x70] sm:$0xff] %vm1003_vm6, %v4620_v22  ;;  %v924_v33 = vpop.f32.mrb[13].mxu0 }
 0x12c   : > { %4879 = vmatmul.mubr.msk.bf16.vlgmr.msra.gmra.mrb[112].mxu0 %vm786_vm4, %v5849_v37  ;;  %v988_v37 = vpop.f32.mrb[13].mxu1  ;;  %1016 = vst.msk [vmem:[#allocation2 + $0x60] sm:$0xff] %vm1003_vm6, %v924_v33 }
 0x12d   : > { %4882 = vmatprep.mubr.msk.bf16.mxu0 %vm786_vm4, %v5869_v30  ;;  %1032 = vst.msk [vmem:[#allocation2 + $0xe0] sm:$0xff] %vm1003_vm6, %v988_v37  ;;  %v4637_v18 = vpop.f32.mrb[14].mxu1 }
 0x12e   : > { %1035 = vst.msk [vmem:[#allocation2 + $0xf8] sm:$0xff] %vm1003_vm6, %v4637_v18  ;;  %v991_v40 = vpop.f32.mrb[15].mxu1 }
 0x12f   : > { %1033 = vst.msk [vmem:[#allocation2 + $0xe8] sm:$0xff] %vm1003_vm6, %v991_v40  ;;  %v4642_v30 = vpop.f32.mrb[16].mxu1 }
 0x130   : > { %v1375_v49 = vadd.f32 %v4642_v30, %v1343_v26  ;;  %v1214_v38 = vpop.f32.mrb[17].mxu1  ;;  %4857 = vmatmul.mubr.msk.bf16.gmra.mrb[124].mxu1 %vm786_vm4, %v5916_v13  ;;  %v1352_v30 = vld [vmem:[#allocation2 + $0x58] sm:$0xff] }
 0x131   : > { %v4643_v4 = vpop.f32.mrb[18].mxu1  ;;  %4860 = vmatprep.mubr.msk.bf16.mxu1 %vm786_vm4, %v5927_v6 }
 0x132   : > { %1407 = vst.msk [vmem:[#allocation2 + $0x10] sm:$0xff] %vm1003_vm6, %v1375_v49  ;;  %v1376_v2 = vadd.f32 %v4643_v4, %v1344_v14  ;;  %v1217_v35 = vpop.f32.mrb[19].mxu1 }
 0x133   : > { %v1374_v7 = vadd.f32 %v1342_v11, %v1217_v35  ;;  %v4646_v62 = vpop.f32.mrb[20].mxu1  ;;  %v1355_v11 = vld [vmem:[#allocation2 + $0x70] sm:$0xff] }
 0x134   : > { %4883 = vmatmul.mubr.msk.bf16.gmra.mrb[116].mxu0 %vm786_vm4, %v5883_v39  ;;  %v4621_v39 = vpop.f32.mrb[14].mxu0  ;;  %1408 = vst.msk [vmem:[#allocation2 + $0x18] sm:$0xff] %vm1003_vm6, %v1376_v2  ;;  %v1230_v23 = vpop.f32.mrb[21].mxu1 }
 0x135   : > { %4886 = vmatprep.mubr.msk.bf16.mxu0 %vm786_vm4, %v5907_v27  ;;  %1019 = vst.msk [vmem:[#allocation2 + $0x78] sm:$0xff] %vm1003_vm6, %v4621_v39  ;;  %v1341_v27 = vld [vmem:[#allocation2] sm:$0xff]  ;;  %v927_v58 = vpop.f32.mrb[15].mxu0  ;;  %1406 = vst.msk [vmem:[#allocation2 + $0x8] sm:$0xff] %vm1003_vm6, %v1374_v7  ;;  %v1377_v19 = vadd.f32 %v1345_v48, %v1230_v23  ;;  %v4647_v59 = vpop.f32.mrb[22].mxu1 }
 0x136   : > { %v1373_v63 = vadd.f32 %v1341_v27, %v1214_v38  ;;  %1017 = vst.msk [vmem:[#allocation2 + $0x68] sm:$0xff] %vm1003_vm6, %v927_v58  ;;  %v4676_v25 = vpop.f32.mrb[16].mxu0  ;;  %v1380_v5 = vadd.f32 %v4647_v59, %v1348_v44  ;;  %v1233_v47 = vpop.f32.mrb[23].mxu1  ;;  %v1350_v38 = vld [vmem:[#allocation2 + $0x48] sm:$0xff] }
 0x137   : > { %v1643_v36 = vpop.f32.mrb[17].mxu0  ;;  %1409 = vst.msk [vmem:[#allocation2 + $0x20] sm:$0xff] %vm1003_vm6, %v1377_v19  ;;  %v1378_v28 = vadd.f32 %v1346_v29, %v1233_v47  ;;  %v2987_v29 = vrot.slane %v6183_v10, 4 }
 0x138   : > { %1405 = vst.msk [vmem:[#allocation2] sm:$0xff] %vm1003_vm6, %v1373_v63  ;;  %v4677_v50 = vpop.f32.mrb[18].mxu0  ;;  %1412 = vst.msk [vmem:[#allocation2 + $0x38] sm:$0xff] %vm1003_vm6, %v1380_v5  ;;  %4861 = vmatmul.mubr.msk.bf16.gmra.mrb[128].mxu1 %vm786_vm4, %v5954_v9  ;;  %v1349_v9 = vld [vmem:[#allocation2 + $0x40] sm:$0xff] }
 0x139   : > { %v1646_v21 = vpop.f32.mrb[19].mxu0  ;;  %1410 = vst.msk [vmem:[#allocation2 + $0x28] sm:$0xff] %vm1003_vm6, %v1378_v28  ;;  %4864 = vmatprep.mubr.msk.bf16.mxu1 %vm786_vm4, %v5971_v24 }
 0x13a   : > { %v4680_v20 = vpop.f32.mrb[20].mxu0 }
 0x13b   : > { %v1773_v0 = vld [vmem:[#allocation2 + $0x18] sm:$0xff]  ;;  %v4650_v32 = vpop.f32.mrb[24].mxu1 }
 0x13c   : > { %4887 = vmatmul.mubr.msk.bf16.gmra.mrb[120].mxu0 %vm786_vm4, %v5938_v45  ;;  %v1347_v45 = vld [vmem:[#allocation2 + $0x30] sm:$0xff]  ;;  %v1805_v46 = vadd.f32 %v4677_v50, %v1773_v0  ;;  %v1771_v34 = vld [vmem:[#allocation2 + $0x8] sm:$0xff]  ;;  %v1383_v55 = vadd.f32 %v4650_v32, %v1351_v31  ;;  %v1246_v37 = vpop.f32.mrb[25].mxu1  ;;  %v1356_v23 = vld [vmem:[#allocation2 + $0x78] sm:$0xff] }
 0x13d   : > { %4890 = vmatprep.mubr.msk.bf16.mxu0 %vm786_vm4, %v5945_v41  ;;  %v1379_v3 = vadd.f32 %v4646_v62, %v1347_v45  ;;  %v1772_v41 = vld [vmem:[#allocation2 + $0x10] sm:$0xff]  ;;  %v1381_v22 = vadd.f32 %v1349_v9, %v1246_v37  ;;  %v4651_v33 = vpop.f32.mrb[26].mxu1  ;;  %v1354_v19 = vld [vmem:[#allocation2 + $0x68] sm:$0xff] }
 0x13e   : > { %v1804_v61 = vadd.f32 %v4676_v25, %v1772_v41  ;;  %1837 = vst.msk [vmem:[#allocation2 + $0x18] sm:$0xff] %vm1003_vm6, %v1805_v46  ;;  %1415 = vst.msk [vmem:[#allocation2 + $0x50] sm:$0xff] %vm1003_vm6, %v1383_v55  ;;  %v1774_v24 = vld [vmem:[#allocation2 + $0x20] sm:$0xff]  ;;  %v1384_v39 = vadd.f32 %v4651_v33, %v1352_v30  ;;  %v1249_v49 = vpop.f32.mrb[27].mxu1  ;;  %v1358_v9 = vld [vmem:[#allocation2 + $0x88] sm:$0xff] }
 0x13f   : > { %1411 = vst.msk [vmem:[#allocation2 + $0x30] sm:$0xff] %vm1003_vm6, %v1379_v3  ;;  %v1770_v13 = vld [vmem:[#allocation2] sm:$0xff]  ;;  %1413 = vst.msk [vmem:[#allocation2 + $0x40] sm:$0xff] %vm1003_vm6, %v1381_v22  ;;  %v1777_v58 = vld [vmem:[#allocation2 + $0x38] sm:$0xff]  ;;  %v1382_v63 = vadd.f32 %v1350_v38, %v1249_v49 }
 0x140   : > { %v1802_v6 = vadd.f32 %v1770_v13, %v1643_v36  ;;  %1836 = vst.msk [vmem:[#allocation2 + $0x10] sm:$0xff] %vm1003_vm6, %v1804_v61  ;;  %1416 = vst.msk [vmem:[#allocation2 + $0x58] sm:$0xff] %vm1003_vm6, %v1384_v39  ;;  %v1775_v14 = vld [vmem:[#allocation2 + $0x28] sm:$0xff]  ;;  %4865 = vmatmul.mubr.msk.bf16.gmra.mrb[132].mxu1 %vm786_vm4, %v5993_v51  ;;  %v1353_v51 = vld [vmem:[#allocation2 + $0x60] sm:$0xff] }
 0x141   : > { %1414 = vst.msk [vmem:[#allocation2 + $0x48] sm:$0xff] %vm1003_vm6, %v1382_v63  ;;  %4868 = vmatprep.mubr.msk.bf16.mxu1 %vm786_vm4, %v6007_v42  ;;  %v1363_v39 = vld [vmem:[#allocation2 + $0xb0] sm:$0xff] }
 0x142   : > { %1834 = vst.msk [vmem:[#allocation2] sm:$0xff] %vm1003_vm6, %v1802_v6 }
 0x143   : > { %v4654_v35 = vpop.f32.mrb[28].mxu1 }
 0x144   : > { %4891 = vmatmul.mubr.msk.bf16.gmra.mrb[124].mxu0 %vm786_vm4, %v6059_v15  ;;  %v1803_v15 = vadd.f32 %v1771_v34, %v1646_v21  ;;  %v1387_v25 = vadd.f32 %v4654_v35, %v1355_v11  ;;  %v1262_v36 = vpop.f32.mrb[29].mxu1 }
 0x145   : > { %4894 = vmatprep.mubr.msk.bf16.mxu0 %vm786_vm4, %v5986_v52  ;;  %v1659_v52 = vpop.f32.mrb[21].mxu0  ;;  %v1780_v45 = vld [vmem:[#allocation2 + $0x50] sm:$0xff]  ;;  %v1385_v50 = vadd.f32 %v1353_v51, %v1262_v36  ;;  %v4655_v3 = vpop.f32.mrb[30].mxu1 }
 0x146   : > { %1835 = vst.msk [vmem:[#allocation2 + $0x8] sm:$0xff] %vm1003_vm6, %v1803_v15  ;;  %v4681_v56 = vpop.f32.mrb[22].mxu0  ;;  %v1776_v40 = vld [vmem:[#allocation2 + $0x30] sm:$0xff]  ;;  %v1806_v27 = vadd.f32 %v1774_v24, %v1659_v52  ;;  %1419 = vst.msk [vmem:[#allocation2 + $0x70] sm:$0xff] %vm1003_vm6, %v1387_v25  ;;  %v1778_v42 = vld [vmem:[#allocation2 + $0x40] sm:$0xff]  ;;  %v1388_v21 = vadd.f32 %v4655_v3, %v1356_v23  ;;  %v1265_v41 = vpop.f32.mrb[31].mxu1 }
 0x147   : > { %v1662_v18 = vpop.f32.mrb[23].mxu0  ;;  %v1808_v26 = vadd.f32 %v4680_v20, %v1776_v40  ;;  %v1809_v4 = vadd.f32 %v4681_v56, %v1777_v58  ;;  %1417 = vst.msk [vmem:[#allocation2 + $0x60] sm:$0xff] %vm1003_vm6, %v1385_v50  ;;  %v1781_v44 = vld [vmem:[#allocation2 + $0x58] sm:$0xff]  ;;  %v1386_v61 = vadd.f32 %v1354_v19, %v1265_v41  ;;  %v1357_v15 = vld [vmem:[#allocation2 + $0x80] sm:$0xff]  ;;  %v1362_v25 = vld [vmem:[#allocation2 + $0xa8] sm:$0xff] }
 0x148   : > { %1838 = vst.msk [vmem:[#allocation2 + $0x20] sm:$0xff] %vm1003_vm6, %v1806_v27  ;;  %v4684_v2 = vpop.f32.mrb[24].mxu0  ;;  %1420 = vst.msk [vmem:[#allocation2 + $0x78] sm:$0xff] %vm1003_vm6, %v1388_v21  ;;  %v1779_v5 = vld [vmem:[#allocation2 + $0x48] sm:$0xff]  ;;  %4869 = vmatmul.mubr.msk.bf16.gmra.mrb[136].mxu1 %vm786_vm4, %v6035_v1  ;;  %v1359_v1 = vld [vmem:[#allocation2 + $0x90] sm:$0xff] }
 0x149   : > { %1840 = vst.msk [vmem:[#allocation2 + $0x30] sm:$0xff] %vm1003_vm6, %v1808_v26  ;;  %1841 = vst.msk [vmem:[#allocation2 + $0x38] sm:$0xff] %vm1003_vm6, %v1809_v4  ;;  %v1812_v48 = vadd.f32 %v4684_v2, %v1780_v45  ;;  %4872 = vmatprep.mubr.msk.bf16.mxu1 %vm786_vm4, %v6208_v57  ;;  %v1360_v57 = vld [vmem:[#allocation2 + $0x98] sm:$0xff]  ;;  %v1361_v58 = vld [vmem:[#allocation2 + $0xa0] sm:$0xff] }
 0x14a   : > { %1418 = vst.msk [vmem:[#allocation2 + $0x68] sm:$0xff] %vm1003_vm6, %v1386_v61  ;;  %v1364_v2 = vld [vmem:[#allocation2 + $0xb8] sm:$0xff] }
 0x14b   : > { %1844 = vst.msk [vmem:[#allocation2 + $0x50] sm:$0xff] %vm1003_vm6, %v1812_v48  ;;  %v4658_v0 = vpop.f32.mrb[32].mxu1 }
 0x14c   : > { %4895 = vmatmul.mubr.msk.bf16.gmra.mrb[128].mxu0 %vm786_vm4, %v6000_v8  ;;  %v1807_v8 = vadd.f32 %v1775_v14, %v1662_v18  ;;  %v1391_v46 = vadd.f32 %v4658_v0, %v1359_v1  ;;  %v1278_v34 = vpop.f32.mrb[33].mxu1  ;;  %v1366_v0 = vld [vmem:[#allocation2 + $0xc8] sm:$0xff] }
 0x14d   : > { %4898 = vmatprep.mubr.msk.bf16.mxu0 %vm786_vm4, %v6023_v17  ;;  %v1675_v17 = vpop.f32.mrb[25].mxu0  ;;  %v1784_v52 = vld [vmem:[#allocation2 + $0x70] sm:$0xff]  ;;  %v1389_v32 = vadd.f32 %v1357_v15, %v1278_v34  ;;  %v4659_v31 = vpop.f32.mrb[34].mxu1 }
 0x14e   : > { %1839 = vst.msk [vmem:[#allocation2 + $0x28] sm:$0xff] %vm1003_vm6, %v1807_v8  ;;  %v4685_v7 = vpop.f32.mrb[26].mxu0  ;;  %v1810_v59 = vadd.f32 %v1778_v42, %v1675_v17  ;;  %1423 = vst.msk [vmem:[#allocation2 + $0x90] sm:$0xff] %vm1003_vm6, %v1391_v46  ;;  %v1782_v10 = vld [vmem:[#allocation2 + $0x60] sm:$0xff]  ;;  %v1392_v55 = vadd.f32 %v4659_v31, %v1360_v57  ;;  %v1281_v37 = vpop.f32.mrb[35].mxu1  ;;  %v1367_v42 = vld [vmem:[#allocation2 + $0xd0] sm:$0xff] }
 0x14f   : > { %v1678_v62 = vpop.f32.mrb[27].mxu0  ;;  %v1813_v13 = vadd.f32 %v4685_v7, %v1781_v44  ;;  %1421 = vst.msk [vmem:[#allocation2 + $0x80] sm:$0xff] %vm1003_vm6, %v1389_v32  ;;  %v1785_v40 = vld [vmem:[#allocation2 + $0x78] sm:$0xff]  ;;  %v1390_v22 = vadd.f32 %v1358_v9, %v1281_v37  ;;  %v1371_v57 = vld [vmem:[#allocation2 + $0xf0] sm:$0xff] }
 0x150   : > { %1842 = vst.msk [vmem:[#allocation2 + $0x40] sm:$0xff] %vm1003_vm6, %v1810_v59  ;;  %v4688_v47 = vpop.f32.mrb[28].mxu0  ;;  %1424 = vst.msk [vmem:[#allocation2 + $0x98] sm:$0xff] %vm1003_vm6, %v1392_v55  ;;  %v1365_v59 = vld [vmem:[#allocation2 + $0xc0] sm:$0xff] }
 0x151   : > { %1845 = vst.msk [vmem:[#allocation2 + $0x58] sm:$0xff] %vm1003_vm6, %v1813_v13  ;;  %v1691_v6 = vpop.f32.mrb[29].mxu0  ;;  %v1816_v56 = vadd.f32 %v4688_v47, %v1784_v52  ;;  %v1783_v30 = vld [vmem:[#allocation2 + $0x68] sm:$0xff]  ;;  %1422 = vst.msk [vmem:[#allocation2 + $0x88] sm:$0xff] %vm1003_vm6, %v1390_v22  ;;  %v1369_v55 = vld [vmem:[#allocation2 + $0xe0] sm:$0xff] }
 0x152   : > { %v4689_v28 = vpop.f32.mrb[30].mxu0  ;;  %v1814_v18 = vadd.f32 %v1782_v10, %v1691_v6  ;;  %v1372_v22 = vld [vmem:[#allocation2 + $0xf8] sm:$0xff] }
 0x153   : > { %v1694_v20 = vpop.f32.mrb[31].mxu0  ;;  %1848 = vst.msk [vmem:[#allocation2 + $0x70] sm:$0xff] %vm1003_vm6, %v1816_v56  ;;  %v1817_v33 = vadd.f32 %v4689_v28, %v1785_v40 }
 0x154   : > { %4899 = vmatmul.mubr.msk.bf16.gmra.mrb[132].mxu0 %vm786_vm4, %v6046_v60  ;;  %v1811_v60 = vadd.f32 %v1779_v5, %v1678_v62  ;;  %1846 = vst.msk [vmem:[#allocation2 + $0x60] sm:$0xff] %vm1003_vm6, %v1814_v18  ;;  %v1815_v26 = vadd.f32 %v1783_v30, %v1694_v20 }
 0x155   : > { %4902 = vmatprep.mubr.msk.bf16.mxu0 %vm786_vm4, %v6062_v53  ;;  %v2986_v53 = vrot.slane %v6180_v43, 4  ;;  %1849 = vst.msk [vmem:[#allocation2 + $0x78] sm:$0xff] %vm1003_vm6, %v1817_v33  ;;  %v1788_v4 = vld [vmem:[#allocation2 + $0x90] sm:$0xff] }
 0x156   : > { %1843 = vst.msk [vmem:[#allocation2 + $0x48] sm:$0xff] %vm1003_vm6, %v1811_v60  ;;  %1847 = vst.msk [vmem:[#allocation2 + $0x68] sm:$0xff] %vm1003_vm6, %v1815_v26  ;;  %v1786_v35 = vld [vmem:[#allocation2 + $0x80] sm:$0xff]  ;;  %v1368_v60 = vld [vmem:[#allocation2 + $0xd8] sm:$0xff] }
 0x157   : > { %v2988_v43 = vsel %vm470_vm2, %v2986_v53, %v2987_v29  ;;  %v1789_v51 = vld [vmem:[#allocation2 + $0x98] sm:$0xff] }
 0x158   : > { %4873 = vmatmul.mubr.msk.bf16.gmra.mrb[140].mxu1 %vm786_vm4, %v2988_v43  ;;  %v1787_v50 = vld [vmem:[#allocation2 + $0x88] sm:$0xff] }
 0x15c   : > { %4903 = vmatmul.mubr.msk.bf16.gmra.mrb[136].mxu0 %vm786_vm4, %v6066_v54 }
 0x15d   : > { %4906 = vmatprep.mubr.msk.bf16.mxu0 %vm786_vm4, %v6104_v12  ;;  %v4662_v12 = vpop.f32.mrb[36].mxu1 }
 0x15e   : > { %v1395_v38 = vadd.f32 %v4662_v12, %v1363_v39  ;;  %v1294_v27 = vpop.f32.mrb[37].mxu1 }
 0x15f   : > { %v4692_v54 = vpop.f32.mrb[32].mxu0  ;;  %v1393_v14 = vadd.f32 %v1361_v58, %v1294_v27  ;;  %v4663_v8 = vpop.f32.mrb[38].mxu1 }
 0x160   : > { %v1707_v24 = vpop.f32.mrb[33].mxu0  ;;  %v1820_v17 = vadd.f32 %v4692_v54, %v1788_v4  ;;  %1427 = vst.msk [vmem:[#allocation2 + $0xb0] sm:$0xff] %vm1003_vm6, %v1395_v38  ;;  %v1396_v11 = vadd.f32 %v4663_v8, %v1364_v2  ;;  %v1297_v7 = vpop.f32.mrb[39].mxu1  ;;  %v2052_v8 = vld [vmem:[#allocation2 + $0x10] sm:$0xff] }
 0x161   : > { %v4693_v49 = vpop.f32.mrb[34].mxu0  ;;  %v1818_v36 = vadd.f32 %v1786_v35, %v1707_v24  ;;  %1425 = vst.msk [vmem:[#allocation2 + $0xa0] sm:$0xff] %vm1003_vm6, %v1393_v14  ;;  %v1394_v62 = vadd.f32 %v1362_v25, %v1297_v7  ;;  %v4666_v48 = vpop.f32.mrb[40].mxu1  ;;  %v1370_v24 = vld [vmem:[#allocation2 + $0xe8] sm:$0xff] }
 0x162   : > { %v1710_v63 = vpop.f32.mrb[35].mxu0  ;;  %1852 = vst.msk [vmem:[#allocation2 + $0x90] sm:$0xff] %vm1003_vm6, %v1820_v17  ;;  %v1821_v45 = vadd.f32 %v4693_v49, %v1789_v51  ;;  %1428 = vst.msk [vmem:[#allocation2 + $0xb8] sm:$0xff] %vm1003_vm6, %v1396_v11  ;;  %v1399_v41 = vadd.f32 %v4666_v48, %v1367_v42  ;;  %v1310_v19 = vpop.f32.mrb[41].mxu1  ;;  %v2050_v11 = vld [vmem:[#allocation2] sm:$0xff] }
 0x163   : > { %1850 = vst.msk [vmem:[#allocation2 + $0x80] sm:$0xff] %vm1003_vm6, %v1818_v36  ;;  %v1819_v3 = vadd.f32 %v1787_v50, %v1710_v63  ;;  %1426 = vst.msk [vmem:[#allocation2 + $0xa8] sm:$0xff] %vm1003_vm6, %v1394_v62  ;;  %v1397_v13 = vadd.f32 %v1365_v59, %v1310_v19  ;;  %v4667_v5 = vpop.f32.mrb[42].mxu1  ;;  %v2053_v62 = vld [vmem:[#allocation2 + $0x18] sm:$0xff] }
 0x164   : > { %4907 = vmatmul.mubr.msk.bf16.gmra.mrb[140].mxu0 %vm786_vm4, %v6213_v16  ;;  %1853 = vst.msk [vmem:[#allocation2 + $0x98] sm:$0xff] %vm1003_vm6, %v1821_v45  ;;  %1431 = vst.msk [vmem:[#allocation2 + $0xd0] sm:$0xff] %vm1003_vm6, %v1399_v41  ;;  %v1400_v29 = vadd.f32 %v4667_v5, %v1368_v60  ;;  %v1313_v6 = vpop.f32.mrb[43].mxu1  ;;  %v2056_v5 = vld [vmem:[#allocation2 + $0x30] sm:$0xff] }
 0x165   : > { %1851 = vst.msk [vmem:[#allocation2 + $0x88] sm:$0xff] %vm1003_vm6, %v1819_v3  ;;  %1429 = vst.msk [vmem:[#allocation2 + $0xc0] sm:$0xff] %vm1003_vm6, %v1397_v13  ;;  %v1398_v46 = vadd.f32 %v1366_v0, %v1313_v6  ;;  %v4670_v31 = vpop.f32.mrb[44].mxu1 }
 0x166   : > { %1432 = vst.msk [vmem:[#allocation2 + $0xd8] sm:$0xff] %vm1003_vm6, %v1400_v29  ;;  %v1403_v56 = vadd.f32 %v4670_v31, %v1371_v57  ;;  %v1326_v10 = vpop.f32.mrb[45].mxu1  ;;  %v2054_v29 = vld [vmem:[#allocation2 + $0x20] sm:$0xff] }
 0x167   : > { %v4696_v23 = vpop.f32.mrb[36].mxu0  ;;  %v1792_v61 = vld [vmem:[#allocation2 + $0xb0] sm:$0xff]  ;;  %1430 = vst.msk [vmem:[#allocation2 + $0xc8] sm:$0xff] %vm1003_vm6, %v1398_v46  ;;  %v1401_v18 = vadd.f32 %v1369_v55, %v1326_v10  ;;  %v4671_v40 = vpop.f32.mrb[46].mxu1  ;;  %v2057_v46 = vld [vmem:[#allocation2 + $0x38] sm:$0xff] }
 0x168   : > { %v1723_v16 = vpop.f32.mrb[37].mxu0  ;;  %v1824_v47 = vadd.f32 %v4696_v23, %v1792_v61  ;;  %v1790_v53 = vld [vmem:[#allocation2 + $0xa0] sm:$0xff]  ;;  %1435 = vst.msk [vmem:[#allocation2 + $0xf0] sm:$0xff] %vm1003_vm6, %v1403_v56  ;;  %v1404_v26 = vadd.f32 %v4671_v40, %v1372_v22  ;;  %v1329_v54 = vpop.f32.mrb[47].mxu1  ;;  %v2060_v40 = vld [vmem:[#allocation2 + $0x50] sm:$0xff] }
 0x169   : > { %v4697_v21 = vpop.f32.mrb[38].mxu0  ;;  %v1822_v1 = vadd.f32 %v1790_v53, %v1723_v16  ;;  %v1793_v28 = vld [vmem:[#allocation2 + $0xb8] sm:$0xff]  ;;  %1433 = vst.msk [vmem:[#allocation2 + $0xe0] sm:$0xff] %vm1003_vm6, %v1401_v18  ;;  %v1402_v49 = vadd.f32 %v1370_v24, %v1329_v54  ;;  %v2051_v16 = vld [vmem:[#allocation2 + $0x8] sm:$0xff] }
 0x16a   : > { %v1726_v44 = vpop.f32.mrb[39].mxu0  ;;  %1856 = vst.msk [vmem:[#allocation2 + $0xb0] sm:$0xff] %vm1003_vm6, %v1824_v47  ;;  %v1825_v34 = vadd.f32 %v4697_v21, %v1793_v28  ;;  %v1791_v15 = vld [vmem:[#allocation2 + $0xa8] sm:$0xff]  ;;  %1436 = vst.msk [vmem:[#allocation2 + $0xf8] sm:$0xff] %vm1003_vm6, %v1404_v26  ;;  %v2058_v26 = vld [vmem:[#allocation2 + $0x40] sm:$0xff] }
 0x16b   : > { %1854 = vst.msk [vmem:[#allocation2 + $0xa0] sm:$0xff] %vm1003_vm6, %v1822_v1  ;;  %v1823_v20 = vadd.f32 %v1791_v15, %v1726_v44  ;;  %v1796_v9 = vld [vmem:[#allocation2 + $0xd0] sm:$0xff]  ;;  %1434 = vst.msk [vmem:[#allocation2 + $0xe8] sm:$0xff] %vm1003_vm6, %v1402_v49  ;;  %v4710_v14 = vpop.f32.mrb[48].mxu1  ;;  %v2061_v49 = vld [vmem:[#allocation2 + $0x58] sm:$0xff] }
 0x16c   : > { %1857 = vst.msk [vmem:[#allocation2 + $0xb8] sm:$0xff] %vm1003_vm6, %v1825_v34  ;;  %v1794_v30 = vld [vmem:[#allocation2 + $0xc0] sm:$0xff]  ;;  %v2084_v17 = vadd.f32 %v4710_v14, %v2052_v8  ;;  %v1923_v35 = vpop.f32.mrb[49].mxu1 }
 0x16d   : > { %1855 = vst.msk [vmem:[#allocation2 + $0xa8] sm:$0xff] %vm1003_vm6, %v1823_v20  ;;  %v1797_v39 = vld [vmem:[#allocation2 + $0xd8] sm:$0xff]  ;;  %v2082_v36 = vadd.f32 %v2050_v11, %v1923_v35  ;;  %v4711_v51 = vpop.f32.mrb[50].mxu1 }
 0x16e   : > { %v1795_v27 = vld [vmem:[#allocation2 + $0xc8] sm:$0xff]  ;;  %2116 = vst.msk [vmem:[#allocation2 + $0x10] sm:$0xff] %vm1003_vm6, %v2084_v17  ;;  %v2085_v3 = vadd.f32 %v4711_v51, %v2053_v62  ;;  %v1926_v23 = vpop.f32.mrb[51].mxu1  ;;  %v2064_v51 = vld [vmem:[#allocation2 + $0x70] sm:$0xff] }
 0x16f   : > { %v4700_v52 = vpop.f32.mrb[40].mxu0  ;;  %v1800_v25 = vld [vmem:[#allocation2 + $0xf0] sm:$0xff]  ;;  %2114 = vst.msk [vmem:[#allocation2] sm:$0xff] %vm1003_vm6, %v2082_v36  ;;  %v2083_v21 = vadd.f32 %v2051_v16, %v1926_v23 }
 0x170   : > { %v1739_v32 = vpop.f32.mrb[41].mxu0  ;;  %v1828_v33 = vadd.f32 %v4700_v52, %v1796_v9  ;;  %v1798_v50 = vld [vmem:[#allocation2 + $0xe0] sm:$0xff]  ;;  %2117 = vst.msk [vmem:[#allocation2 + $0x18] sm:$0xff] %vm1003_vm6, %v2085_v3 }
 0x171   : > { %v4701_v43 = vpop.f32.mrb[42].mxu0  ;;  %v1826_v12 = vadd.f32 %v1794_v30, %v1739_v32  ;;  %v1801_v42 = vld [vmem:[#allocation2 + $0xf8] sm:$0xff]  ;;  %2115 = vst.msk [vmem:[#allocation2 + $0x8] sm:$0xff] %vm1003_vm6, %v2083_v21  ;;  %v2055_v32 = vld [vmem:[#allocation2 + $0x28] sm:$0xff]  ;;  %v2062_v3 = vld [vmem:[#allocation2 + $0x60] sm:$0xff] }
 0x172   : > { %v1742_v37 = vpop.f32.mrb[43].mxu0  ;;  %1860 = vst.msk [vmem:[#allocation2 + $0xd0] sm:$0xff] %vm1003_vm6, %v1828_v33  ;;  %v1829_v38 = vadd.f32 %v4701_v43, %v1797_v39  ;;  %v1799_v19 = vld [vmem:[#allocation2 + $0xe8] sm:$0xff]  ;;  %v2065_v21 = vld [vmem:[#allocation2 + $0x78] sm:$0xff] }
 0x173   : > { %1858 = vst.msk [vmem:[#allocation2 + $0xc0] sm:$0xff] %vm1003_vm6, %v1826_v12  ;;  %v1827_v58 = vadd.f32 %v1795_v27, %v1742_v37  ;;  %v4714_v13 = vpop.f32.mrb[52].mxu1 }
 0x174   : > { %1861 = vst.msk [vmem:[#allocation2 + $0xd8] sm:$0xff] %vm1003_vm6, %v1829_v38  ;;  %v2088_v47 = vadd.f32 %v4714_v13, %v2056_v5  ;;  %v1939_v53 = vpop.f32.mrb[53].mxu1 }
 0x175   : > { %1859 = vst.msk [vmem:[#allocation2 + $0xc8] sm:$0xff] %vm1003_vm6, %v1827_v58  ;;  %v2332_v0 = vld [vmem:[#allocation2 + $0x10] sm:$0xff]  ;;  %v2086_v1 = vadd.f32 %v2054_v29, %v1939_v53  ;;  %v4715_v28 = vpop.f32.mrb[54].mxu1 }
 0x176   : > { %2120 = vst.msk [vmem:[#allocation2 + $0x30] sm:$0xff] %vm1003_vm6, %v2088_v47  ;;  %v2330_v15 = vld [vmem:[#allocation2] sm:$0xff]  ;;  %v2089_v20 = vadd.f32 %v4715_v28, %v2057_v46  ;;  %v1942_v52 = vpop.f32.mrb[55].mxu1  ;;  %v2068_v28 = vld [vmem:[#allocation2 + $0x90] sm:$0xff] }
 0x177   : > { %v4704_v63 = vpop.f32.mrb[44].mxu0  ;;  %2118 = vst.msk [vmem:[#allocation2 + $0x20] sm:$0xff] %vm1003_vm6, %v2086_v1  ;;  %v2333_v57 = vld [vmem:[#allocation2 + $0x18] sm:$0xff]  ;;  %v2087_v43 = vadd.f32 %v2055_v32, %v1942_v52 }
 0x178   : > { %v1755_v4 = vpop.f32.mrb[45].mxu0  ;;  %v1832_v45 = vadd.f32 %v4704_v63, %v1800_v25  ;;  %2121 = vst.msk [vmem:[#allocation2 + $0x38] sm:$0xff] %vm1003_vm6, %v2089_v20  ;;  %v2331_v10 = vld [vmem:[#allocation2 + $0x8] sm:$0xff]  ;;  %v2066_v20 = vld [vmem:[#allocation2 + $0x80] sm:$0xff] }
 0x179   : > { %v4705_v2 = vpop.f32.mrb[46].mxu0  ;;  %v1830_v48 = vadd.f32 %v1798_v50, %v1755_v4  ;;  %2119 = vst.msk [vmem:[#allocation2 + $0x28] sm:$0xff] %vm1003_vm6, %v2087_v43  ;;  %v2059_v4 = vld [vmem:[#allocation2 + $0x48] sm:$0xff]  ;;  %v2069_v43 = vld [vmem:[#allocation2 + $0x98] sm:$0xff] }
 0x17a   : > { %v1758_v7 = vpop.f32.mrb[47].mxu0  ;;  %1864 = vst.msk [vmem:[#allocation2 + $0xf0] sm:$0xff] %vm1003_vm6, %v1832_v45  ;;  %v1833_v41 = vadd.f32 %v4705_v2, %v1801_v42 }
 0x17b   : > { %1862 = vst.msk [vmem:[#allocation2 + $0xe0] sm:$0xff] %vm1003_vm6, %v1830_v48  ;;  %v1831_v59 = vadd.f32 %v1799_v19, %v1758_v7  ;;  %v4718_v18 = vpop.f32.mrb[56].mxu1 }
 0x17c   : > { %1865 = vst.msk [vmem:[#allocation2 + $0xf8] sm:$0xff] %vm1003_vm6, %v1833_v41  ;;  %v2092_v33 = vadd.f32 %v4718_v18, %v2060_v40  ;;  %v1955_v30 = vpop.f32.mrb[57].mxu1 }
 0x17d   : > { %1863 = vst.msk [vmem:[#allocation2 + $0xe8] sm:$0xff] %vm1003_vm6, %v1831_v59  ;;  %v2336_v24 = vld [vmem:[#allocation2 + $0x30] sm:$0xff]  ;;  %v2090_v12 = vadd.f32 %v2058_v26, %v1955_v30  ;;  %v4719_v39 = vpop.f32.mrb[58].mxu1 }
 0x17e   : > { %2124 = vst.msk [vmem:[#allocation2 + $0x50] sm:$0xff] %vm1003_vm6, %v2092_v33  ;;  %v2334_v27 = vld [vmem:[#allocation2 + $0x20] sm:$0xff]  ;;  %v2093_v58 = vadd.f32 %v4719_v39, %v2061_v49  ;;  %v1958_v63 = vpop.f32.mrb[59].mxu1  ;;  %v2072_v39 = vld [vmem:[#allocation2 + $0xb0] sm:$0xff] }
 0x17f   : > { %v4744_v44 = vpop.f32.mrb[48].mxu0  ;;  %2122 = vst.msk [vmem:[#allocation2 + $0x40] sm:$0xff] %vm1003_vm6, %v2090_v12  ;;  %v2337_v8 = vld [vmem:[#allocation2 + $0x38] sm:$0xff]  ;;  %v2091_v2 = vadd.f32 %v2059_v4, %v1958_v63 }
 0x180   : > { %v2203_v61 = vpop.f32.mrb[49].mxu0  ;;  %v2364_v34 = vadd.f32 %v4744_v44, %v2332_v0  ;;  %2125 = vst.msk [vmem:[#allocation2 + $0x58] sm:$0xff] %vm1003_vm6, %v2093_v58  ;;  %v2335_v35 = vld [vmem:[#allocation2 + $0x28] sm:$0xff]  ;;  %v2070_v58 = vld [vmem:[#allocation2 + $0xa0] sm:$0xff] }
 0x181   : > { %v4745_v60 = vpop.f32.mrb[50].mxu0  ;;  %v2362_v31 = vadd.f32 %v2330_v15, %v2203_v61  ;;  %2123 = vst.msk [vmem:[#allocation2 + $0x48] sm:$0xff] %vm1003_vm6, %v2091_v2  ;;  %v2063_v61 = vld [vmem:[#allocation2 + $0x68] sm:$0xff]  ;;  %v2073_v2 = vld [vmem:[#allocation2 + $0xb8] sm:$0xff] }
 0x182   : > { %v2206_v6 = vpop.f32.mrb[51].mxu0  ;;  %2396 = vst.msk [vmem:[#allocation2 + $0x10] sm:$0xff] %vm1003_vm6, %v2364_v34  ;;  %v2365_v56 = vadd.f32 %v4745_v60, %v2333_v57 }
 0x183   : > { %2394 = vst.msk [vmem:[#allocation2] sm:$0xff] %vm1003_vm6, %v2362_v31  ;;  %v2363_v55 = vadd.f32 %v2331_v10, %v2206_v6  ;;  %v4722_v36 = vpop.f32.mrb[60].mxu1 }
 0x184   : > { %2397 = vst.msk [vmem:[#allocation2 + $0x18] sm:$0xff] %vm1003_vm6, %v2365_v56  ;;  %v2096_v45 = vadd.f32 %v4722_v36, %v2064_v51  ;;  %v1971_v50 = vpop.f32.mrb[61].mxu1 }
 0x185   : > { %2395 = vst.msk [vmem:[#allocation2 + $0x8] sm:$0xff] %vm1003_vm6, %v2363_v55  ;;  %v2340_v16 = vld [vmem:[#allocation2 + $0x50] sm:$0xff]  ;;  %v2094_v48 = vadd.f32 %v2062_v3, %v1971_v50  ;;  %v4723_v42 = vpop.f32.mrb[62].mxu1 }
 0x186   : > { %2128 = vst.msk [vmem:[#allocation2 + $0x70] sm:$0xff] %vm1003_vm6, %v2096_v45  ;;  %v2338_v19 = vld [vmem:[#allocation2 + $0x40] sm:$0xff]  ;;  %v2097_v59 = vadd.f32 %v4723_v42, %v2065_v21  ;;  %v1974_v44 = vpop.f32.mrb[63].mxu1  ;;  %v2076_v42 = vld [vmem:[#allocation2 + $0xd0] sm:$0xff] }
 0x187   : > { %v4748_v37 = vpop.f32.mrb[52].mxu0  ;;  %2126 = vst.msk [vmem:[#allocation2 + $0x60] sm:$0xff] %vm1003_vm6, %v2094_v48  ;;  %v2341_v5 = vld [vmem:[#allocation2 + $0x58] sm:$0xff]  ;;  %v2095_v60 = vadd.f32 %v2063_v61, %v1974_v44 }
 0x188   : > { %v2219_v9 = vpop.f32.mrb[53].mxu0  ;;  %v2368_v38 = vadd.f32 %v4748_v37, %v2336_v24  ;;  %2129 = vst.msk [vmem:[#allocation2 + $0x78] sm:$0xff] %vm1003_vm6, %v2097_v59  ;;  %v2339_v53 = vld [vmem:[#allocation2 + $0x48] sm:$0xff]  ;;  %v2074_v59 = vld [vmem:[#allocation2 + $0xc0] sm:$0xff] }
 0x189   : > { %v4749_v22 = vpop.f32.mrb[54].mxu0  ;;  %v2366_v14 = vadd.f32 %v2334_v27, %v2219_v9  ;;  %2127 = vst.msk [vmem:[#allocation2 + $0x68] sm:$0xff] %vm1003_vm6, %v2095_v60  ;;  %v2067_v9 = vld [vmem:[#allocation2 + $0x88] sm:$0xff]  ;;  %v2077_v60 = vld [vmem:[#allocation2 + $0xd8] sm:$0xff] }
 0x18a   : > { %v2222_v54 = vpop.f32.mrb[55].mxu0  ;;  %2400 = vst.msk [vmem:[#allocation2 + $0x30] sm:$0xff] %vm1003_vm6, %v2368_v38  ;;  %v2369_v17 = vadd.f32 %v4749_v22, %v2337_v8 }
 0x18b   : > { %2398 = vst.msk [vmem:[#allocation2 + $0x20] sm:$0xff] %vm1003_vm6, %v2366_v14  ;;  %v2367_v11 = vadd.f32 %v2335_v35, %v2222_v54  ;;  %v4726_v1 = vpop.f32.mrb[64].mxu1 }
 0x18c   : > { %2401 = vst.msk [vmem:[#allocation2 + $0x38] sm:$0xff] %vm1003_vm6, %v2369_v17  ;;  %v2100_v34 = vadd.f32 %v4726_v1, %v2068_v28  ;;  %v1987_v15 = vpop.f32.mrb[65].mxu1 }
 0x18d   : > { %2399 = vst.msk [vmem:[#allocation2 + $0x28] sm:$0xff] %vm1003_vm6, %v2367_v11  ;;  %v2344_v32 = vld [vmem:[#allocation2 + $0x70] sm:$0xff]  ;;  %v2098_v31 = vadd.f32 %v2066_v20, %v1987_v15  ;;  %v4727_v57 = vpop.f32.mrb[66].mxu1 }
 0x18e   : > { %2132 = vst.msk [vmem:[#allocation2 + $0x90] sm:$0xff] %vm1003_vm6, %v2100_v34  ;;  %v2342_v10 = vld [vmem:[#allocation2 + $0x60] sm:$0xff]  ;;  %v2101_v55 = vadd.f32 %v4727_v57, %v2069_v43  ;;  %v1990_v37 = vpop.f32.mrb[67].mxu1  ;;  %v2080_v57 = vld [vmem:[#allocation2 + $0xf0] sm:$0xff] }
 0x18f   : > { %v4752_v7 = vpop.f32.mrb[56].mxu0  ;;  %2130 = vst.msk [vmem:[#allocation2 + $0x80] sm:$0xff] %vm1003_vm6, %v2098_v31  ;;  %v2345_v40 = vld [vmem:[#allocation2 + $0x78] sm:$0xff]  ;;  %v2099_v22 = vadd.f32 %v2067_v9, %v1990_v37 }
 0x190   : > { %v2235_v25 = vpop.f32.mrb[57].mxu0  ;;  %v2372_v41 = vadd.f32 %v4752_v7, %v2340_v16  ;;  %2133 = vst.msk [vmem:[#allocation2 + $0x98] sm:$0xff] %vm1003_vm6, %v2101_v55  ;;  %v2343_v30 = vld [vmem:[#allocation2 + $0x68] sm:$0xff]  ;;  %v2078_v55 = vld [vmem:[#allocation2 + $0xe0] sm:$0xff] }
 0x191   : > { %v4753_v62 = vpop.f32.mrb[58].mxu0  ;;  %v2370_v13 = vadd.f32 %v2338_v19, %v2235_v25  ;;  %2131 = vst.msk [vmem:[#allocation2 + $0x88] sm:$0xff] %vm1003_vm6, %v2099_v22  ;;  %v2071_v25 = vld [vmem:[#allocation2 + $0xa8] sm:$0xff]  ;;  %v2081_v22 = vld [vmem:[#allocation2 + $0xf8] sm:$0xff] }
 0x192   : > { %v2238_v23 = vpop.f32.mrb[59].mxu0  ;;  %2404 = vst.msk [vmem:[#allocation2 + $0x50] sm:$0xff] %vm1003_vm6, %v2372_v41  ;;  %v2373_v47 = vadd.f32 %v4753_v62, %v2341_v5 }
 0x193   : > { %2402 = vst.msk [vmem:[#allocation2 + $0x40] sm:$0xff] %vm1003_vm6, %v2370_v13  ;;  %v2371_v29 = vadd.f32 %v2339_v53, %v2238_v23  ;;  %v4730_v12 = vpop.f32.mrb[68].mxu1 }
 0x194   : > { %2405 = vst.msk [vmem:[#allocation2 + $0x58] sm:$0xff] %vm1003_vm6, %v2373_v47  ;;  %v2104_v38 = vadd.f32 %v4730_v12, %v2072_v39  ;;  %v2003_v27 = vpop.f32.mrb[69].mxu1 }
 0x195   : > { %2403 = vst.msk [vmem:[#allocation2 + $0x48] sm:$0xff] %vm1003_vm6, %v2371_v29  ;;  %v2348_v4 = vld [vmem:[#allocation2 + $0x90] sm:$0xff]  ;;  %v2102_v14 = vadd.f32 %v2070_v58, %v2003_v27  ;;  %v4731_v8 = vpop.f32.mrb[70].mxu1 }
 0x196   : > { %2136 = vst.msk [vmem:[#allocation2 + $0xb0] sm:$0xff] %vm1003_vm6, %v2104_v38  ;;  %v2346_v35 = vld [vmem:[#allocation2 + $0x80] sm:$0xff]  ;;  %v2105_v11 = vadd.f32 %v4731_v8, %v2073_v2  ;;  %v2006_v7 = vpop.f32.mrb[71].mxu1  ;;  %v2610_v8 = vld [vmem:[#allocation2 + $0x10] sm:$0xff] }
 0x197   : > { %v4756_v6 = vpop.f32.mrb[60].mxu0  ;;  %2134 = vst.msk [vmem:[#allocation2 + $0xa0] sm:$0xff] %vm1003_vm6, %v2102_v14  ;;  %v2349_v51 = vld [vmem:[#allocation2 + $0x98] sm:$0xff]  ;;  %v2103_v62 = vadd.f32 %v2071_v25, %v2006_v7 }
 0x198   : > { %v2251_v0 = vpop.f32.mrb[61].mxu0  ;;  %v2376_v56 = vadd.f32 %v4756_v6, %v2344_v32  ;;  %2137 = vst.msk [vmem:[#allocation2 + $0xb8] sm:$0xff] %vm1003_vm6, %v2105_v11  ;;  %v2347_v50 = vld [vmem:[#allocation2 + $0x88] sm:$0xff]  ;;  %v2608_v11 = vld [vmem:[#allocation2] sm:$0xff] }
 0x199   : > { %v4757_v46 = vpop.f32.mrb[62].mxu0  ;;  %v2374_v18 = vadd.f32 %v2342_v10, %v2251_v0  ;;  %2135 = vst.msk [vmem:[#allocation2 + $0xa8] sm:$0xff] %vm1003_vm6, %v2103_v62  ;;  %v2075_v0 = vld [vmem:[#allocation2 + $0xc8] sm:$0xff]  ;;  %v2611_v62 = vld [vmem:[#allocation2 + $0x18] sm:$0xff] }
 0x19a   : > { %v2254_v52 = vpop.f32.mrb[63].mxu0  ;;  %2408 = vst.msk [vmem:[#allocation2 + $0x70] sm:$0xff] %vm1003_vm6, %v2376_v56  ;;  %v2377_v33 = vadd.f32 %v4757_v46, %v2345_v40 }
 0x19b   : > { %2406 = vst.msk [vmem:[#allocation2 + $0x60] sm:$0xff] %vm1003_vm6, %v2374_v18  ;;  %v2375_v26 = vadd.f32 %v2343_v30, %v2254_v52  ;;  %v4734_v48 = vpop.f32.mrb[72].mxu1 }
 0x19c   : > { %2409 = vst.msk [vmem:[#allocation2 + $0x78] sm:$0xff] %vm1003_vm6, %v2377_v33  ;;  %v2108_v41 = vadd.f32 %v4734_v48, %v2076_v42  ;;  %v2019_v19 = vpop.f32.mrb[73].mxu1 }
 0x19d   : > { %2407 = vst.msk [vmem:[#allocation2 + $0x68] sm:$0xff] %vm1003_vm6, %v2375_v26  ;;  %v2352_v61 = vld [vmem:[#allocation2 + $0xb0] sm:$0xff]  ;;  %v2106_v13 = vadd.f32 %v2074_v59, %v2019_v19  ;;  %v4735_v5 = vpop.f32.mrb[74].mxu1 }
 0x19e   : > { %2140 = vst.msk [vmem:[#allocation2 + $0xd0] sm:$0xff] %vm1003_vm6, %v2108_v41  ;;  %v2350_v53 = vld [vmem:[#allocation2 + $0xa0] sm:$0xff]  ;;  %v2109_v29 = vadd.f32 %v4735_v5, %v2077_v60  ;;  %v2022_v6 = vpop.f32.mrb[75].mxu1  ;;  %v2614_v5 = vld [vmem:[#allocation2 + $0x30] sm:$0xff] }
 0x19f   : > { %v4760_v54 = vpop.f32.mrb[64].mxu0  ;;  %2138 = vst.msk [vmem:[#allocation2 + $0xc0] sm:$0xff] %vm1003_vm6, %v2106_v13  ;;  %v2353_v28 = vld [vmem:[#allocation2 + $0xb8] sm:$0xff]  ;;  %v2107_v46 = vadd.f32 %v2075_v0, %v2022_v6 }
 0x1a0   : > { %v2267_v24 = vpop.f32.mrb[65].mxu0  ;;  %v2380_v17 = vadd.f32 %v4760_v54, %v2348_v4  ;;  %2141 = vst.msk [vmem:[#allocation2 + $0xd8] sm:$0xff] %vm1003_vm6, %v2109_v29  ;;  %v2351_v15 = vld [vmem:[#allocation2 + $0xa8] sm:$0xff]  ;;  %v2612_v29 = vld [vmem:[#allocation2 + $0x20] sm:$0xff] }
 0x1a1   : > { %v4761_v49 = vpop.f32.mrb[66].mxu0  ;;  %v2378_v36 = vadd.f32 %v2346_v35, %v2267_v24  ;;  %2139 = vst.msk [vmem:[#allocation2 + $0xc8] sm:$0xff] %vm1003_vm6, %v2107_v46  ;;  %v2079_v24 = vld [vmem:[#allocation2 + $0xe8] sm:$0xff]  ;;  %v2615_v46 = vld [vmem:[#allocation2 + $0x38] sm:$0xff] }
 0x1a2   : > { %v2270_v63 = vpop.f32.mrb[67].mxu0  ;;  %2412 = vst.msk [vmem:[#allocation2 + $0x90] sm:$0xff] %vm1003_vm6, %v2380_v17  ;;  %v2381_v45 = vadd.f32 %v4761_v49, %v2349_v51 }
 0x1a3   : > { %2410 = vst.msk [vmem:[#allocation2 + $0x80] sm:$0xff] %vm1003_vm6, %v2378_v36  ;;  %v2379_v3 = vadd.f32 %v2347_v50, %v2270_v63  ;;  %v4738_v31 = vpop.f32.mrb[76].mxu1 }
 0x1a4   : > { %2413 = vst.msk [vmem:[#allocation2 + $0x98] sm:$0xff] %vm1003_vm6, %v2381_v45  ;;  %v2112_v56 = vadd.f32 %v4738_v31, %v2080_v57  ;;  %v2035_v10 = vpop.f32.mrb[77].mxu1 }
 0x1a5   : > { %2411 = vst.msk [vmem:[#allocation2 + $0x88] sm:$0xff] %vm1003_vm6, %v2379_v3  ;;  %v2356_v9 = vld [vmem:[#allocation2 + $0xd0] sm:$0xff]  ;;  %v2110_v18 = vadd.f32 %v2078_v55, %v2035_v10  ;;  %v4739_v40 = vpop.f32.mrb[78].mxu1 }
 0x1a6   : > { %2144 = vst.msk [vmem:[#allocation2 + $0xf0] sm:$0xff] %vm1003_vm6, %v2112_v56  ;;  %v2354_v30 = vld [vmem:[#allocation2 + $0xc0] sm:$0xff]  ;;  %v2113_v26 = vadd.f32 %v4739_v40, %v2081_v22  ;;  %v2038_v54 = vpop.f32.mrb[79].mxu1  ;;  %v2618_v40 = vld [vmem:[#allocation2 + $0x50] sm:$0xff] }
 0x1a7   : > { %v4764_v23 = vpop.f32.mrb[68].mxu0  ;;  %2142 = vst.msk [vmem:[#allocation2 + $0xe0] sm:$0xff] %vm1003_vm6, %v2110_v18  ;;  %v2357_v39 = vld [vmem:[#allocation2 + $0xd8] sm:$0xff]  ;;  %v2111_v49 = vadd.f32 %v2079_v24, %v2038_v54 }
 0x1a8   : > { %v2283_v16 = vpop.f32.mrb[69].mxu0  ;;  %v2384_v47 = vadd.f32 %v4764_v23, %v2352_v61  ;;  %2145 = vst.msk [vmem:[#allocation2 + $0xf8] sm:$0xff] %vm1003_vm6, %v2113_v26  ;;  %v2355_v27 = vld [vmem:[#allocation2 + $0xc8] sm:$0xff]  ;;  %v2616_v26 = vld [vmem:[#allocation2 + $0x40] sm:$0xff] }
 0x1a9   : > { %v4765_v21 = vpop.f32.mrb[70].mxu0  ;;  %v2382_v1 = vadd.f32 %v2350_v53, %v2283_v16  ;;  %2143 = vst.msk [vmem:[#allocation2 + $0xe8] sm:$0xff] %vm1003_vm6, %v2111_v49  ;;  %v2609_v16 = vld [vmem:[#allocation2 + $0x8] sm:$0xff]  ;;  %v2619_v49 = vld [vmem:[#allocation2 + $0x58] sm:$0xff] }
 0x1aa   : > { %v2286_v44 = vpop.f32.mrb[71].mxu0  ;;  %2416 = vst.msk [vmem:[#allocation2 + $0xb0] sm:$0xff] %vm1003_vm6, %v2384_v47  ;;  %v2385_v34 = vadd.f32 %v4765_v21, %v2353_v28 }
 0x1ab   : > { %2414 = vst.msk [vmem:[#allocation2 + $0xa0] sm:$0xff] %vm1003_vm6, %v2382_v1  ;;  %v2383_v20 = vadd.f32 %v2351_v15, %v2286_v44  ;;  %v4778_v14 = vpop.f32.mrb[80].mxu1 }
 0x1ac   : > { %2417 = vst.msk [vmem:[#allocation2 + $0xb8] sm:$0xff] %vm1003_vm6, %v2385_v34  ;;  %v2642_v17 = vadd.f32 %v4778_v14, %v2610_v8  ;;  %v2481_v35 = vpop.f32.mrb[81].mxu1 }
 0x1ad   : > { %2415 = vst.msk [vmem:[#allocation2 + $0xa8] sm:$0xff] %vm1003_vm6, %v2383_v20  ;;  %v2360_v25 = vld [vmem:[#allocation2 + $0xf0] sm:$0xff]  ;;  %v2640_v36 = vadd.f32 %v2608_v11, %v2481_v35  ;;  %v4779_v51 = vpop.f32.mrb[82].mxu1 }
 0x1ae   : > { %v2358_v50 = vld [vmem:[#allocation2 + $0xe0] sm:$0xff]  ;;  %2674 = vst.msk [vmem:[#allocation2 + $0x10] sm:$0xff] %vm1003_vm6, %v2642_v17  ;;  %v2643_v3 = vadd.f32 %v4779_v51, %v2611_v62  ;;  %v2484_v23 = vpop.f32.mrb[83].mxu1  ;;  %v2622_v51 = vld [vmem:[#allocation2 + $0x70] sm:$0xff] }
 0x1af   : > { %v4768_v52 = vpop.f32.mrb[72].mxu0  ;;  %v2361_v42 = vld [vmem:[#allocation2 + $0xf8] sm:$0xff]  ;;  %2672 = vst.msk [vmem:[#allocation2] sm:$0xff] %vm1003_vm6, %v2640_v36  ;;  %v2641_v21 = vadd.f32 %v2609_v16, %v2484_v23 }
 0x1b0   : > { %v2299_v32 = vpop.f32.mrb[73].mxu0  ;;  %v2388_v33 = vadd.f32 %v4768_v52, %v2356_v9  ;;  %v2359_v19 = vld [vmem:[#allocation2 + $0xe8] sm:$0xff]  ;;  %2675 = vst.msk [vmem:[#allocation2 + $0x18] sm:$0xff] %vm1003_vm6, %v2643_v3  ;;  %v2620_v3 = vld [vmem:[#allocation2 + $0x60] sm:$0xff] }
 0x1b1   : > { %v4769_v43 = vpop.f32.mrb[74].mxu0  ;;  %v2386_v12 = vadd.f32 %v2354_v30, %v2299_v32  ;;  %2673 = vst.msk [vmem:[#allocation2 + $0x8] sm:$0xff] %vm1003_vm6, %v2641_v21  ;;  %v2613_v32 = vld [vmem:[#allocation2 + $0x28] sm:$0xff]  ;;  %v2623_v21 = vld [vmem:[#allocation2 + $0x78] sm:$0xff] }
 0x1b2   : > { %v2302_v37 = vpop.f32.mrb[75].mxu0  ;;  %2420 = vst.msk [vmem:[#allocation2 + $0xd0] sm:$0xff] %vm1003_vm6, %v2388_v33  ;;  %v2389_v38 = vadd.f32 %v4769_v43, %v2357_v39 }
 0x1b3   : > { %2418 = vst.msk [vmem:[#allocation2 + $0xc0] sm:$0xff] %vm1003_vm6, %v2386_v12  ;;  %v2387_v58 = vadd.f32 %v2355_v27, %v2302_v37  ;;  %v4782_v13 = vpop.f32.mrb[84].mxu1 }
 0x1b4   : > { %2421 = vst.msk [vmem:[#allocation2 + $0xd8] sm:$0xff] %vm1003_vm6, %v2389_v38  ;;  %v2646_v47 = vadd.f32 %v4782_v13, %v2614_v5  ;;  %v2497_v53 = vpop.f32.mrb[85].mxu1 }
 0x1b5   : > { %2419 = vst.msk [vmem:[#allocation2 + $0xc8] sm:$0xff] %vm1003_vm6, %v2387_v58  ;;  %v2890_v0 = vld [vmem:[#allocation2 + $0x10] sm:$0xff]  ;;  %v2644_v1 = vadd.f32 %v2612_v29, %v2497_v53  ;;  %v4783_v28 = vpop.f32.mrb[86].mxu1 }
 0x1b6   : > { %2678 = vst.msk [vmem:[#allocation2 + $0x30] sm:$0xff] %vm1003_vm6, %v2646_v47  ;;  %v2888_v15 = vld [vmem:[#allocation2] sm:$0xff]  ;;  %v2647_v20 = vadd.f32 %v4783_v28, %v2615_v46  ;;  %v2500_v52 = vpop.f32.mrb[87].mxu1  ;;  %v2626_v28 = vld [vmem:[#allocation2 + $0x90] sm:$0xff] }
 0x1b7   : > { %v4772_v63 = vpop.f32.mrb[76].mxu0  ;;  %2676 = vst.msk [vmem:[#allocation2 + $0x20] sm:$0xff] %vm1003_vm6, %v2644_v1  ;;  %v2891_v57 = vld [vmem:[#allocation2 + $0x18] sm:$0xff]  ;;  %v2645_v43 = vadd.f32 %v2613_v32, %v2500_v52 }
 0x1b8   : > { %v2315_v4 = vpop.f32.mrb[77].mxu0  ;;  %v2392_v45 = vadd.f32 %v4772_v63, %v2360_v25  ;;  %2679 = vst.msk [vmem:[#allocation2 + $0x38] sm:$0xff] %vm1003_vm6, %v2647_v20  ;;  %v2889_v10 = vld [vmem:[#allocation2 + $0x8] sm:$0xff]  ;;  %v2624_v20 = vld [vmem:[#allocation2 + $0x80] sm:$0xff] }
 0x1b9   : > { %v4773_v2 = vpop.f32.mrb[78].mxu0  ;;  %v2390_v48 = vadd.f32 %v2358_v50, %v2315_v4  ;;  %2677 = vst.msk [vmem:[#allocation2 + $0x28] sm:$0xff] %vm1003_vm6, %v2645_v43  ;;  %v2617_v4 = vld [vmem:[#allocation2 + $0x48] sm:$0xff]  ;;  %v2627_v43 = vld [vmem:[#allocation2 + $0x98] sm:$0xff] }
 0x1ba   : > { %v2318_v7 = vpop.f32.mrb[79].mxu0  ;;  %2424 = vst.msk [vmem:[#allocation2 + $0xf0] sm:$0xff] %vm1003_vm6, %v2392_v45  ;;  %v2393_v41 = vadd.f32 %v4773_v2, %v2361_v42 }
 0x1bb   : > { %2422 = vst.msk [vmem:[#allocation2 + $0xe0] sm:$0xff] %vm1003_vm6, %v2390_v48  ;;  %v2391_v59 = vadd.f32 %v2359_v19, %v2318_v7  ;;  %v4786_v18 = vpop.f32.mrb[88].mxu1 }
 0x1bc   : > { %2425 = vst.msk [vmem:[#allocation2 + $0xf8] sm:$0xff] %vm1003_vm6, %v2393_v41  ;;  %v2650_v33 = vadd.f32 %v4786_v18, %v2618_v40  ;;  %v2513_v30 = vpop.f32.mrb[89].mxu1 }
 0x1bd   : > { %2423 = vst.msk [vmem:[#allocation2 + $0xe8] sm:$0xff] %vm1003_vm6, %v2391_v59  ;;  %v2894_v24 = vld [vmem:[#allocation2 + $0x30] sm:$0xff]  ;;  %v2648_v12 = vadd.f32 %v2616_v26, %v2513_v30  ;;  %v4787_v39 = vpop.f32.mrb[90].mxu1 }
 0x1be   : > { %2682 = vst.msk [vmem:[#allocation2 + $0x50] sm:$0xff] %vm1003_vm6, %v2650_v33  ;;  %v2892_v27 = vld [vmem:[#allocation2 + $0x20] sm:$0xff]  ;;  %v2651_v58 = vadd.f32 %v4787_v39, %v2619_v49  ;;  %v2516_v63 = vpop.f32.mrb[91].mxu1  ;;  %v2630_v39 = vld [vmem:[#allocation2 + $0xb0] sm:$0xff] }
 0x1bf   : > { %v4812_v44 = vpop.f32.mrb[80].mxu0  ;;  %2680 = vst.msk [vmem:[#allocation2 + $0x40] sm:$0xff] %vm1003_vm6, %v2648_v12  ;;  %v2895_v8 = vld [vmem:[#allocation2 + $0x38] sm:$0xff]  ;;  %v2649_v2 = vadd.f32 %v2617_v4, %v2516_v63 }
 0x1c0   : > { %v2761_v61 = vpop.f32.mrb[81].mxu0  ;;  %v2922_v34 = vadd.f32 %v4812_v44, %v2890_v0  ;;  %2683 = vst.msk [vmem:[#allocation2 + $0x58] sm:$0xff] %vm1003_vm6, %v2651_v58  ;;  %v2893_v35 = vld [vmem:[#allocation2 + $0x28] sm:$0xff]  ;;  %v2628_v58 = vld [vmem:[#allocation2 + $0xa0] sm:$0xff] }
 0x1c1   : > { %v4813_v60 = vpop.f32.mrb[82].mxu0  ;;  %v2920_v31 = vadd.f32 %v2888_v15, %v2761_v61  ;;  %2681 = vst.msk [vmem:[#allocation2 + $0x48] sm:$0xff] %vm1003_vm6, %v2649_v2  ;;  %v2621_v61 = vld [vmem:[#allocation2 + $0x68] sm:$0xff]  ;;  %v2631_v2 = vld [vmem:[#allocation2 + $0xb8] sm:$0xff] }
 0x1c2   : > { %v2764_v6 = vpop.f32.mrb[83].mxu0  ;;  %2954 = vst.msk [vmem:[#allocation2 + $0x10] sm:$0xff] %vm1003_vm6, %v2922_v34  ;;  %v2923_v56 = vadd.f32 %v4813_v60, %v2891_v57 }
 0x1c3   : > { %2952 = vst.msk [vmem:[#allocation2] sm:$0xff] %vm1003_vm6, %v2920_v31  ;;  %v2921_v55 = vadd.f32 %v2889_v10, %v2764_v6  ;;  %v4790_v36 = vpop.f32.mrb[92].mxu1 }
 0x1c4   : > { %2955 = vst.msk [vmem:[#allocation2 + $0x18] sm:$0xff] %vm1003_vm6, %v2923_v56  ;;  %v2654_v45 = vadd.f32 %v4790_v36, %v2622_v51  ;;  %v2529_v50 = vpop.f32.mrb[93].mxu1 }
 0x1c5   : > { %2953 = vst.msk [vmem:[#allocation2 + $0x8] sm:$0xff] %vm1003_vm6, %v2921_v55  ;;  %v2898_v16 = vld [vmem:[#allocation2 + $0x50] sm:$0xff]  ;;  %v2652_v48 = vadd.f32 %v2620_v3, %v2529_v50  ;;  %v4791_v42 = vpop.f32.mrb[94].mxu1 }
 0x1c6   : > { %2686 = vst.msk [vmem:[#allocation2 + $0x70] sm:$0xff] %vm1003_vm6, %v2654_v45  ;;  %v2896_v19 = vld [vmem:[#allocation2 + $0x40] sm:$0xff]  ;;  %v2655_v59 = vadd.f32 %v4791_v42, %v2623_v21  ;;  %v2532_v44 = vpop.f32.mrb[95].mxu1  ;;  %v2634_v42 = vld [vmem:[#allocation2 + $0xd0] sm:$0xff] }
 0x1c7   : > { %v4816_v37 = vpop.f32.mrb[84].mxu0  ;;  %2684 = vst.msk [vmem:[#allocation2 + $0x60] sm:$0xff] %vm1003_vm6, %v2652_v48  ;;  %v2899_v5 = vld [vmem:[#allocation2 + $0x58] sm:$0xff]  ;;  %v2653_v60 = vadd.f32 %v2621_v61, %v2532_v44 }
 0x1c8   : > { %v2777_v9 = vpop.f32.mrb[85].mxu0  ;;  %v2926_v38 = vadd.f32 %v4816_v37, %v2894_v24  ;;  %2687 = vst.msk [vmem:[#allocation2 + $0x78] sm:$0xff] %vm1003_vm6, %v2655_v59  ;;  %v2897_v53 = vld [vmem:[#allocation2 + $0x48] sm:$0xff]  ;;  %v2632_v59 = vld [vmem:[#allocation2 + $0xc0] sm:$0xff] }
 0x1c9   : > { %v4817_v22 = vpop.f32.mrb[86].mxu0  ;;  %v2924_v14 = vadd.f32 %v2892_v27, %v2777_v9  ;;  %2685 = vst.msk [vmem:[#allocation2 + $0x68] sm:$0xff] %vm1003_vm6, %v2653_v60  ;;  %v2625_v9 = vld [vmem:[#allocation2 + $0x88] sm:$0xff]  ;;  %v2635_v60 = vld [vmem:[#allocation2 + $0xd8] sm:$0xff] }
 0x1ca   : > { %v2780_v54 = vpop.f32.mrb[87].mxu0  ;;  %2958 = vst.msk [vmem:[#allocation2 + $0x30] sm:$0xff] %vm1003_vm6, %v2926_v38  ;;  %v2927_v17 = vadd.f32 %v4817_v22, %v2895_v8 }
 0x1cb   : > { %2956 = vst.msk [vmem:[#allocation2 + $0x20] sm:$0xff] %vm1003_vm6, %v2924_v14  ;;  %v2925_v11 = vadd.f32 %v2893_v35, %v2780_v54  ;;  %v4794_v1 = vpop.f32.mrb[96].mxu1 }
 0x1cc   : > { %2959 = vst.msk [vmem:[#allocation2 + $0x38] sm:$0xff] %vm1003_vm6, %v2927_v17  ;;  %v2658_v34 = vadd.f32 %v4794_v1, %v2626_v28  ;;  %v2545_v15 = vpop.f32.mrb[97].mxu1 }
 0x1cd   : > { %2957 = vst.msk [vmem:[#allocation2 + $0x28] sm:$0xff] %vm1003_vm6, %v2925_v11  ;;  %v2902_v32 = vld [vmem:[#allocation2 + $0x70] sm:$0xff]  ;;  %v2656_v31 = vadd.f32 %v2624_v20, %v2545_v15  ;;  %v4795_v57 = vpop.f32.mrb[98].mxu1 }
 0x1ce   : > { %2690 = vst.msk [vmem:[#allocation2 + $0x90] sm:$0xff] %vm1003_vm6, %v2658_v34  ;;  %v2900_v10 = vld [vmem:[#allocation2 + $0x60] sm:$0xff]  ;;  %v2659_v55 = vadd.f32 %v4795_v57, %v2627_v43  ;;  %v2548_v37 = vpop.f32.mrb[99].mxu1  ;;  %v2638_v57 = vld [vmem:[#allocation2 + $0xf0] sm:$0xff] }
 0x1cf   : > { %v4820_v7 = vpop.f32.mrb[88].mxu0  ;;  %2688 = vst.msk [vmem:[#allocation2 + $0x80] sm:$0xff] %vm1003_vm6, %v2656_v31  ;;  %v2903_v40 = vld [vmem:[#allocation2 + $0x78] sm:$0xff]  ;;  %v2657_v22 = vadd.f32 %v2625_v9, %v2548_v37 }
 0x1d0   : > { %v2793_v25 = vpop.f32.mrb[89].mxu0  ;;  %v2930_v41 = vadd.f32 %v4820_v7, %v2898_v16  ;;  %2691 = vst.msk [vmem:[#allocation2 + $0x98] sm:$0xff] %vm1003_vm6, %v2659_v55  ;;  %v2901_v30 = vld [vmem:[#allocation2 + $0x68] sm:$0xff]  ;;  %v2636_v55 = vld [vmem:[#allocation2 + $0xe0] sm:$0xff] }
 0x1d1   : > { %v4821_v62 = vpop.f32.mrb[90].mxu0  ;;  %v2928_v13 = vadd.f32 %v2896_v19, %v2793_v25  ;;  %2689 = vst.msk [vmem:[#allocation2 + $0x88] sm:$0xff] %vm1003_vm6, %v2657_v22  ;;  %v2629_v25 = vld [vmem:[#allocation2 + $0xa8] sm:$0xff]  ;;  %v2639_v22 = vld [vmem:[#allocation2 + $0xf8] sm:$0xff] }
 0x1d2   : > { %v2796_v23 = vpop.f32.mrb[91].mxu0  ;;  %2962 = vst.msk [vmem:[#allocation2 + $0x50] sm:$0xff] %vm1003_vm6, %v2930_v41  ;;  %v2931_v47 = vadd.f32 %v4821_v62, %v2899_v5 }
 0x1d3   : > { %2960 = vst.msk [vmem:[#allocation2 + $0x40] sm:$0xff] %vm1003_vm6, %v2928_v13  ;;  %v2929_v29 = vadd.f32 %v2897_v53, %v2796_v23  ;;  %v4798_v12 = vpop.f32.mrb[100].mxu1 }
 0x1d4   : > { %2963 = vst.msk [vmem:[#allocation2 + $0x58] sm:$0xff] %vm1003_vm6, %v2931_v47  ;;  %v2662_v38 = vadd.f32 %v4798_v12, %v2630_v39  ;;  %v2561_v27 = vpop.f32.mrb[101].mxu1 }
 0x1d5   : > { %2961 = vst.msk [vmem:[#allocation2 + $0x48] sm:$0xff] %vm1003_vm6, %v2929_v29  ;;  %v2906_v4 = vld [vmem:[#allocation2 + $0x90] sm:$0xff]  ;;  %v2660_v14 = vadd.f32 %v2628_v58, %v2561_v27  ;;  %v4799_v8 = vpop.f32.mrb[102].mxu1 }
 0x1d6   : > { %2694 = vst.msk [vmem:[#allocation2 + $0xb0] sm:$0xff] %vm1003_vm6, %v2662_v38  ;;  %v2904_v35 = vld [vmem:[#allocation2 + $0x80] sm:$0xff]  ;;  %v2663_v11 = vadd.f32 %v4799_v8, %v2631_v2  ;;  %v2564_v7 = vpop.f32.mrb[103].mxu1  ;;  %v3170_v8 = vld [vmem:[#allocation2 + $0x10] sm:$0xff] }
 0x1d7   : > { %v4824_v6 = vpop.f32.mrb[92].mxu0  ;;  %2692 = vst.msk [vmem:[#allocation2 + $0xa0] sm:$0xff] %vm1003_vm6, %v2660_v14  ;;  %v2907_v51 = vld [vmem:[#allocation2 + $0x98] sm:$0xff]  ;;  %v2661_v62 = vadd.f32 %v2629_v25, %v2564_v7 }
 0x1d8   : > { %v2809_v0 = vpop.f32.mrb[93].mxu0  ;;  %v2934_v56 = vadd.f32 %v4824_v6, %v2902_v32  ;;  %2695 = vst.msk [vmem:[#allocation2 + $0xb8] sm:$0xff] %vm1003_vm6, %v2663_v11  ;;  %v2905_v50 = vld [vmem:[#allocation2 + $0x88] sm:$0xff]  ;;  %v3168_v11 = vld [vmem:[#allocation2] sm:$0xff] }
 0x1d9   : > { %v4825_v46 = vpop.f32.mrb[94].mxu0  ;;  %v2932_v18 = vadd.f32 %v2900_v10, %v2809_v0  ;;  %2693 = vst.msk [vmem:[#allocation2 + $0xa8] sm:$0xff] %vm1003_vm6, %v2661_v62  ;;  %v2633_v0 = vld [vmem:[#allocation2 + $0xc8] sm:$0xff]  ;;  %v3171_v62 = vld [vmem:[#allocation2 + $0x18] sm:$0xff] }
 0x1da   : > { %v2812_v52 = vpop.f32.mrb[95].mxu0  ;;  %2966 = vst.msk [vmem:[#allocation2 + $0x70] sm:$0xff] %vm1003_vm6, %v2934_v56  ;;  %v2935_v33 = vadd.f32 %v4825_v46, %v2903_v40 }
 0x1db   : > { %2964 = vst.msk [vmem:[#allocation2 + $0x60] sm:$0xff] %vm1003_vm6, %v2932_v18  ;;  %v2933_v26 = vadd.f32 %v2901_v30, %v2812_v52  ;;  %v4802_v48 = vpop.f32.mrb[104].mxu1 }
 0x1dc   : > { %2967 = vst.msk [vmem:[#allocation2 + $0x78] sm:$0xff] %vm1003_vm6, %v2935_v33  ;;  %v2666_v41 = vadd.f32 %v4802_v48, %v2634_v42  ;;  %v2577_v19 = vpop.f32.mrb[105].mxu1 }
 0x1dd   : > { %2965 = vst.msk [vmem:[#allocation2 + $0x68] sm:$0xff] %vm1003_vm6, %v2933_v26  ;;  %v2910_v61 = vld [vmem:[#allocation2 + $0xb0] sm:$0xff]  ;;  %v2664_v13 = vadd.f32 %v2632_v59, %v2577_v19  ;;  %v4803_v5 = vpop.f32.mrb[106].mxu1 }
 0x1de   : > { %2698 = vst.msk [vmem:[#allocation2 + $0xd0] sm:$0xff] %vm1003_vm6, %v2666_v41  ;;  %v2908_v53 = vld [vmem:[#allocation2 + $0xa0] sm:$0xff]  ;;  %v2667_v29 = vadd.f32 %v4803_v5, %v2635_v60  ;;  %v2580_v6 = vpop.f32.mrb[107].mxu1  ;;  %v3174_v5 = vld [vmem:[#allocation2 + $0x30] sm:$0xff] }
 0x1df   : > { %v4828_v54 = vpop.f32.mrb[96].mxu0  ;;  %2696 = vst.msk [vmem:[#allocation2 + $0xc0] sm:$0xff] %vm1003_vm6, %v2664_v13  ;;  %v2911_v28 = vld [vmem:[#allocation2 + $0xb8] sm:$0xff]  ;;  %v2665_v46 = vadd.f32 %v2633_v0, %v2580_v6 }
 0x1e0   : > { %v2825_v24 = vpop.f32.mrb[97].mxu0  ;;  %v2938_v17 = vadd.f32 %v4828_v54, %v2906_v4  ;;  %2699 = vst.msk [vmem:[#allocation2 + $0xd8] sm:$0xff] %vm1003_vm6, %v2667_v29  ;;  %v2909_v15 = vld [vmem:[#allocation2 + $0xa8] sm:$0xff]  ;;  %v3172_v29 = vld [vmem:[#allocation2 + $0x20] sm:$0xff] }
 0x1e1   : > { %v4829_v49 = vpop.f32.mrb[98].mxu0  ;;  %v2936_v36 = vadd.f32 %v2904_v35, %v2825_v24  ;;  %2697 = vst.msk [vmem:[#allocation2 + $0xc8] sm:$0xff] %vm1003_vm6, %v2665_v46  ;;  %v2637_v24 = vld [vmem:[#allocation2 + $0xe8] sm:$0xff]  ;;  %v3175_v46 = vld [vmem:[#allocation2 + $0x38] sm:$0xff] }
 0x1e2   : > { %v2828_v63 = vpop.f32.mrb[99].mxu0  ;;  %2970 = vst.msk [vmem:[#allocation2 + $0x90] sm:$0xff] %vm1003_vm6, %v2938_v17  ;;  %v2939_v45 = vadd.f32 %v4829_v49, %v2907_v51 }
 0x1e3   : > { %2968 = vst.msk [vmem:[#allocation2 + $0x80] sm:$0xff] %vm1003_vm6, %v2936_v36  ;;  %v2937_v3 = vadd.f32 %v2905_v50, %v2828_v63  ;;  %v4806_v31 = vpop.f32.mrb[108].mxu1 }
 0x1e4   : > { %2971 = vst.msk [vmem:[#allocation2 + $0x98] sm:$0xff] %vm1003_vm6, %v2939_v45  ;;  %v2670_v56 = vadd.f32 %v4806_v31, %v2638_v57  ;;  %v2593_v10 = vpop.f32.mrb[109].mxu1 }
 0x1e5   : > { %2969 = vst.msk [vmem:[#allocation2 + $0x88] sm:$0xff] %vm1003_vm6, %v2937_v3  ;;  %v2914_v9 = vld [vmem:[#allocation2 + $0xd0] sm:$0xff]  ;;  %v2668_v18 = vadd.f32 %v2636_v55, %v2593_v10  ;;  %v4807_v40 = vpop.f32.mrb[110].mxu1 }
 0x1e6   : > { %2702 = vst.msk [vmem:[#allocation2 + $0xf0] sm:$0xff] %vm1003_vm6, %v2670_v56  ;;  %v2912_v30 = vld [vmem:[#allocation2 + $0xc0] sm:$0xff]  ;;  %v2671_v26 = vadd.f32 %v4807_v40, %v2639_v22  ;;  %v2596_v54 = vpop.f32.mrb[111].mxu1  ;;  %v3178_v40 = vld [vmem:[#allocation2 + $0x50] sm:$0xff] }
 0x1e7   : > { %v4832_v23 = vpop.f32.mrb[100].mxu0  ;;  %2700 = vst.msk [vmem:[#allocation2 + $0xe0] sm:$0xff] %vm1003_vm6, %v2668_v18  ;;  %v2915_v39 = vld [vmem:[#allocation2 + $0xd8] sm:$0xff]  ;;  %v2669_v49 = vadd.f32 %v2637_v24, %v2596_v54  ;;  %v6591_v24 = vld [vmem:[%s6965_s4] ss:$0 sm:$0xff] }
 0x1e8   : > { %v2841_v16 = vpop.f32.mrb[101].mxu0  ;;  %v2942_v47 = vadd.f32 %v4832_v23, %v2910_v61  ;;  %2703 = vst.msk [vmem:[#allocation2 + $0xf8] sm:$0xff] %vm1003_vm6, %v2671_v26  ;;  %v2913_v27 = vld [vmem:[#allocation2 + $0xc8] sm:$0xff]  ;;  %v3176_v26 = vld [vmem:[#allocation2 + $0x40] sm:$0xff] }
 0x1e9   : > { %v4833_v21 = vpop.f32.mrb[102].mxu0  ;;  %v2940_v1 = vadd.f32 %v2908_v53, %v2841_v16  ;;  %2701 = vst.msk [vmem:[#allocation2 + $0xe8] sm:$0xff] %vm1003_vm6, %v2669_v49  ;;  %v3169_v16 = vld [vmem:[#allocation2 + $0x8] sm:$0xff] }
 0x1ea   : > { %v2844_v44 = vpop.f32.mrb[103].mxu0  ;;  %2974 = vst.msk [vmem:[#allocation2 + $0xb0] sm:$0xff] %vm1003_vm6, %v2942_v47  ;;  %v2943_v34 = vadd.f32 %v4833_v21, %v2911_v28 }
 0x1eb   : > { %2972 = vst.msk [vmem:[#allocation2 + $0xa0] sm:$0xff] %vm1003_vm6, %v2940_v1  ;;  %v2941_v20 = vadd.f32 %v2909_v15, %v2844_v44  ;;  %v4846_v14 = vpop.f32.mrb[112].mxu1 }
 0x1ec   : > { %2975 = vst.msk [vmem:[#allocation2 + $0xb8] sm:$0xff] %vm1003_vm6, %v2943_v34  ;;  %v3202_v17 = vadd.f32 %v4846_v14, %v3170_v8  ;;  %v3041_v35 = vpop.f32.mrb[113].mxu1  ;;  %v3177_v14 = vld [vmem:[#allocation2 + $0x48] sm:$0xff] }
 0x1ed   : > { %2973 = vst.msk [vmem:[#allocation2 + $0xa8] sm:$0xff] %vm1003_vm6, %v2941_v20  ;;  %v2918_v25 = vld [vmem:[#allocation2 + $0xf0] sm:$0xff]  ;;  %v3200_v36 = vadd.f32 %v3168_v11, %v3041_v35  ;;  %v4847_v51 = vpop.f32.mrb[114].mxu1 }
 0x1ee   : > { %v2916_v50 = vld [vmem:[#allocation2 + $0xe0] sm:$0xff]  ;;  %3234 = vst.msk [vmem:[#allocation2 + $0x10] sm:$0xff] %vm1003_vm6, %v3202_v17  ;;  %v3203_v3 = vadd.f32 %v4847_v51, %v3171_v62  ;;  %v3044_v23 = vpop.f32.mrb[115].mxu1 }
 0x1ef   : > { %v4836_v52 = vpop.f32.mrb[104].mxu0  ;;  %v2919_v42 = vld [vmem:[#allocation2 + $0xf8] sm:$0xff]  ;;  %3232 = vst.msk [vmem:[#allocation2] sm:$0xff] %vm1003_vm6, %v3200_v36  ;;  %v3201_v21 = vadd.f32 %v3169_v16, %v3044_v23 }
 0x1f0   : > { %v2857_v32 = vpop.f32.mrb[105].mxu0  ;;  %v2946_v33 = vadd.f32 %v4836_v52, %v2914_v9  ;;  %v2917_v19 = vld [vmem:[#allocation2 + $0xe8] sm:$0xff]  ;;  %3235 = vst.msk [vmem:[#allocation2 + $0x18] sm:$0xff] %vm1003_vm6, %v3203_v3 }
 0x1f1   : > { %v4837_v43 = vpop.f32.mrb[106].mxu0  ;;  %v2944_v12 = vadd.f32 %v2912_v30, %v2857_v32  ;;  %3233 = vst.msk [vmem:[#allocation2 + $0x8] sm:$0xff] %vm1003_vm6, %v3201_v21  ;;  %v3173_v32 = vld [vmem:[#allocation2 + $0x28] sm:$0xff] }
 0x1f2   : > { %v2860_v37 = vpop.f32.mrb[107].mxu0  ;;  %2978 = vst.msk [vmem:[#allocation2 + $0xd0] sm:$0xff] %vm1003_vm6, %v2946_v33  ;;  %v2947_v38 = vadd.f32 %v4837_v43, %v2915_v39 }
 0x1f3   : > { %2976 = vst.msk [vmem:[#allocation2 + $0xc0] sm:$0xff] %vm1003_vm6, %v2944_v12  ;;  %v2945_v58 = vadd.f32 %v2913_v27, %v2860_v37  ;;  %v4850_v13 = vpop.f32.mrb[116].mxu1 }
 0x1f4   : > { %2979 = vst.msk [vmem:[#allocation2 + $0xd8] sm:$0xff] %vm1003_vm6, %v2947_v38  ;;  %v3206_v47 = vadd.f32 %v4850_v13, %v3174_v5  ;;  %v3057_v53 = vpop.f32.mrb[117].mxu1  ;;  %v3179_v38 = vld [vmem:[#allocation2 + $0x58] sm:$0xff]  ;;  %v3180_v5 = vld [vmem:[#allocation2 + $0x60] sm:$0xff] }
 0x1f5   : > { %2977 = vst.msk [vmem:[#allocation2 + $0xc8] sm:$0xff] %vm1003_vm6, %v2945_v58  ;;  %v3448_v0 = vld [vmem:[#allocation2 + $0x10] sm:$0xff]  ;;  %v3204_v1 = vadd.f32 %v3172_v29, %v3057_v53  ;;  %v4851_v28 = vpop.f32.mrb[118].mxu1 }
 0x1f6   : > { %3238 = vst.msk [vmem:[#allocation2 + $0x30] sm:$0xff] %vm1003_vm6, %v3206_v47  ;;  %v3446_v15 = vld [vmem:[#allocation2] sm:$0xff]  ;;  %v3207_v20 = vadd.f32 %v4851_v28, %v3175_v46  ;;  %v3060_v52 = vpop.f32.mrb[119].mxu1 }
 0x1f7   : > { %v4840_v63 = vpop.f32.mrb[108].mxu0  ;;  %3236 = vst.msk [vmem:[#allocation2 + $0x20] sm:$0xff] %vm1003_vm6, %v3204_v1  ;;  %v3449_v57 = vld [vmem:[#allocation2 + $0x18] sm:$0xff]  ;;  %v3205_v43 = vadd.f32 %v3173_v32, %v3060_v52 }
 0x1f8   : > { %v2873_v4 = vpop.f32.mrb[109].mxu0  ;;  %v2950_v45 = vadd.f32 %v4840_v63, %v2918_v25  ;;  %3239 = vst.msk [vmem:[#allocation2 + $0x38] sm:$0xff] %vm1003_vm6, %v3207_v20  ;;  %v3447_v10 = vld [vmem:[#allocation2 + $0x8] sm:$0xff] }
 0x1f9   : > { %v4841_v2 = vpop.f32.mrb[110].mxu0  ;;  %v2948_v48 = vadd.f32 %v2916_v50, %v2873_v4  ;;  %3237 = vst.msk [vmem:[#allocation2 + $0x28] sm:$0xff] %vm1003_vm6, %v3205_v43 }
 0x1fa   : > { %v2876_v7 = vpop.f32.mrb[111].mxu0  ;;  %2982 = vst.msk [vmem:[#allocation2 + $0xf0] sm:$0xff] %vm1003_vm6, %v2950_v45  ;;  %v2951_v41 = vadd.f32 %v4841_v2, %v2919_v42 }
 0x1fb   : > { %2980 = vst.msk [vmem:[#allocation2 + $0xe0] sm:$0xff] %vm1003_vm6, %v2948_v48  ;;  %v2949_v59 = vadd.f32 %v2917_v19, %v2876_v7  ;;  %v4854_v18 = vpop.f32.mrb[120].mxu1  ;;  %v3182_v19 = vld [vmem:[#allocation2 + $0x70] sm:$0xff] }
 0x1fc   : > { %2983 = vst.msk [vmem:[#allocation2 + $0xf8] sm:$0xff] %vm1003_vm6, %v2951_v41  ;;  %v3210_v33 = vadd.f32 %v4854_v18, %v3178_v40  ;;  %v3073_v30 = vpop.f32.mrb[121].mxu1 }
 0x1fd   : > { %2981 = vst.msk [vmem:[#allocation2 + $0xe8] sm:$0xff] %vm1003_vm6, %v2949_v59  ;;  %v3452_v12 = vld [vmem:[#allocation2 + $0x30] sm:$0xff]  ;;  %v3208_v39 = vadd.f32 %v3176_v26, %v3073_v30  ;;  %v4855_v49 = vpop.f32.mrb[122].mxu1 }
 0x1fe   : > { %3242 = vst.msk [vmem:[#allocation2 + $0x50] sm:$0xff] %vm1003_vm6, %v3210_v33  ;;  %v3450_v58 = vld [vmem:[#allocation2 + $0x20] sm:$0xff]  ;;  %v3211_v63 = vadd.f32 %v4855_v49, %v3179_v38  ;;  %v3076_v4 = vpop.f32.mrb[123].mxu1 }
 0x1ff   : > { %v4880_v44 = vpop.f32.mrb[112].mxu0  ;;  %3240 = vst.msk [vmem:[#allocation2 + $0x40] sm:$0xff] %vm1003_vm6, %v3208_v39  ;;  %v3453_v17 = vld [vmem:[#allocation2 + $0x38] sm:$0xff]  ;;  %v3209_v35 = vadd.f32 %v3177_v14, %v3076_v4  ;;  %v3186_v39 = vld [vmem:[#allocation2 + $0x90] sm:$0xff] }
 0x200   : > { %v3319_v61 = vpop.f32.mrb[113].mxu0  ;;  %v3480_v34 = vadd.f32 %v4880_v44, %v3448_v0  ;;  %3243 = vst.msk [vmem:[#allocation2 + $0x58] sm:$0xff] %vm1003_vm6, %v3211_v63  ;;  %v3451_v36 = vld [vmem:[#allocation2 + $0x28] sm:$0xff]  ;;  %v3183_v0 = vld [vmem:[#allocation2 + $0x78] sm:$0xff]  ;;  %v3184_v63 = vld [vmem:[#allocation2 + $0x80] sm:$0xff] }
 0x201   : > { %v4881_v60 = vpop.f32.mrb[114].mxu0  ;;  %v3478_v31 = vadd.f32 %v3446_v15, %v3319_v61  ;;  %3241 = vst.msk [vmem:[#allocation2 + $0x48] sm:$0xff] %vm1003_vm6, %v3209_v35  ;;  %v3181_v15 = vld [vmem:[#allocation2 + $0x68] sm:$0xff]  ;;  %v3187_v35 = vld [vmem:[#allocation2 + $0x98] sm:$0xff] }
 0x202   : > { %v3322_v6 = vpop.f32.mrb[115].mxu0  ;;  %3512 = vst.msk [vmem:[#allocation2 + $0x10] sm:$0xff] %vm1003_vm6, %v3480_v34  ;;  %v3481_v56 = vadd.f32 %v4881_v60, %v3449_v57 }
 0x203   : > { %3510 = vst.msk [vmem:[#allocation2] sm:$0xff] %vm1003_vm6, %v3478_v31  ;;  %v3479_v55 = vadd.f32 %v3447_v10, %v3322_v6  ;;  %v4858_v41 = vpop.f32.mrb[124].mxu1 }
 0x204   : > { %3513 = vst.msk [vmem:[#allocation2 + $0x18] sm:$0xff] %vm1003_vm6, %v3481_v56  ;;  %v3214_v61 = vadd.f32 %v4858_v41, %v3182_v19  ;;  %v3089_v13 = vpop.f32.mrb[125].mxu1 }
 0x205   : > { %3511 = vst.msk [vmem:[#allocation2 + $0x8] sm:$0xff] %vm1003_vm6, %v3479_v55  ;;  %v3456_v53 = vld [vmem:[#allocation2 + $0x50] sm:$0xff]  ;;  %v3212_v29 = vadd.f32 %v3180_v5, %v3089_v13  ;;  %v4859_v6 = vpop.f32.mrb[126].mxu1 }
 0x206   : > { %3246 = vst.msk [vmem:[#allocation2 + $0x70] sm:$0xff] %vm1003_vm6, %v3214_v61  ;;  %v3454_v28 = vld [vmem:[#allocation2 + $0x40] sm:$0xff]  ;;  %v3215_v46 = vadd.f32 %v4859_v6, %v3183_v0  ;;  %v3092_v34 = vpop.f32.mrb[127].mxu1 }
 0x207   : > { %v4884_v37 = vpop.f32.mrb[116].mxu0  ;;  %3244 = vst.msk [vmem:[#allocation2 + $0x60] sm:$0xff] %vm1003_vm6, %v3212_v29  ;;  %v3457_v32 = vld [vmem:[#allocation2 + $0x58] sm:$0xff]  ;;  %v3213_v31 = vadd.f32 %v3181_v15, %v3092_v34 }
 0x208   : > { %v3335_v9 = vpop.f32.mrb[117].mxu0  ;;  %v3484_v27 = vadd.f32 %v4884_v37, %v3452_v12  ;;  %3247 = vst.msk [vmem:[#allocation2 + $0x78] sm:$0xff] %vm1003_vm6, %v3215_v46  ;;  %v3455_v10 = vld [vmem:[#allocation2 + $0x48] sm:$0xff] }
 0x209   : > { %v4885_v22 = vpop.f32.mrb[118].mxu0  ;;  %v3544_v8 = vld [vmem:[#allocation2 + $0x10] sm:$0xff]  ;;  %v3482_v2 = vadd.f32 %v3450_v58, %v3335_v9  ;;  %3245 = vst.msk [vmem:[#allocation2 + $0x68] sm:$0xff] %vm1003_vm6, %v3213_v31 }
 0x20a   : > { %v3338_v54 = vpop.f32.mrb[119].mxu0  ;;  %v6596_v11 = vadd.f32 %v6591_v24, %v3544_v8  ;;  %v3542_v7 = vld [vmem:[#allocation2] sm:$0xff]  ;;  %3516 = vst.msk [vmem:[#allocation2 + $0x30] sm:$0xff] %vm1003_vm6, %v3484_v27  ;;  %v3485_v25 = vadd.f32 %v4885_v22, %v3453_v17 }
 0x20b   : > { %v6601_v51 = vadd.f32 %v6591_v24, %v3542_v7  ;;  %v3545_v62 = vld [vmem:[#allocation2 + $0x18] sm:$0xff]  ;;  %3514 = vst.msk [vmem:[#allocation2 + $0x20] sm:$0xff] %vm1003_vm6, %v3482_v2  ;;  %v3483_v45 = vadd.f32 %v3451_v36, %v3338_v54  ;;  %v4862_v12 = vpop.f32.mrb[128].mxu1 }
 0x20c   : > { %v4348_v3 = vmul.f32 -1.442695, %v6596_v11  ;;  %v6607_v23 = vadd.f32 %v6591_v24, %v3545_v62  ;;  %v3543_v16 = vld [vmem:[#allocation2 + $0x8] sm:$0xff]  ;;  %3517 = vst.msk [vmem:[#allocation2 + $0x38] sm:$0xff] %vm1003_vm6, %v3485_v25  ;;  %v3218_v27 = vadd.f32 %v4862_v12, %v3186_v39  ;;  %v3105_v58 = vpop.f32.mrb[129].mxu1  ;;  %v3191_v39 = vld [vmem:[#allocation2 + $0xb8] sm:$0xff] }
 0x20d   : > { %v4346_v42 = vmul.f32 -1.442695, %v6601_v51  ;;  %v6612_v21 = vadd.f32 %v6591_v24, %v3543_v16  ;;  %3515 = vst.msk [vmem:[#allocation2 + $0x28] sm:$0xff] %vm1003_vm6, %v3483_v45  ;;  %v3460_v8 = vld [vmem:[#allocation2 + $0x70] sm:$0xff]  ;;  %v3216_v2 = vadd.f32 %v3184_v63, %v3105_v58  ;;  %v4863_v17 = vpop.f32.mrb[130].mxu1 }
 0x20e   : > { %5012 = vpow2.f32 %v4348_v3  ;;  %v4349_v44 = vmul.f32 -1.442695, %v6607_v23  ;;  %3250 = vst.msk [vmem:[#allocation2 + $0x90] sm:$0xff] %vm1003_vm6, %v3218_v27  ;;  %v3458_v36 = vld [vmem:[#allocation2 + $0x60] sm:$0xff]  ;;  %v3219_v62 = vadd.f32 %v4863_v17, %v3187_v35  ;;  %v3108_v45 = vpop.f32.mrb[131].mxu1 }
 0x20f   : > { %v4888_v50 = vpop.f32.mrb[120].mxu0  ;;  %5014 = vpow2.f32 %v4346_v42  ;;  %v4347_v47 = vmul.f32 -1.442695, %v6612_v21  ;;  %3248 = vst.msk [vmem:[#allocation2 + $0x80] sm:$0xff] %vm1003_vm6, %v3216_v2  ;;  %v3461_v41 = vld [vmem:[#allocation2 + $0x78] sm:$0xff] }
 0x210   : > { %v3351_v48 = vpop.f32.mrb[121].mxu0  ;;  %5016 = vpow2.f32 %v4349_v44  ;;  %v3488_v1 = vadd.f32 %v4888_v50, %v3456_v53  ;;  %v3185_v50 = vld [vmem:[#allocation2 + $0x88] sm:$0xff]  ;;  %3251 = vst.msk [vmem:[#allocation2 + $0x98] sm:$0xff] %vm1003_vm6, %v3219_v62 }
 0x211   : > { %v4889_v59 = vpop.f32.mrb[122].mxu0  ;;  %5018 = vpow2.f32 %v4347_v47  ;;  %v3548_v20 = vld [vmem:[#allocation2 + $0x30] sm:$0xff]  ;;  %v3486_v52 = vadd.f32 %v3454_v28, %v3351_v48  ;;  %v3217_v19 = vadd.f32 %v3185_v50, %v3108_v45 }
 0x212   : > { %v3354_v60 = vpop.f32.mrb[123].mxu0  ;;  %v6620_v57 = vadd.f32 %v6591_v24, %v3548_v20  ;;  %v3546_v43 = vld [vmem:[#allocation2 + $0x20] sm:$0xff]  ;;  %3520 = vst.msk [vmem:[#allocation2 + $0x50] sm:$0xff] %vm1003_vm6, %v3488_v1  ;;  %v3489_v56 = vadd.f32 %v4889_v59, %v3457_v32 }
 0x213   : > { %v6625_v55 = vadd.f32 %v6591_v24, %v3546_v43  ;;  %v3549_v37 = vld [vmem:[#allocation2 + $0x38] sm:$0xff]  ;;  %3518 = vst.msk [vmem:[#allocation2 + $0x40] sm:$0xff] %vm1003_vm6, %v3486_v52  ;;  %v3487_v9 = vadd.f32 %v3455_v10, %v3354_v60  ;;  %v3459_v60 = vld [vmem:[#allocation2 + $0x68] sm:$0xff]  ;;  %3249 = vst.msk [vmem:[#allocation2 + $0x88] sm:$0xff] %vm1003_vm6, %v3217_v19  ;;  %v4866_v31 = vpop.f32.mrb[132].mxu1 }
 0x214   : > { %v4352_v40 = vmul.f32 -1.442695, %v6620_v57  ;;  %v6631_v22 = vadd.f32 %v6591_v24, %v3549_v37  ;;  %v3547_v33 = vld [vmem:[#allocation2 + $0x28] sm:$0xff]  ;;  %3521 = vst.msk [vmem:[#allocation2 + $0x58] sm:$0xff] %vm1003_vm6, %v3489_v56  ;;  %v3190_v43 = vld [vmem:[#allocation2 + $0xb0] sm:$0xff] }
 0x215   : > { %v4350_v26 = vmul.f32 -1.442695, %v6625_v55  ;;  %v6636_v54 = vadd.f32 %v6591_v24, %v3547_v33  ;;  %3519 = vst.msk [vmem:[#allocation2 + $0x48] sm:$0xff] %vm1003_vm6, %v3487_v9  ;;  %v3222_v37 = vadd.f32 %v4866_v31, %v3190_v43  ;;  %v3121_v9 = vpop.f32.mrb[133].mxu1 }
 0x216   : > { %5020 = vpow2.f32 %v4352_v40  ;;  %v4353_v38 = vmul.f32 -1.442695, %v6631_v22  ;;  %v4867_v12 = vpop.f32.mrb[134].mxu1  ;;  %v3462_v27 = vld [vmem:[#allocation2 + $0x80] sm:$0xff] }
 0x217   : > { %v4892_v18 = vpop.f32.mrb[124].mxu0  ;;  %5022 = vpow2.f32 %v4350_v26  ;;  %v4351_v14 = vmul.f32 -1.442695, %v6636_v54  ;;  %3254 = vst.msk [vmem:[#allocation2 + $0xb0] sm:$0xff] %vm1003_vm6, %v3222_v37  ;;  %v3223_v58 = vadd.f32 %v4867_v12, %v3191_v39  ;;  %v3124_v63 = vpop.f32.mrb[135].mxu1  ;;  %v3465_v35 = vld [vmem:[#allocation2 + $0x98] sm:$0xff] }
 0x218   : > { %v3367_v30 = vpop.f32.mrb[125].mxu0  ;;  %v5013_v7 = vpop.eup %5012  ;;  %5024 = vpow2.f32 %v4353_v38  ;;  %v3492_v25 = vadd.f32 %v4892_v18, %v3460_v8  ;;  %v3188_v18 = vld [vmem:[#allocation2 + $0xa0] sm:$0xff] }
 0x219   : > { %v4893_v49 = vpop.f32.mrb[126].mxu0  ;;  %v5015_v3 = vpop.eup %5014  ;;  %v3711_v16 = vadd.f32 1.0, %v5013_v7  ;;  %5026 = vpow2.f32 %v4351_v14  ;;  %v3552_v48 = vld [vmem:[#allocation2 + $0x50] sm:$0xff]  ;;  %v3490_v42 = vadd.f32 %v3458_v36, %v3367_v30  ;;  %v3220_v26 = vadd.f32 %v3188_v18, %v3121_v9  ;;  %3255 = vst.msk [vmem:[#allocation2 + $0xb8] sm:$0xff] %vm1003_vm6, %v3223_v58 }
 0x21a   : > { %v3370_v4 = vpop.f32.mrb[127].mxu0  ;;  %v5017_v59 = vpop.eup %5016  ;;  %v3709_v44 = vadd.f32 1.0, %v5015_v3  ;;  %v6644_v61 = vadd.f32 %v6591_v24, %v3552_v48  ;;  %v3550_v13 = vld [vmem:[#allocation2 + $0x40] sm:$0xff]  ;;  %3524 = vst.msk [vmem:[#allocation2 + $0x70] sm:$0xff] %vm1003_vm6, %v3492_v25  ;;  %v3493_v5 = vadd.f32 %v4893_v49, %v3461_v41  ;;  %v3464_v30 = vld [vmem:[#allocation2 + $0x90] sm:$0xff]  ;;  %v3463_v3 = vld [vmem:[#allocation2 + $0x88] sm:$0xff] }
 0x21b   : > { %v5019_v47 = vpop.eup %5018  ;;  %5028 = vrcp.f32 %v3711_v16  ;;  %v3712_v53 = vadd.f32 1.0, %v5017_v59  ;;  %v6649_v29 = vadd.f32 %v6591_v24, %v3550_v13  ;;  %v3553_v6 = vld [vmem:[#allocation2 + $0x58] sm:$0xff]  ;;  %3522 = vst.msk [vmem:[#allocation2 + $0x60] sm:$0xff] %vm1003_vm6, %v3490_v42  ;;  %v3491_v0 = vadd.f32 %v3459_v60, %v3370_v4  ;;  %v3189_v4 = vld [vmem:[#allocation2 + $0xa8] sm:$0xff]  ;;  %3252 = vst.msk [vmem:[#allocation2 + $0xa0] sm:$0xff] %vm1003_vm6, %v3220_v26 }
 0x21c   : > { %5030 = vrcp.f32 %v3709_v44  ;;  %v3710_v28 = vadd.f32 1.0, %v5019_v47  ;;  %v4356_v46 = vmul.f32 -1.442695, %v6644_v61  ;;  %v6655_v34 = vadd.f32 %v6591_v24, %v3553_v6  ;;  %v3551_v15 = vld [vmem:[#allocation2 + $0x48] sm:$0xff]  ;;  %3525 = vst.msk [vmem:[#allocation2 + $0x78] sm:$0xff] %vm1003_vm6, %v3493_v5 }
 0x21d   : > { %5032 = vrcp.f32 %v3712_v53  ;;  %v4354_v52 = vmul.f32 -1.442695, %v6649_v29  ;;  %v6660_v32 = vadd.f32 %v6591_v24, %v3551_v15  ;;  %3523 = vst.msk [vmem:[#allocation2 + $0x68] sm:$0xff] %vm1003_vm6, %v3491_v0  ;;  %v3221_v7 = vadd.f32 %v3189_v4, %v3124_v63 }
 0x21e   : > { %5034 = vrcp.f32 %v3710_v28  ;;  %v4357_v10 = vmul.f32 -1.442695, %v6655_v34  ;;  %v3194_v28 = vld [vmem:[#allocation2 + $0xd0] sm:$0xff] }
 0x21f   : > { %v4896_v1 = vpop.f32.mrb[128].mxu0  ;;  %5036 = vpow2.f32 %v4356_v46  ;;  %v4355_v33 = vmul.f32 -1.442695, %v6660_v32  ;;  %3253 = vst.msk [vmem:[#allocation2 + $0xa8] sm:$0xff] %vm1003_vm6, %v3221_v7 }
 0x220   : > { %v3383_v20 = vpop.f32.mrb[129].mxu0  ;;  %v5021_v49 = vpop.eup %5020  ;;  %5038 = vpow2.f32 %v4354_v52  ;;  %v3496_v38 = vadd.f32 %v4896_v1, %v3464_v30 }
 0x221   : > { %v4897_v56 = vpop.f32.mrb[130].mxu0  ;;  %v5023_v14 = vpop.eup %5022  ;;  %v3715_v8 = vadd.f32 1.0, %v5021_v49  ;;  %5040 = vpow2.f32 %v4357_v10  ;;  %v3556_v2 = vld [vmem:[#allocation2 + $0x70] sm:$0xff]  ;;  %v3494_v17 = vadd.f32 %v3462_v27, %v3383_v20 }
 0x222   : > { %v3386_v40 = vpop.f32.mrb[131].mxu0  ;;  %v5025_v25 = vpop.eup %5024  ;;  %v3713_v36 = vadd.f32 1.0, %v5023_v14  ;;  %5042 = vpow2.f32 %v4355_v33  ;;  %v6669_v62 = vadd.f32 %v6591_v24, %v3556_v2  ;;  %v3554_v45 = vld [vmem:[#allocation2 + $0x60] sm:$0xff]  ;;  %3528 = vst.msk [vmem:[#allocation2 + $0x90] sm:$0xff] %vm1003_vm6, %v3496_v38  ;;  %v3497_v50 = vadd.f32 %v4897_v56, %v3465_v35  ;;  %v3469_v14 = vld [vmem:[#allocation2 + $0xb8] sm:$0xff] }
 0x223   : > { %v5027_v16 = vpop.eup %5026  ;;  %5044 = vrcp.f32 %v3715_v8  ;;  %v3716_v48 = vadd.f32 1.0, %v5025_v25  ;;  %v6674_v42 = vadd.f32 %v6591_v24, %v3554_v45  ;;  %v3557_v41 = vld [vmem:[#allocation2 + $0x78] sm:$0xff]  ;;  %3526 = vst.msk [vmem:[#allocation2 + $0x80] sm:$0xff] %vm1003_vm6, %v3494_v17  ;;  %v3495_v19 = vadd.f32 %v3463_v3, %v3386_v40  ;;  %v4870_v1 = vpop.f32.mrb[136].mxu1  ;;  %v3192_v56 = vld [vmem:[#allocation2 + $0xc0] sm:$0xff]  ;;  %v3468_v40 = vld [vmem:[#allocation2 + $0xb0] sm:$0xff] }
 0x224   : > { %5046 = vrcp.f32 %v3713_v36  ;;  %v3714_v44 = vadd.f32 1.0, %v5027_v16  ;;  %v4360_v13 = vmul.f32 -1.442695, %v6669_v62  ;;  %v6684_v5 = vadd.f32 %v6591_v24, %v3557_v41  ;;  %v3555_v60 = vld [vmem:[#allocation2 + $0x68] sm:$0xff]  ;;  %3529 = vst.msk [vmem:[#allocation2 + $0x98] sm:$0xff] %vm1003_vm6, %v3497_v50  ;;  %v3137_v43 = vpop.f32.mrb[137].mxu1 }
 0x225   : > { %v5029_v53 = vpop.eup %5028  ;;  %5048 = vrcp.f32 %v3716_v48  ;;  %v4358_v6 = vmul.f32 -1.442695, %v6674_v42  ;;  %v6689_v0 = vadd.f32 %v6591_v24, %v3555_v60  ;;  %3527 = vst.msk [vmem:[#allocation2 + $0x88] sm:$0xff] %vm1003_vm6, %v3495_v19  ;;  %v3226_v31 = vadd.f32 %v4870_v1, %v3194_v28  ;;  %v4871_v30 = vpop.f32.mrb[138].mxu1  ;;  %v3466_v49 = vld [vmem:[#allocation2 + $0xa0] sm:$0xff]  ;;  %v3195_v1 = vld [vmem:[#allocation2 + $0xd8] sm:$0xff] }
 0x226   : > { %v5031_v15 = vpop.eup %5030  ;;  %v3807_v20 = vmul.f32 %v5029_v53, %v6596_v11  ;;  %5050 = vrcp.f32 %v3714_v44  ;;  %v4361_v52 = vmul.f32 -1.442695, %v6684_v5  ;;  %v3224_v33 = vadd.f32 %v3192_v56, %v3137_v43  ;;  %v6700_v38 = vpop.f32.mrb[139].mxu1  ;;  %v3467_v44 = vld [vmem:[#allocation2 + $0xa8] sm:$0xff] }
 0x227   : > { %v4900_v59 = vpop.f32.mrb[132].mxu0  ;;  %v5033_v37 = vpop.eup %5032  ;;  %v3805_v9 = vmul.f32 %v5031_v15, %v6601_v51  ;;  %5052 = vpow2.f32 %v4360_v13  ;;  %v4359_v18 = vmul.f32 -1.442695, %v6689_v0  ;;  %3258 = vst.msk [vmem:[#allocation2 + $0xd0] sm:$0xff] %vm1003_vm6, %v3226_v31  ;;  %v3227_v31 = vadd.f32 %v4871_v30, %v3195_v1 }
 0x228   : > { %v3399_v47 = vpop.f32.mrb[133].mxu0  ;;  %v5035_v26 = vpop.eup %5034  ;;  %v4420_v12 = vpack.c.bf16 %v3807_v20, %v3807_v20  ;;  %v3808_v11 = vmul.f32 %v5033_v37, %v6607_v23  ;;  %5054 = vpow2.f32 %v4358_v6  ;;  %v3500_v39 = vadd.f32 %v4900_v59, %v3468_v40  ;;  %3256 = vst.msk [vmem:[#allocation2 + $0xc0] sm:$0xff] %vm1003_vm6, %v3224_v33  ;;  %v3193_v33 = vld [vmem:[#allocation2 + $0xc8] sm:$0xff] }
 0x229   : > { %v4901_v46 = vpop.f32.mrb[134].mxu0  ;;  %v5037_v27 = vpop.eup %5036  ;;  %v4418_v51 = vpack.c.bf16 %v3805_v9, %v3805_v9  ;;  %v3806_v58 = vmul.f32 %v5035_v26, %v6612_v21  ;;  %5056 = vpow2.f32 %v4361_v52  ;;  %v3560_v63 = vld [vmem:[#allocation2 + $0x90] sm:$0xff]  ;;  %v3498_v4 = vadd.f32 %v3466_v49, %v3399_v47  ;;  %3259 = vst.msk [vmem:[#allocation2 + $0xd8] sm:$0xff] %vm1003_vm6, %v3227_v31 }
 0x22a   : > { %v6694_v10 = vpop.f32.mrb[135].mxu0  ;;  %v5039_v8 = vpop.eup %5038  ;;  %3968 = vst.msk [vmem:[%s6705_s12 + $0x8] sm:$0xf] %vm3965_vm7, %v4420_v12  ;;  %v4421_v23 = vpack.c.bf16 %v3808_v11, %v3808_v11  ;;  %v3719_v2 = vadd.f32 1.0, %v5037_v27  ;;  %5058 = vpow2.f32 %v4359_v18  ;;  %v6710_v17 = vadd.f32 %v6591_v24, %v3560_v63  ;;  %v3558_v21 = vld [vmem:[#allocation2 + $0x80] sm:$0xff] }
 0x22b   : > { %3532 = vst.msk [vmem:[#allocation2 + $0xb0] sm:$0xff] %vm1003_vm6, %v3500_v39  ;;  %v5041_v35 = vpop.eup %5040  ;;  %v4419_v7 = vpack.c.bf16 %v3806_v58, %v3806_v58  ;;  %v3717_v25 = vadd.f32 1.0, %v5039_v8  ;;  %v6716_v36 = vadd.f32 %v6591_v24, %v3558_v21  ;;  %v3561_v45 = vld [vmem:[#allocation2 + $0x98] sm:$0xff]  ;;  %3530 = vst.msk [vmem:[#allocation2 + $0xa0] sm:$0xff] %vm1003_vm6, %v3498_v4  ;;  %v3501_v50 = vadd.f32 %v4901_v46, %v3469_v14  ;;  %v4874_v28 = vpop.f32.mrb[140].mxu1  ;;  %v3198_v21 = vld [vmem:[#allocation2 + $0xf0] sm:$0xff] }
 0x22c   : > { %3966 = vst.msk [vmem:[%s6705_s12] sm:$0xf] %vm3965_vm7, %v4418_v51  ;;  %v5043_v16 = vpop.eup %5042  ;;  %3969 = vst.msk [vmem:[%s6705_s12 + $0xc] sm:$0xf] %vm3965_vm7, %v4421_v23  ;;  %5060 = vrcp.f32 %v3719_v2  ;;  %v3720_v48 = vadd.f32 1.0, %v5041_v35  ;;  %v6723_v19 = vadd.f32 %v6591_v24, %v3561_v45  ;;  %v3559_v59 = vld [vmem:[#allocation2 + $0x88] sm:$0xff]  ;;  %v3499_v40 = vadd.f32 %v3467_v44, %v6694_v10 }
 0x22d   : > { %v4364_v41 = vmul.f32 -1.442695, %v6710_v17  ;;  %v5045_v60 = vpop.eup %5044  ;;  %3967 = vst.msk [vmem:[%s6705_s12 + $0x4] sm:$0xf] %vm3965_vm7, %v4419_v7  ;;  %5062 = vrcp.f32 %v3717_v25  ;;  %v3718_v47 = vadd.f32 1.0, %v5043_v16  ;;  %v6731_v6 = vadd.f32 %v6591_v24, %v3559_v59  ;;  %v3153_v43 = vpop.f32.mrb[141].mxu1 }
 0x22e   : > { %v4362_v53 = vmul.f32 -1.442695, %v6716_v36  ;;  %3533 = vst.msk [vmem:[#allocation2 + $0xb8] sm:$0xff] %vm1003_vm6, %v3501_v50  ;;  %v5047_v15 = vpop.eup %5046  ;;  %v3811_v20 = vmul.f32 %v5045_v60, %v6620_v57  ;;  %5064 = vrcp.f32 %v3720_v48  ;;  %v4365_v52 = vmul.f32 -1.442695, %v6723_v19  ;;  %v3472_v26 = vld [vmem:[#allocation2 + $0xd0] sm:$0xff] }
 0x22f   : > { %v4904_v3 = vpop.f32.mrb[136].mxu0  ;;  %v5049_v37 = vpop.eup %5048  ;;  %v3809_v9 = vmul.f32 %v5047_v15, %v6625_v55  ;;  %5066 = vrcp.f32 %v3718_v47  ;;  %v4363_v18 = vmul.f32 -1.442695, %v6731_v6  ;;  %v3225_v30 = vadd.f32 %v3193_v33, %v6700_v38  ;;  %3531 = vst.msk [vmem:[#allocation2 + $0xa8] sm:$0xff] %vm1003_vm6, %v3499_v40  ;;  %v3470_v35 = vld [vmem:[#allocation2 + $0xc0] sm:$0xff]  ;;  %v3199_v47 = vld [vmem:[#allocation2 + $0xf8] sm:$0xff] }
 0x230   : > { %v6725_v13 = vpop.f32.mrb[137].mxu0  ;;  %v4875_v12 = vpop.f32.mrb[142].mxu1  ;;  %v4424_v11 = vpack.c.bf16 %v3811_v20, %v3811_v20  ;;  %v3812_v39 = vmul.f32 %v5049_v37, %v6631_v22  ;;  %5068 = vpow2.f32 %v4364_v41  ;;  %v3504_v58 = vadd.f32 %v4904_v3, %v3472_v26  ;;  %v3196_v60 = vld [vmem:[#allocation2 + $0xe0] sm:$0xff]  ;;  %v3473_v40 = vld [vmem:[#allocation2 + $0xd8] sm:$0xff] }
 0x231   : > { %v6734_v46 = vpop.f32.mrb[138].mxu0  ;;  %v5051_v57 = vpop.eup %5050  ;;  %v4422_v27 = vpack.c.bf16 %v3809_v9, %v3809_v9  ;;  %5070 = vpow2.f32 %v4362_v53  ;;  %3257 = vst.msk [vmem:[#allocation2 + $0xc8] sm:$0xff] %vm1003_vm6, %v3225_v30  ;;  %v3230_v16 = vadd.f32 %v4874_v28, %v3198_v21  ;;  %v3502_v28 = vadd.f32 %v3470_v35, %v6725_v13 }
 0x232   : > { %v6738_v56 = vpop.f32.mrb[139].mxu0  ;;  %v3156_v49 = vpop.f32.mrb[143].mxu1  ;;  %v3810_v51 = vmul.f32 %v5051_v57, %v6636_v54  ;;  %v3564_v10 = vld [vmem:[#allocation2 + $0xb0] sm:$0xff]  ;;  %3972 = vst.msk [vmem:[%s6705_s12 + $0x18] sm:$0xf] %vm3965_vm7, %v4424_v11  ;;  %v4425_v22 = vpack.c.bf16 %v3812_v39, %v3812_v39  ;;  %5072 = vpow2.f32 %v4365_v52  ;;  %v3562_v14 = vld [vmem:[#allocation2 + $0xa0] sm:$0xff]  ;;  %v3228_v15 = vadd.f32 %v3196_v60, %v3153_v43 }
 0x233   : > { %v5053_v55 = vpop.eup %5052  ;;  %v6751_v38 = vadd.f32 %v6591_v24, %v3564_v10  ;;  %3970 = vst.msk [vmem:[%s6705_s12 + $0x10] sm:$0xf] %vm3965_vm7, %v4422_v27  ;;  %5074 = vpow2.f32 %v4363_v18  ;;  %v6757_v2 = vadd.f32 %v6591_v24, %v3562_v14  ;;  %v3231_v20 = vadd.f32 %v4875_v12, %v3199_v47  ;;  %v3197_v52 = vld [vmem:[#allocation2 + $0xe8] sm:$0xff] }
 0x234   : > { %v5055_v63 = vpop.eup %5054  ;;  %v3723_v4 = vadd.f32 1.0, %v5053_v55  ;;  %v4423_v54 = vpack.c.bf16 %v3810_v51, %v3810_v51  ;;  %3536 = vst.msk [vmem:[#allocation2 + $0xd0] sm:$0xff] %vm1003_vm6, %v3504_v58  ;;  %3262 = vst.msk [vmem:[#allocation2 + $0xf0] sm:$0xff] %vm1003_vm6, %v3230_v16  ;;  %v3229_v33 = vadd.f32 %v3197_v52, %v3156_v49  ;;  %v3505_v13 = vadd.f32 %v6734_v46, %v3473_v40 }
 0x235   : > { %v5057_v8 = vpop.eup %5056  ;;  %v3721_v23 = vadd.f32 1.0, %v5055_v63  ;;  %3973 = vst.msk [vmem:[%s6705_s12 + $0x1c] sm:$0xf] %vm3965_vm7, %v4425_v22  ;;  %v4368_v50 = vmul.f32 -1.442695, %v6751_v38  ;;  %v3565_v3 = vld [vmem:[#allocation2 + $0xb8] sm:$0xff] }
 0x236   : > { %v5059_v25 = vpop.eup %5058  ;;  %5076 = vrcp.f32 %v3723_v4  ;;  %v3724_v45 = vadd.f32 1.0, %v5057_v8  ;;  %3971 = vst.msk [vmem:[%s6705_s12 + $0x14] sm:$0xf] %vm3965_vm7, %v4423_v54  ;;  %v4366_v59 = vmul.f32 -1.442695, %v6757_v2  ;;  %v6771_v44 = vadd.f32 %v6591_v24, %v3565_v3  ;;  %v3563_v11 = vld [vmem:[#allocation2 + $0xa8] sm:$0xff] }
 0x237   : > { %v6760_v7 = vpop.f32.mrb[140].mxu0  ;;  %5078 = vrcp.f32 %v3721_v23  ;;  %v3722_v41 = vadd.f32 1.0, %v5059_v25  ;;  %v5061_v1 = vpop.eup %5060  ;;  %3534 = vst.msk [vmem:[#allocation2 + $0xc0] sm:$0xff] %vm1003_vm6, %v3502_v28  ;;  %3260 = vst.msk [vmem:[#allocation2 + $0xe0] sm:$0xff] %vm1003_vm6, %v3228_v15  ;;  %v6788_v39 = vadd.f32 %v6591_v24, %v3563_v11 }
 0x238   : > { %v6765_v48 = vpop.f32.mrb[141].mxu0  ;;  %5080 = vrcp.f32 %v3724_v45  ;;  %v5063_v37 = vpop.eup %5062  ;;  %v3815_v9 = vmul.f32 %v5061_v1, %v6644_v61  ;;  %v4369_v18 = vmul.f32 -1.442695, %v6771_v44  ;;  %3263 = vst.msk [vmem:[#allocation2 + $0xf8] sm:$0xff] %vm1003_vm6, %v3231_v20  ;;  %3261 = vst.msk [vmem:[#allocation2 + $0xe8] sm:$0xff] %vm1003_vm6, %v3229_v33 }
 0x239   : > { %v6773_v53 = vpop.f32.mrb[142].mxu0  ;;  %5082 = vrcp.f32 %v3722_v41  ;;  %v5065_v26 = vpop.eup %5064  ;;  %v3813_v57 = vmul.f32 %v5063_v37, %v6649_v29  ;;  %v3471_v29 = vld [vmem:[#allocation2 + $0xc8] sm:$0xff]  ;;  %3537 = vst.msk [vmem:[#allocation2 + $0xd8] sm:$0xff] %vm1003_vm6, %v3505_v13  ;;  %v4367_v14 = vmul.f32 -1.442695, %v6788_v39 }
 0x23a   : > { %v6777_v31 = vpop.f32.mrb[143].mxu0  ;;  %5084 = vpow2.f32 %v4368_v50  ;;  %v5067_v61 = vpop.eup %5066  ;;  %v4428_v43 = vpack.c.bf16 %v3815_v9, %v3815_v9  ;;  %v3816_v12 = vmul.f32 %v5065_v26, %v6655_v34  ;;  %v3503_v27 = vadd.f32 %v3471_v29, %v6738_v56 }
 0x23b   : > { %5086 = vpow2.f32 %v4366_v59  ;;  %v5069_v30 = vpop.eup %5068  ;;  %v4426_v49 = vpack.c.bf16 %v3813_v57, %v3813_v57  ;;  %v3814_v55 = vmul.f32 %v5067_v61, %v6660_v32  ;;  %v3568_v46 = vld [vmem:[#allocation2 + $0xd0] sm:$0xff] }
 0x23c   : > { %5088 = vpow2.f32 %v4369_v18  ;;  %v5071_v34 = vpop.eup %5070  ;;  %3976 = vst.msk [vmem:[%s6705_s12 + $0x28] sm:$0xf] %vm3965_vm7, %v4428_v43  ;;  %v4429_v51 = vpack.c.bf16 %v3816_v12, %v3816_v12  ;;  %v3727_v10 = vadd.f32 1.0, %v5069_v30  ;;  %v6797_v58 = vadd.f32 %v6591_v24, %v3568_v46  ;;  %v3476_v8 = vld [vmem:[#allocation2 + $0xf0] sm:$0xff] }
 0x23d   : > { %v5073_v63 = vpop.eup %5072  ;;  %3974 = vst.msk [vmem:[%s6705_s12 + $0x20] sm:$0xf] %vm3965_vm7, %v4426_v49  ;;  %v4427_v32 = vpack.c.bf16 %v3814_v55, %v3814_v55  ;;  %v3725_v22 = vadd.f32 1.0, %v5071_v34  ;;  %v3508_v35 = vadd.f32 %v6760_v7, %v3476_v8 }
 0x23e   : > { %3535 = vst.msk [vmem:[#allocation2 + $0xc8] sm:$0xff] %vm1003_vm6, %v3503_v27  ;;  %v5075_v4 = vpop.eup %5074  ;;  %5090 = vrcp.f32 %v3727_v10  ;;  %v3728_v56 = vadd.f32 1.0, %v5073_v63  ;;  %v4372_v21 = vmul.f32 -1.442695, %v6797_v58  ;;  %v3566_v50 = vld [vmem:[#allocation2 + $0xc0] sm:$0xff] }
 0x23f   : > { %3977 = vst.msk [vmem:[%s6705_s12 + $0x2c] sm:$0xf] %vm3965_vm7, %v4429_v51  ;;  %3975 = vst.msk [vmem:[%s6705_s12 + $0x24] sm:$0xf] %vm3965_vm7, %v4427_v32  ;;  %5092 = vrcp.f32 %v3725_v22  ;;  %v3726_v23 = vadd.f32 1.0, %v5075_v4  ;;  %v3474_v3 = vld [vmem:[#allocation2 + $0xe0] sm:$0xff]  ;;  %v6812_v60 = vadd.f32 %v6591_v24, %v3566_v50 }
 0x240   : > { %v5077_v54 = vpop.eup %5076  ;;  %5094 = vrcp.f32 %v3728_v56  ;;  %v3477_v16 = vld [vmem:[#allocation2 + $0xf8] sm:$0xff]  ;;  %3540 = vst.msk [vmem:[#allocation2 + $0xf0] sm:$0xff] %vm1003_vm6, %v3508_v35  ;;  %v3506_v47 = vadd.f32 %v3474_v3, %v6765_v48  ;;  %v3475_v7 = vld [vmem:[#allocation2 + $0xe8] sm:$0xff] }
 0x241   : > { %v5079_v25 = vpop.eup %5078  ;;  %v3819_v45 = vmul.f32 %v5077_v54, %v6669_v62  ;;  %5096 = vrcp.f32 %v3726_v23  ;;  %v3569_v15 = vld [vmem:[#allocation2 + $0xd8] sm:$0xff]  ;;  %v3509_v20 = vadd.f32 %v6773_v53, %v3477_v16  ;;  %v4370_v9 = vmul.f32 -1.442695, %v6812_v60 }
 0x242   : > { %v5081_v41 = vpop.eup %5080  ;;  %v3817_v59 = vmul.f32 %v5079_v25, %v6674_v42  ;;  %5098 = vpow2.f32 %v4367_v14  ;;  %3538 = vst.msk [vmem:[#allocation2 + $0xe0] sm:$0xff] %vm1003_vm6, %v3506_v47  ;;  %v6824_v40 = vadd.f32 %v6591_v24, %v3569_v15 }
 0x243   : > { %v5083_v1 = vpop.eup %5082  ;;  %v4432_v28 = vpack.c.bf16 %v3819_v45, %v3819_v45  ;;  %v3820_v62 = vmul.f32 %v5081_v41, %v6684_v5  ;;  %5100 = vpow2.f32 %v4372_v21  ;;  %3541 = vst.msk [vmem:[#allocation2 + $0xf8] sm:$0xff] %vm1003_vm6, %v3509_v20 }
 0x244   : > { %v5085_v42 = vpop.eup %5084  ;;  %v4430_v52 = vpack.c.bf16 %v3817_v59, %v3817_v59  ;;  %v3818_v37 = vmul.f32 %v5083_v1, %v6689_v0  ;;  %v3507_v0 = vadd.f32 %v3475_v7, %v6777_v31  ;;  %5102 = vpow2.f32 %v4370_v9 }
 0x245   : > { %v5087_v48 = vpop.eup %5086  ;;  %3980 = vst.msk [vmem:[%s6705_s12 + $0x38] sm:$0xf] %vm3965_vm7, %v4432_v28  ;;  %v4433_v18 = vpack.c.bf16 %v3820_v62, %v3820_v62  ;;  %v3731_v5 = vadd.f32 1.0, %v5085_v42  ;;  %v3567_v53 = vld [vmem:[#allocation2 + $0xc8] sm:$0xff]  ;;  %v4373_v61 = vmul.f32 -1.442695, %v6824_v40 }
 0x246   : > { %v5089_v33 = vpop.eup %5088  ;;  %3978 = vst.msk [vmem:[%s6705_s12 + $0x30] sm:$0xf] %vm3965_vm7, %v4430_v52  ;;  %v4431_v26 = vpack.c.bf16 %v3818_v37, %v3818_v37  ;;  %v3729_v57 = vadd.f32 1.0, %v5087_v48  ;;  %v6831_v11 = vadd.f32 %v6591_v24, %v3567_v53 }
 0x247   : > { %3981 = vst.msk [vmem:[%s6705_s12 + $0x3c] sm:$0xf] %vm3965_vm7, %v4433_v18  ;;  %5104 = vrcp.f32 %v3731_v5  ;;  %v3732_v13 = vadd.f32 1.0, %v5089_v33  ;;  %v3572_v12 = vld [vmem:[#allocation2 + $0xf0] sm:$0xff] }
 0x248   : > { %3539 = vst.msk [vmem:[#allocation2 + $0xe8] sm:$0xff] %vm1003_vm6, %v3507_v0  ;;  %5106 = vrcp.f32 %v3729_v57  ;;  %v4371_v31 = vmul.f32 -1.442695, %v6831_v11  ;;  %v5091_v43 = vpop.eup %5090  ;;  %v6842_v49 = vadd.f32 %v6591_v24, %v3572_v12 }
 0x249   : > { %3979 = vst.msk [vmem:[%s6705_s12 + $0x34] sm:$0xf] %vm3965_vm7, %v4431_v26  ;;  %5108 = vrcp.f32 %v3732_v13  ;;  %v5093_v29 = vpop.eup %5092  ;;  %v3823_v30 = vmul.f32 %v5091_v43, %v6710_v17  ;;  %v3570_v27 = vld [vmem:[#allocation2 + $0xe0] sm:$0xff] }
 0x24a   : > { %5110 = vpow2.f32 %v4373_v61  ;;  %v5095_v55 = vpop.eup %5094  ;;  %v3821_v46 = vmul.f32 %v5093_v29, %v6716_v36  ;;  %v4376_v63 = vmul.f32 -1.442695, %v6842_v49  ;;  %v6848_v32 = vadd.f32 %v6591_v24, %v3570_v27  ;;  %v3573_v17 = vld [vmem:[#allocation2 + $0xf8] sm:$0xff] }
 0x24b   : > { %5112 = vpow2.f32 %v4371_v31  ;;  %v5097_v34 = vpop.eup %5096  ;;  %v4436_v51 = vpack.c.bf16 %v3823_v30, %v3823_v30  ;;  %v3824_v10 = vmul.f32 %v5095_v55, %v6723_v19  ;;  %v6852_v36 = vadd.f32 %v6591_v24, %v3573_v17 }
 0x24c   : > { %v5099_v22 = vpop.eup %5098  ;;  %v4434_v4 = vpack.c.bf16 %v3821_v46, %v3821_v46  ;;  %v3822_v56 = vmul.f32 %v5097_v34, %v6731_v6  ;;  %5114 = vpow2.f32 %v4376_v63  ;;  %v4374_v54 = vmul.f32 -1.442695, %v6848_v32 }
 0x24d   : > { %v5101_v14 = vpop.eup %5100  ;;  %3984 = vst.msk [vmem:[%s6705_s12 + $0x48] sm:$0xf] %vm3965_vm7, %v4436_v51  ;;  %v4437_v8 = vpack.c.bf16 %v3824_v10, %v3824_v10  ;;  %v3730_v19 = vadd.f32 1.0, %v5099_v22  ;;  %v4377_v45 = vmul.f32 -1.442695, %v6852_v36 }
 0x24e   : > { %3982 = vst.msk [vmem:[%s6705_s12 + $0x40] sm:$0xf] %vm3965_vm7, %v4434_v4  ;;  %v4435_v21 = vpack.c.bf16 %v3822_v56, %v3822_v56  ;;  %v3735_v35 = vadd.f32 1.0, %v5101_v14  ;;  %v5103_v6 = vpop.eup %5102 }
 0x24f   : > { %v3571_v23 = vld [vmem:[#allocation2 + $0xe8] sm:$0xff]  ;;  %3985 = vst.msk [vmem:[%s6705_s12 + $0x4c] sm:$0xf] %vm3965_vm7, %v4437_v8  ;;  %5116 = vrcp.f32 %v3730_v19  ;;  %v3733_v3 = vadd.f32 1.0, %v5103_v6 }
 0x250   : > { %v6860_v25 = vadd.f32 %v6591_v24, %v3571_v23  ;;  %3983 = vst.msk [vmem:[%s6705_s12 + $0x44] sm:$0xf] %vm3965_vm7, %v4435_v21  ;;  %5118 = vrcp.f32 %v3735_v35 }
 0x251   : > { %v5105_v50 = vpop.eup %5104  ;;  %5120 = vpow2.f32 %v4374_v54 }
 0x252   : > { %v4375_v16 = vmul.f32 -1.442695, %v6860_v25  ;;  %v5107_v41 = vpop.eup %5106  ;;  %v3827_v59 = vmul.f32 %v5105_v50, %v6751_v38  ;;  %5122 = vrcp.f32 %v3733_v3 }
 0x253   : > { %v5109_v24 = vpop.eup %5108  ;;  %v3825_v47 = vmul.f32 %v5107_v41, %v6757_v2  ;;  %5124 = vpow2.f32 %v4377_v45 }
 0x254   : > { %v5111_v7 = vpop.eup %5110  ;;  %v4440_v1 = vpack.c.bf16 %v3827_v59, %v3827_v59  ;;  %v3828_v28 = vmul.f32 %v5109_v24, %v6771_v44  ;;  %5126 = vpow2.f32 %v4375_v16 }
 0x255   : > { %v5113_v62 = vpop.eup %5112  ;;  %v4438_v15 = vpack.c.bf16 %v3825_v47, %v3825_v47  ;;  %v3736_v20 = vadd.f32 1.0, %v5111_v7 }
 0x256   : > { %3988 = vst.msk [vmem:[%s6705_s12 + $0x58] sm:$0xf] %vm3965_vm7, %v4440_v1  ;;  %v4441_v42 = vpack.c.bf16 %v3828_v28, %v3828_v28  ;;  %v3734_v38 = vadd.f32 1.0, %v5113_v62  ;;  %v5115_v52 = vpop.eup %5114 }
 0x257   : > { %3986 = vst.msk [vmem:[%s6705_s12 + $0x50] sm:$0xf] %vm3965_vm7, %v4438_v15  ;;  %5128 = vrcp.f32 %v3736_v20  ;;  %v3739_v2 = vadd.f32 1.0, %v5115_v52 }
 0x258   : > { %3989 = vst.msk [vmem:[%s6705_s12 + $0x5c] sm:$0xf] %vm3965_vm7, %v4441_v42  ;;  %5130 = vrcp.f32 %v3734_v38 }
 0x259   : > { %v5117_v37 = vpop.eup %5116  ;;  %5132 = vrcp.f32 %v3739_v2 }
 0x25a   : > { %v5119_v44 = vpop.eup %5118  ;;  %v3826_v9 = vmul.f32 %v5117_v37, %v6788_v39 }
 0x25b   : > { %v5121_v48 = vpop.eup %5120  ;;  %v3831_v18 = vmul.f32 %v5119_v44, %v6797_v58 }
 0x25c   : > { %v5123_v5 = vpop.eup %5122  ;;  %v4439_v53 = vpack.c.bf16 %v3826_v9, %v3826_v9  ;;  %v3737_v0 = vadd.f32 1.0, %v5121_v48 }
 0x25d   : > { %v5125_v33 = vpop.eup %5124  ;;  %v4444_v26 = vpack.c.bf16 %v3831_v18, %v3831_v18  ;;  %v3829_v57 = vmul.f32 %v5123_v5, %v6812_v60 }
 0x25e   : > { %v5127_v13 = vpop.eup %5126  ;;  %3987 = vst.msk [vmem:[%s6705_s12 + $0x54] sm:$0xf] %vm3965_vm7, %v4439_v53  ;;  %5134 = vrcp.f32 %v3737_v0  ;;  %v3740_v61 = vadd.f32 1.0, %v5125_v33 }
 0x25f   : > { %3992 = vst.msk [vmem:[%s6705_s12 + $0x68] sm:$0xf] %vm3965_vm7, %v4444_v26  ;;  %v4442_v39 = vpack.c.bf16 %v3829_v57, %v3829_v57  ;;  %v3738_v31 = vadd.f32 1.0, %v5127_v13 }
 0x260   : > { %5136 = vrcp.f32 %v3740_v61 }
 0x261   : > { %v5129_v58 = vpop.eup %5128  ;;  %3990 = vst.msk [vmem:[%s6705_s12 + $0x60] sm:$0xf] %vm3965_vm7, %v4442_v39  ;;  %5138 = vrcp.f32 %v3738_v31 }
 0x262   : > { %v5131_v43 = vpop.eup %5130  ;;  %v3832_v60 = vmul.f32 %v5129_v58, %v6824_v40 }
 0x263   : > { %v3830_v12 = vmul.f32 %v5131_v43, %v6831_v11  ;;  %v5133_v30 = vpop.eup %5132 }
 0x264   : > { %v4445_v29 = vpack.c.bf16 %v3832_v60, %v3832_v60  ;;  %v3835_v46 = vmul.f32 %v5133_v30, %v6842_v49 }
 0x265   : > { %v4443_v55 = vpack.c.bf16 %v3830_v12, %v3830_v12 }
 0x266   : > { %3993 = vst.msk [vmem:[%s6705_s12 + $0x6c] sm:$0xf] %vm3965_vm7, %v4445_v29  ;;  %v4448_v27 = vpack.c.bf16 %v3835_v46, %v3835_v46 }
 0x267   : > { %3991 = vst.msk [vmem:[%s6705_s12 + $0x64] sm:$0xf] %vm3965_vm7, %v4443_v55 }
 0x268   : > { %v5135_v34 = vpop.eup %5134  ;;  %3996 = vst.msk [vmem:[%s6705_s12 + $0x78] sm:$0xf] %vm3965_vm7, %v4448_v27 }
 0x269   : > { %v3833_v40 = vmul.f32 %v5135_v34, %v6848_v32 }
 0x26a   : > { %v5137_v11 = vpop.eup %5136 }
 0x26b   : > { %v5139_v51 = vpop.eup %5138  ;;  %v4446_v10 = vpack.c.bf16 %v3833_v40, %v3833_v40  ;;  %v3836_v63 = vmul.f32 %v5137_v11, %v6852_v36 }
 0x26c   : > { %v3834_v49 = vmul.f32 %v5139_v51, %v6860_v25 }
 0x26d   : > { %3994 = vst.msk [vmem:[%s6705_s12 + $0x70] sm:$0xf] %vm3965_vm7, %v4446_v10  ;;  %v4449_v17 = vpack.c.bf16 %v3836_v63, %v3836_v63 }
 0x26e   : > { %v4447_v32 = vpack.c.bf16 %v3834_v49, %v3834_v49 }
 0x26f   : > { %3997 = vst.msk [vmem:[%s6705_s12 + $0x7c] sm:$0xf] %vm3965_vm7, %v4449_v17 }
 0x270   : > { %3995 = vst.msk [vmem:[%s6705_s12 + $0x74] sm:$0xf] %vm3965_vm7, %v4447_v32 }
 0x271   : > { %5153 = shalt.err (!%p5150_p5)
}
 0x272   : > { %s5154_s29 = scalar_lea.hbm %s6905_s16, 2048  ;;  %s5158_s10 = scalar_lea.hbm %s6966_s5, 4096 }
 0x273   : > { %p5155_p6 = scmp.ne.s32.totalorder %s6905_s16, %s5154_s29  ;;  %p5159_p10 = scmp.lt.u32.totalorder %s6905_s16, %s6966_s5 }
 0x274   : > { %p5160_p11 = scmp.lt.u32.totalorder %s5158_s10, %s5154_s29  ;;  %p5162_p13 = scmp.lt.u32.totalorder %s5154_s29, %s6905_s16 }
 0x275   : > { %p5156_p7 = pnand %p5155_p6, %p5294_p4 }
 0x276   : > { %p5161_p12 = por %p5160_p11, %p5159_p10 }
 0x277   : > { %p5157_p9 = pneg %p5156_p7 }
 0x278   : > { %p5163_p0 = por %p5162_p13, %p5161_p12 }
 0x27a   : > { %p5164_p1 = pnand %p5163_p0, %p5157_p9 }
 0x27c   : > { %5167 = shalt.err (!%p5164_p1)
}
 0x27d   : > { %s5222_s13 = smov 64   ;;  %s5223_s9 = smov 4  }
 0x27e   : > { %4912 = dma.vmem_to_hbm [thread:$0]  (%p5294_p4), %s6907_s14, 2048, %s6905_s16, %s6915_s21, %s5222_s13, %s5222_s13, %s5223_s9  }
 0x27f PF: > { %p4918_p2 = scmp.ge.s32.totalorder %s5218_s23, 2  ;;  %s4030_s15 = sand.u32 1, %s5198_s18  }
 0x280   : > { %s4031_s24 = scalar_lea.sflag [#allocation4], %s4030_s15 }
 0x281   : > { %p4915_p3 = pnand %p4918_p2, %p5301_p8 }
 0x283   : > { %5193 = dma.done.wait (!%p4915_p3), %s4031_s24, 2048  }
 0x284   : > { %5195 = vsyncadd (!%p4915_p3), %s4031_s24, 4294965248  ;;  %s18_s23 = sadd.s32 1, %s5218_s23   ;;  %s7107_s18 = smov %s5202_s19 }
 0x285   : > { %p15_p5 = scmp.ge.s32.totalorder %s18_s23, 4   ;;  %s7108_s19 = smov %s5206_s20 }
 0x286   : > { %s7109_s20 = smov %s5307_s6  ;;  %s7110_s21 = smov %s5214_s22 }
 0x287   : > { %s7111_s22 = smov %s7113_s26  ;;  %17 = sbr.rel (!%p15_p5) target bundleno = 4 (0x4), region = 83 }
 0x28e   :  { %4036 = vsyncpa [#allocation4], 1 }
 0x28f   :  { %4038 = vsyncpa [#allocation4 + $0x1], 1 }

</bundles_post_ra>
